<compile_context>
chip_gen: v5e
topology: v5e:2x2
jax: 0.10.0
libtpu: 0.0.40
codegen_flags: <defaults>
</compile_context>

<pallas_src>
import jax
import jax.numpy as jnp
from jax.experimental import pallas as pl
from jax.experimental.pallas import tpu as pltpu


def _round_up(x, m):
    return ((x + m - 1) // m) * m


def _pick_batch_tile(n, max_tile=8):
    """Largest divisor of n (<= max_tile) that still leaves >=2 grid steps."""
    best = 1
    for bt in range(1, min(n, max_tile) + 1):
        if n % bt == 0 and (n // bt >= 2 or (n == bt == 1)):
            best = bt
    return best


def _make_drc_block_kernel(size, cins, couts, act_rows, H, W, pad, B_tile,
                           mm_dtype):
    """Fused per-batch-tile kernel (all static config baked in)."""
    HW = H * W
    bufw = HW + 2 * pad          # per-image flat activation width (lane axis)
    C0 = cins[0]

    def kernel(*refs):
        # refs = (x, w_0..w_{s-1}, b_0..b_{s-1}, slopes, out, act, patches)
        x_ref = refs[0]                                # (B_tile, C0, HW) f32
        w_refs = refs[1:1 + size]                      # (cout_i, 25*cin_i) bf16
        b_refs = refs[1 + size:1 + 2 * size]           # (cout_i, 1) f32
        slope_ref = refs[1 + 2 * size]                 # (size,) f32 in SMEM
        out_ref = refs[2 + 2 * size]                   # (B_tile, C0, HW) f32
        act_ref = refs[3 + 2 * size]                   # (act_rows, B_tile*bufw)
        pat_ref = refs[4 + 2 * size]                   # (25*c_last, B_tile*HW)

        # Column index of every flattened pixel; horizontal taps must mask the
        # columns that would bleed into the neighbouring image row (W=16<<128,
        # so masking beats a per-row physical column halo here).
        col = jax.lax.broadcasted_iota(jnp.int32, (1, HW), 1) % W
        col_mask = {dw: jnp.logical_and(col + dw >= 0, col + dw < W)
                    for dw in (-2, -1, 1, 2)}          # hoisted out of loops

        # Zero ONLY the halo lane strips (per image).  The [pad, pad+HW)
        # interior of every used row and every patches row is fully rewritten
        # each grid step, so no full-buffer memset and no program_id==0 gate
        # (which would break under megacore grid sharding).
        zhalo = jnp.zeros((act_rows, pad), mm_dtype)
        for b in range(B_tile):
            act_ref[:, b * bufw: b * bufw + pad] = zhalo
            act_ref[:, b * bufw + pad + HW: (b + 1) * bufw] = zhalo

        def emit_taps(n_rows, chan_base):
            """Append the 25 shifted taps of act rows [0:n_rows] (the newest
            channel group, global channels [chan_base, chan_base+n_rows)) into
            the incremental im2col patches scratch."""
            base = 25 * chan_base
            for kh in range(5):
                dh = kh - 2
                for kw in range(5):
                    dw = kw - 2
                    t = kh * 5 + kw
                    for b in range(B_tile):
                        s = b * bufw + pad + dh * W + dw   # static lane offset
                        tap = act_ref[0:n_rows, s:s + HW]
                        if dw != 0:
                            tap = jnp.where(col_mask[dw], tap,
                                            jnp.zeros_like(tap))
                        pat_ref[base + t * n_rows: base + (t + 1) * n_rows,
                                b * HW:(b + 1) * HW] = tap

        # Group 0: the input image(s) (cast once to the matmul dtype).
        for b in range(B_tile):
            act_ref[0:C0, b * bufw + pad: b * bufw + pad + HW] = \
                x_ref[b].astype(mm_dtype)
        emit_taps(C0, 0)

        prev = None            # previous intermediate node's f32 PReLU output
        c_off = C0             # channels materialised in the patches scratch
        for i in range(size):
            cout = couts[i]
            k_i = 25 * cins[i]                         # contiguous valid rows
            # ONE matmul per node over the whole (taps x channels) contraction.
            acc = jnp.dot(w_refs[i][...], pat_ref[0:k_i, :],
                          preferred_element_type=jnp.float32)
            acc = acc + b_refs[i][...]                 # folded bias (f32)

            # PyTorch `out_val +=` carry: intermediate node i>0 adds the
            # previous node's PReLU output before its own PReLU (f32 exact).
            if 0 < i < size - 1:
                acc = acc + prev

            a = slope_ref[i]                           # SMEM scalar PReLU slope
            acc = jnp.where(acc >= 0.0, acc, a * acc)

            if i < size - 1:
                # torch.cat([in_val, out_val], 1): stage the new channels in the
                # halo'd act buffer, then append only THEIR taps (reuse older).
                for b in range(B_tile):
                    act_ref[0:cout, b * bufw + pad: b * bufw + pad + HW] = \
                        acc[:, b * HW:(b + 1) * HW].astype(mm_dtype)
                emit_taps(cout, c_off)
                prev = acc
                c_off += cout
            else:
                # Final node: residual add with the original input (f32).
                for b in range(B_tile):
                    out_ref[b] = acc[:, b * HW:(b + 1) * HW] + x_ref[b]

    return kernel


def init_params(key, channel_in, size=3):
    """Deterministic synthetic parameters, PyTorch layouts (same as __init__)."""
    params = []
    for i in range(size):
        cin = int((1 + i * 0.5) * channel_in)
        cout = int(channel_in / 2.0) if i != size - 1 else channel_in
        key, k1, k2, k3, k4 = jax.random.split(key, 5)
        w3 = 0.1 * jax.random.normal(k1, (cout, cin, 3, 3), jnp.float32)
        b3 = 0.1 * jax.random.normal(k2, (cout,), jnp.float32)
        w5 = 0.1 * jax.random.normal(k3, (cout, cin, 5, 5), jnp.float32)
        b5 = 0.1 * jax.random.normal(k4, (cout,), jnp.float32)
        prelu_a = 0.25                                  # nn.PReLU default init
        params.append((w3, b3, w5, b5, prelu_a))
    return params


def drc_block_forward(x_nchw, params, alphas_block, batch_tile=None,
                      matmul_dtype=jnp.bfloat16):
    """Exact forward of _DRC_block_DNAS.  x_nchw: (N, C, H, W) float32 NCHW."""
    x = jnp.asarray(x_nchw, jnp.float32)
    N, C0, H, W = x.shape
    size = len(params)
    assert len(alphas_block) == size

    cins = [int((1 + i * 0.5) * C0) for i in range(size)]
    couts = [int(C0 / 2.0) if i != size - 1 else C0 for i in range(size)]
    # Channel groups appended to the concat buffer: the input, then each
    # intermediate node's output (the final node's output is never re-consumed).
    group_sizes = [C0] + couts[:size - 1]
    group_starts = [0]
    for gs in group_sizes[:-1]:
        group_starts.append(group_starts[-1] + gs)
    c_last = cins[size - 1]                    # channels feeding the final node
    HW = H * W
    pad = _round_up(2 * W + 2, 128)            # lane-aligned flat spatial halo
    bufw = HW + 2 * pad
    act_rows = _round_up(max(group_sizes), 8)

    B_tile = batch_tile if batch_tile is not None else _pick_batch_tile(N)
    assert N % B_tile == 0

    # --- fold alpha3*conv3 + alpha5*conv5 into ONE 5x5 conv per node and pack
    # its weight as (cout, 25*cin) in [group][tap][channel] order, i.e.
    # column = 25*group_start + (kh*5+kw)*group_size + (ci - group_start),
    # matching the incremental im2col patches scratch built in the kernel.
    w_arrs, b_arrs, slope_list = [], [], []
    for i, ((w3, b3, w5, b5, prelu_a), (a3, a5)) in enumerate(
            zip(params, alphas_block)):
        cin, cout = cins[i], couts[i]
        w3p = jnp.pad(jnp.asarray(w3, jnp.float32),
                      ((0, 0), (0, 0), (1, 1), (1, 1)))        # 3x3 -> 5x5
        w_comb = a3 * w3p + a5 * jnp.asarray(w5, jnp.float32)  # (cout,cin,5,5)
        b_comb = (a3 * jnp.asarray(b3, jnp.float32)
                  + a5 * jnp.asarray(b5, jnp.float32))
        blocks = []
        for g in range(i + 1):                 # groups 0..i exactly cover cin
            gs, gn = group_starts[g], group_sizes[g]
            blk = jnp.transpose(w_comb[:, gs:gs + gn], (0, 2, 3, 1))
            blocks.append(blk.reshape(cout, 25 * gn))
        w_arrs.append(jnp.concatenate(blocks, axis=1).astype(matmul_dtype))
        b_arrs.append(b_comb.reshape(cout, 1))
        slope_list.append(prelu_a)
    slopes = jnp.asarray(slope_list, jnp.float32)      # (size,) -> SMEM

    x_flat = x.reshape(N, C0, HW)              # lane-dense NC(HW), free reshape

    kernel = _make_drc_block_kernel(size, cins, couts, act_rows, H, W, pad,
                                    B_tile, matmul_dtype)

    in_specs = [pl.BlockSpec((B_tile, C0, HW), lambda n: (n, 0, 0))]
    in_specs += [pl.BlockSpec(w.shape, lambda n: (0, 0)) for w in w_arrs]
    in_specs += [pl.BlockSpec(b.shape, lambda n: (0, 0)) for b in b_arrs]
    in_specs += [pl.BlockSpec(memory_space=pltpu.MemorySpace.SMEM)]   # slopes

    flops_per_img = sum(2 * couts[i] * 25 * cins[i] * HW for i in range(size))
    bytes_w = sum(int(w.size) * w.dtype.itemsize for w in w_arrs)
    cost = pl.CostEstimate(
        flops=int(N * flops_per_img),
        transcendentals=0,
        bytes_accessed=int(2 * N * C0 * HW * 4 + bytes_w),
    )

    out = pl.pallas_call(
        kernel,
        out_shape=jax.ShapeDtypeStruct((N, C0, HW), jnp.float32),
        grid_spec=pltpu.PrefetchScalarGridSpec(
            num_scalar_prefetch=0,
            grid=(N // B_tile,),                      # B_tile images per step
            in_specs=in_specs,
            out_specs=pl.BlockSpec((B_tile, C0, HW), lambda n: (n, 0, 0)),
            scratch_shapes=[
                # halo'd activation staging buffer (only the newest channels)
                pltpu.VMEM((act_rows, B_tile * bufw), matmul_dtype),
                # incremental im2col patches: [group][tap][channel] x pixels
                pltpu.VMEM((25 * c_last, B_tile * HW), matmul_dtype),
            ],
        ),
        compiler_params=pltpu.CompilerParams(
            dimension_semantics=("parallel",),         # megacore split on v7x
        ),
        cost_estimate=cost,
    )(x_flat, *w_arrs, *b_arrs, slopes)

    return out.reshape(N, C0, H, W)


def drc_block_reference(x, params, alphas_block):
    """Pure-JAX f32 reference with the exact PyTorch forward semantics."""
    size = len(params)
    dn = ('NCHW', 'OIHW', 'NCHW')

    def prelu(v, a):
        return jnp.where(v >= 0.0, v, a * v)

    def conv(v, w, b, p):
        y = jax.lax.conv_general_dilated(v, w, (1, 1), [(p, p), (p, p)],
                                         dimension_numbers=dn)
        return y + b[None, :, None, None]

    residual = x
    in_val = x
    out_val = 0.0
    for i in range(size - 1):
        w3, b3, w5, b5, a = params[i]
        a3, a5 = alphas_block[i]
        out_val = (out_val + a3 * conv(in_val, w3, b3, 1)
                   + a5 * conv(in_val, w5, b5, 2))
        out_val = prelu(out_val, a)
        in_val = jnp.concatenate([in_val, out_val], axis=1)
    w3, b3, w5, b5, a = params[-1]
    a3, a5 = alphas_block[-1]
    out_f = a3 * conv(in_val, w3, b3, 1) + a5 * conv(in_val, w5, b5, 2)
    return prelu(out_f, a) + residual


if __name__ == "__main__":
    key = jax.random.PRNGKey(0)
    kx, kxb, kp = jax.random.split(key, 3)

    channel_in, size = 4, 3
    params = init_params(kp, channel_in, size=size)
    # DNAS architecture mixing coefficients: one (alpha3, alpha5) pair per node
    alphas_block = [(0.6, 0.4), (0.3, 0.7), (0.5, 0.5)]

    # --- main demo: batch=2, B_tile=1 (keeps 2 parallel grid steps) ----------
    x = jax.random.normal(kx, (2, channel_in, 16, 16), jnp.float32)   # NCHW
    out = drc_block_forward(x, params, alphas_block)
    jax.block_until_ready(out)
    assert out.shape == x.shape and out.dtype == jnp.float32
    ref = drc_block_reference(x, params, alphas_block)
    err = float(jnp.max(jnp.abs(out - ref)))
    # bf16 matmul operands give ~1e-2 abs error at these magnitudes.
    assert err < 0.1, f"kernel/reference mismatch: max abs err = {err}"

    # --- batched-grid-step path: batch=4, 2 images per step ------------------
    xb = jax.random.normal(kxb, (4, channel_in, 16, 16), jnp.float32)
    outb = drc_block_forward(xb, params, alphas_block, batch_tile=2)
    jax.block_until_ready(outb)
    refb = drc_block_reference(xb, params, alphas_block)
    errb = float(jnp.max(jnp.abs(outb - refb)))
    assert errb < 0.1, f"batched kernel mismatch: max abs err = {errb}"

    print("KERNEL_OK")
</pallas_src>

<mosaic_0001>
module attributes {stable_mosaic.version = 11 : i64} {
  func.func @kernel(%arg0: i32, %arg1: memref<1x4x256xf32, #tpu.memory_space<vmem>>, %arg2: memref<2x100xbf16, #tpu.memory_space<vmem>>, %arg3: memref<2x150xbf16, #tpu.memory_space<vmem>>, %arg4: memref<4x200xbf16, #tpu.memory_space<vmem>>, %arg5: memref<2x1xf32, #tpu.memory_space<vmem>>, %arg6: memref<2x1xf32, #tpu.memory_space<vmem>>, %arg7: memref<4x1xf32, #tpu.memory_space<vmem>>, %arg8: memref<3xf32, #tpu.memory_space<smem>>, %arg9: memref<1x4x256xf32, #tpu.memory_space<vmem>>, %arg10: memref<8x512xbf16, #tpu.memory_space<vmem>>, %arg11: memref<200x256xbf16, #tpu.memory_space<vmem>>) attributes {dimension_semantics = [#tpu.dimension_semantics<parallel>], iteration_bounds = array<i64: 2>, scalar_prefetch = 0 : i64, scratch_operands = 2 : i64, tpu.core_type = #tpu.core_type<tc>, window_params = [{transform_indices = @transform_0, window_bounds = array<i64: 1, 4, 256>}, {pipeline_mode = #tpu.pipeline_mode<synchronous>, transform_indices = @transform_1, window_bounds = array<i64: 2, 100>}, {pipeline_mode = #tpu.pipeline_mode<synchronous>, transform_indices = @transform_2, window_bounds = array<i64: 2, 150>}, {pipeline_mode = #tpu.pipeline_mode<synchronous>, transform_indices = @transform_3, window_bounds = array<i64: 4, 200>}, {pipeline_mode = #tpu.pipeline_mode<synchronous>, transform_indices = @transform_4, window_bounds = array<i64: 2, 1>}, {pipeline_mode = #tpu.pipeline_mode<synchronous>, transform_indices = @transform_5, window_bounds = array<i64: 2, 1>}, {pipeline_mode = #tpu.pipeline_mode<synchronous>, transform_indices = @transform_6, window_bounds = array<i64: 4, 1>}, {transform_indices = @transform_7, window_bounds = array<i64: 3>}, {transform_indices = @transform_8, window_bounds = array<i64: 1, 4, 256>}]} {
    %0 = tpu.iota {dimensions = array<i32: 1>} : vector<1x256xi32>
    %c16_i32 = arith.constant 16 : i32
    %c0_i32 = arith.constant 0 : i32
    %1 = arith.cmpi eq, %c16_i32, %c0_i32 : i32
    %c1_i32 = arith.constant 1 : i32
    %2 = arith.select %1, %c1_i32, %c16_i32 : i32
    %3 = vector.broadcast %2 : i32 to vector<1x256xi32>
    %4 = arith.remsi %0, %3 : vector<1x256xi32>
    %c0_i32_0 = arith.constant 0 : i32
    %5 = vector.broadcast %c0_i32_0 : i32 to vector<1x256xi32>
    %6 = arith.cmpi ne, %4, %5 : vector<1x256xi32>
    %c0_i32_1 = arith.constant 0 : i32
    %7 = vector.broadcast %c0_i32_1 : i32 to vector<1x256xi32>
    %8 = arith.cmpi slt, %4, %7 : vector<1x256xi32>
    %c0_i32_2 = arith.constant 0 : i32
    %9 = arith.cmpi slt, %2, %c0_i32_2 : i32
    %10 = vector.broadcast %9 : i1 to vector<1x256xi1>
    %11 = vector.broadcast %10 : vector<1x256xi1> to vector<1x256xi1>
    %12 = arith.xori %8, %11 : vector<1x256xi1>
    %13 = arith.andi %12, %6 : vector<1x256xi1>
    %14 = vector.broadcast %2 : i32 to vector<1x256xi32>
    %15 = arith.addi %4, %14 : vector<1x256xi32>
    %16 = arith.select %13, %15, %4 : vector<1x256xi1>, vector<1x256xi32>
    %c-2_i32 = arith.constant -2 : i32
    %17 = vector.broadcast %c-2_i32 : i32 to vector<1x256xi32>
    %18 = arith.addi %16, %17 : vector<1x256xi32>
    %c0_i32_3 = arith.constant 0 : i32
    %19 = vector.broadcast %c0_i32_3 : i32 to vector<1x256xi32>
    %20 = arith.cmpi sge, %18, %19 : vector<1x256xi32>
    %c-2_i32_4 = arith.constant -2 : i32
    %21 = vector.broadcast %c-2_i32_4 : i32 to vector<1x256xi32>
    %22 = arith.addi %16, %21 : vector<1x256xi32>
    %c16_i32_5 = arith.constant 16 : i32
    %23 = vector.broadcast %c16_i32_5 : i32 to vector<1x256xi32>
    %24 = arith.cmpi slt, %22, %23 : vector<1x256xi32>
    %25 = arith.andi %20, %24 : vector<1x256xi1>
    %c-1_i32 = arith.constant -1 : i32
    %26 = vector.broadcast %c-1_i32 : i32 to vector<1x256xi32>
    %27 = arith.addi %16, %26 : vector<1x256xi32>
    %c0_i32_6 = arith.constant 0 : i32
    %28 = vector.broadcast %c0_i32_6 : i32 to vector<1x256xi32>
    %29 = arith.cmpi sge, %27, %28 : vector<1x256xi32>
    %c-1_i32_7 = arith.constant -1 : i32
    %30 = vector.broadcast %c-1_i32_7 : i32 to vector<1x256xi32>
    %31 = arith.addi %16, %30 : vector<1x256xi32>
    %c16_i32_8 = arith.constant 16 : i32
    %32 = vector.broadcast %c16_i32_8 : i32 to vector<1x256xi32>
    %33 = arith.cmpi slt, %31, %32 : vector<1x256xi32>
    %34 = arith.andi %29, %33 : vector<1x256xi1>
    %c1_i32_9 = arith.constant 1 : i32
    %35 = vector.broadcast %c1_i32_9 : i32 to vector<1x256xi32>
    %36 = arith.addi %16, %35 : vector<1x256xi32>
    %c0_i32_10 = arith.constant 0 : i32
    %37 = vector.broadcast %c0_i32_10 : i32 to vector<1x256xi32>
    %38 = arith.cmpi sge, %36, %37 : vector<1x256xi32>
    %c1_i32_11 = arith.constant 1 : i32
    %39 = vector.broadcast %c1_i32_11 : i32 to vector<1x256xi32>
    %40 = arith.addi %16, %39 : vector<1x256xi32>
    %c16_i32_12 = arith.constant 16 : i32
    %41 = vector.broadcast %c16_i32_12 : i32 to vector<1x256xi32>
    %42 = arith.cmpi slt, %40, %41 : vector<1x256xi32>
    %43 = arith.andi %38, %42 : vector<1x256xi1>
    %c2_i32 = arith.constant 2 : i32
    %44 = vector.broadcast %c2_i32 : i32 to vector<1x256xi32>
    %45 = arith.addi %16, %44 : vector<1x256xi32>
    %c0_i32_13 = arith.constant 0 : i32
    %46 = vector.broadcast %c0_i32_13 : i32 to vector<1x256xi32>
    %47 = arith.cmpi sge, %45, %46 : vector<1x256xi32>
    %c2_i32_14 = arith.constant 2 : i32
    %48 = vector.broadcast %c2_i32_14 : i32 to vector<1x256xi32>
    %49 = arith.addi %16, %48 : vector<1x256xi32>
    %c16_i32_15 = arith.constant 16 : i32
    %50 = vector.broadcast %c16_i32_15 : i32 to vector<1x256xi32>
    %51 = arith.cmpi slt, %49, %50 : vector<1x256xi32>
    %52 = arith.andi %47, %51 : vector<1x256xi1>
    %cst = arith.constant 0.000000e+00 : bf16
    %53 = vector.broadcast %cst : bf16 to vector<8x128xbf16>
    %c0 = arith.constant 0 : index
    %c0_16 = arith.constant 0 : index
    %54 = vector.load %arg10[%c0, %c0_16] : memref<8x512xbf16, #tpu.memory_space<vmem>>, vector<8x128xbf16>
    tpu.vector_store %arg10[%c0, %c0_16], %53 {strides = array<i32>} : memref<8x512xbf16, #tpu.memory_space<vmem>>, vector<8x128xbf16>,
    %c0_17 = arith.constant 0 : index
    %c384 = arith.constant 384 : index
    %55 = vector.load %arg10[%c0_17, %c384] : memref<8x512xbf16, #tpu.memory_space<vmem>>, vector<8x128xbf16>
    tpu.vector_store %arg10[%c0_17, %c384], %53 {strides = array<i32>} : memref<8x512xbf16, #tpu.memory_space<vmem>>, vector<8x128xbf16>,
    %c0_18 = arith.constant 0 : index
    %c0_19 = arith.constant 0 : index
    %c0_20 = arith.constant 0 : index
    %56 = vector.load %arg1[%c0_18, %c0_19, %c0_20] : memref<1x4x256xf32, #tpu.memory_space<vmem>>, vector<1x4x256xf32>
    %57 = vector.shape_cast %56 : vector<1x4x256xf32> to vector<4x256xf32>
    %58 = arith.truncf %57 : vector<4x256xf32> to vector<4x256xbf16>
    %c0_21 = arith.constant 0 : index
    %c128 = arith.constant 128 : index
    %59 = vector.load %arg10[%c0_21, %c128] : memref<8x512xbf16, #tpu.memory_space<vmem>>, vector<4x256xbf16>
    tpu.vector_store %arg10[%c0_21, %c128], %58 {strides = array<i32>} : memref<8x512xbf16, #tpu.memory_space<vmem>>, vector<4x256xbf16>,
    %c0_22 = arith.constant 0 : index
    %c94 = arith.constant 94 : index
    %60 = vector.load %arg10[%c0_22, %c94] : memref<8x512xbf16, #tpu.memory_space<vmem>>, vector<4x256xbf16>
    %cst_23 = arith.constant 0.000000e+00 : bf16
    %61 = vector.broadcast %cst_23 : bf16 to vector<4x256xbf16>
    %62 = vector.shape_cast %25 : vector<1x256xi1> to vector<1x256xi1>
    %63 = vector.broadcast %62 : vector<1x256xi1> to vector<4x256xi1>
    %64 = arith.select %63, %60, %61 : vector<4x256xi1>, vector<4x256xbf16>
    %c0_24 = arith.constant 0 : index
    %c0_25 = arith.constant 0 : index
    %65 = vector.load %arg11[%c0_24, %c0_25] : memref<200x256xbf16, #tpu.memory_space<vmem>>, vector<4x256xbf16>
    tpu.vector_store %arg11[%c0_24, %c0_25], %64 {strides = array<i32>} : memref<200x256xbf16, #tpu.memory_space<vmem>>, vector<4x256xbf16>,
    %c0_26 = arith.constant 0 : index
    %c95 = arith.constant 95 : index
    %66 = vector.load %arg10[%c0_26, %c95] : memref<8x512xbf16, #tpu.memory_space<vmem>>, vector<4x256xbf16>
    %cst_27 = arith.constant 0.000000e+00 : bf16
    %67 = vector.broadcast %cst_27 : bf16 to vector<4x256xbf16>
    %68 = vector.shape_cast %34 : vector<1x256xi1> to vector<1x256xi1>
    %69 = vector.broadcast %68 : vector<1x256xi1> to vector<4x256xi1>
    %70 = arith.select %69, %66, %67 : vector<4x256xi1>, vector<4x256xbf16>
    %c4 = arith.constant 4 : index
    %c0_28 = arith.constant 0 : index
    %71 = vector.load %arg11[%c4, %c0_28] : memref<200x256xbf16, #tpu.memory_space<vmem>>, vector<4x256xbf16>
    tpu.vector_store %arg11[%c4, %c0_28], %70 {strides = array<i32>} : memref<200x256xbf16, #tpu.memory_space<vmem>>, vector<4x256xbf16>,
    %c0_29 = arith.constant 0 : index
    %c96 = arith.constant 96 : index
    %72 = vector.load %arg10[%c0_29, %c96] : memref<8x512xbf16, #tpu.memory_space<vmem>>, vector<4x256xbf16>
    %c8 = arith.constant 8 : index
    %c0_30 = arith.constant 0 : index
    %73 = vector.load %arg11[%c8, %c0_30] : memref<200x256xbf16, #tpu.memory_space<vmem>>, vector<4x256xbf16>
    tpu.vector_store %arg11[%c8, %c0_30], %72 {strides = array<i32>} : memref<200x256xbf16, #tpu.memory_space<vmem>>, vector<4x256xbf16>,
    %c0_31 = arith.constant 0 : index
    %c97 = arith.constant 97 : index
    %74 = vector.load %arg10[%c0_31, %c97] : memref<8x512xbf16, #tpu.memory_space<vmem>>, vector<4x256xbf16>
    %cst_32 = arith.constant 0.000000e+00 : bf16
    %75 = vector.broadcast %cst_32 : bf16 to vector<4x256xbf16>
    %76 = vector.shape_cast %43 : vector<1x256xi1> to vector<1x256xi1>
    %77 = vector.broadcast %76 : vector<1x256xi1> to vector<4x256xi1>
    %78 = arith.select %77, %74, %75 : vector<4x256xi1>, vector<4x256xbf16>
    %c12 = arith.constant 12 : index
    %c0_33 = arith.constant 0 : index
    %79 = vector.load %arg11[%c12, %c0_33] : memref<200x256xbf16, #tpu.memory_space<vmem>>, vector<4x256xbf16>
    tpu.vector_store %arg11[%c12, %c0_33], %78 {strides = array<i32>} : memref<200x256xbf16, #tpu.memory_space<vmem>>, vector<4x256xbf16>,
    %c0_34 = arith.constant 0 : index
    %c98 = arith.constant 98 : index
    %80 = vector.load %arg10[%c0_34, %c98] : memref<8x512xbf16, #tpu.memory_space<vmem>>, vector<4x256xbf16>
    %cst_35 = arith.constant 0.000000e+00 : bf16
    %81 = vector.broadcast %cst_35 : bf16 to vector<4x256xbf16>
    %82 = vector.shape_cast %52 : vector<1x256xi1> to vector<1x256xi1>
    %83 = vector.broadcast %82 : vector<1x256xi1> to vector<4x256xi1>
    %84 = arith.select %83, %80, %81 : vector<4x256xi1>, vector<4x256xbf16>
    %c16 = arith.constant 16 : index
    %c0_36 = arith.constant 0 : index
    %85 = vector.load %arg11[%c16, %c0_36] : memref<200x256xbf16, #tpu.memory_space<vmem>>, vector<4x256xbf16>
    tpu.vector_store %arg11[%c16, %c0_36], %84 {strides = array<i32>} : memref<200x256xbf16, #tpu.memory_space<vmem>>, vector<4x256xbf16>,
    %c0_37 = arith.constant 0 : index
    %c110 = arith.constant 110 : index
    %86 = vector.load %arg10[%c0_37, %c110] : memref<8x512xbf16, #tpu.memory_space<vmem>>, vector<4x256xbf16>
    %cst_38 = arith.constant 0.000000e+00 : bf16
    %87 = vector.broadcast %cst_38 : bf16 to vector<4x256xbf16>
    %88 = vector.shape_cast %25 : vector<1x256xi1> to vector<1x256xi1>
    %89 = vector.broadcast %88 : vector<1x256xi1> to vector<4x256xi1>
    %90 = arith.select %89, %86, %87 : vector<4x256xi1>, vector<4x256xbf16>
    %c20 = arith.constant 20 : index
    %c0_39 = arith.constant 0 : index
    %91 = vector.load %arg11[%c20, %c0_39] : memref<200x256xbf16, #tpu.memory_space<vmem>>, vector<4x256xbf16>
    tpu.vector_store %arg11[%c20, %c0_39], %90 {strides = array<i32>} : memref<200x256xbf16, #tpu.memory_space<vmem>>, vector<4x256xbf16>,
    %c0_40 = arith.constant 0 : index
    %c111 = arith.constant 111 : index
    %92 = vector.load %arg10[%c0_40, %c111] : memref<8x512xbf16, #tpu.memory_space<vmem>>, vector<4x256xbf16>
    %cst_41 = arith.constant 0.000000e+00 : bf16
    %93 = vector.broadcast %cst_41 : bf16 to vector<4x256xbf16>
    %94 = vector.shape_cast %34 : vector<1x256xi1> to vector<1x256xi1>
    %95 = vector.broadcast %94 : vector<1x256xi1> to vector<4x256xi1>
    %96 = arith.select %95, %92, %93 : vector<4x256xi1>, vector<4x256xbf16>
    %c24 = arith.constant 24 : index
    %c0_42 = arith.constant 0 : index
    %97 = vector.load %arg11[%c24, %c0_42] : memref<200x256xbf16, #tpu.memory_space<vmem>>, vector<4x256xbf16>
    tpu.vector_store %arg11[%c24, %c0_42], %96 {strides = array<i32>} : memref<200x256xbf16, #tpu.memory_space<vmem>>, vector<4x256xbf16>,
    %c0_43 = arith.constant 0 : index
    %c112 = arith.constant 112 : index
    %98 = vector.load %arg10[%c0_43, %c112] : memref<8x512xbf16, #tpu.memory_space<vmem>>, vector<4x256xbf16>
    %c28 = arith.constant 28 : index
    %c0_44 = arith.constant 0 : index
    %99 = vector.load %arg11[%c28, %c0_44] : memref<200x256xbf16, #tpu.memory_space<vmem>>, vector<4x256xbf16>
    tpu.vector_store %arg11[%c28, %c0_44], %98 {strides = array<i32>} : memref<200x256xbf16, #tpu.memory_space<vmem>>, vector<4x256xbf16>,
    %c0_45 = arith.constant 0 : index
    %c113 = arith.constant 113 : index
    %100 = vector.load %arg10[%c0_45, %c113] : memref<8x512xbf16, #tpu.memory_space<vmem>>, vector<4x256xbf16>
    %cst_46 = arith.constant 0.000000e+00 : bf16
    %101 = vector.broadcast %cst_46 : bf16 to vector<4x256xbf16>
    %102 = vector.shape_cast %43 : vector<1x256xi1> to vector<1x256xi1>
    %103 = vector.broadcast %102 : vector<1x256xi1> to vector<4x256xi1>
    %104 = arith.select %103, %100, %101 : vector<4x256xi1>, vector<4x256xbf16>
    %c32 = arith.constant 32 : index
    %c0_47 = arith.constant 0 : index
    %105 = vector.load %arg11[%c32, %c0_47] : memref<200x256xbf16, #tpu.memory_space<vmem>>, vector<4x256xbf16>
    tpu.vector_store %arg11[%c32, %c0_47], %104 {strides = array<i32>} : memref<200x256xbf16, #tpu.memory_space<vmem>>, vector<4x256xbf16>,
    %c0_48 = arith.constant 0 : index
    %c114 = arith.constant 114 : index
    %106 = vector.load %arg10[%c0_48, %c114] : memref<8x512xbf16, #tpu.memory_space<vmem>>, vector<4x256xbf16>
    %cst_49 = arith.constant 0.000000e+00 : bf16
    %107 = vector.broadcast %cst_49 : bf16 to vector<4x256xbf16>
    %108 = vector.shape_cast %52 : vector<1x256xi1> to vector<1x256xi1>
    %109 = vector.broadcast %108 : vector<1x256xi1> to vector<4x256xi1>
    %110 = arith.select %109, %106, %107 : vector<4x256xi1>, vector<4x256xbf16>
    %c36 = arith.constant 36 : index
    %c0_50 = arith.constant 0 : index
    %111 = vector.load %arg11[%c36, %c0_50] : memref<200x256xbf16, #tpu.memory_space<vmem>>, vector<4x256xbf16>
    tpu.vector_store %arg11[%c36, %c0_50], %110 {strides = array<i32>} : memref<200x256xbf16, #tpu.memory_space<vmem>>, vector<4x256xbf16>,
    %c0_51 = arith.constant 0 : index
    %c126 = arith.constant 126 : index
    %112 = vector.load %arg10[%c0_51, %c126] : memref<8x512xbf16, #tpu.memory_space<vmem>>, vector<4x256xbf16>
    %cst_52 = arith.constant 0.000000e+00 : bf16
    %113 = vector.broadcast %cst_52 : bf16 to vector<4x256xbf16>
    %114 = vector.shape_cast %25 : vector<1x256xi1> to vector<1x256xi1>
    %115 = vector.broadcast %114 : vector<1x256xi1> to vector<4x256xi1>
    %116 = arith.select %115, %112, %113 : vector<4x256xi1>, vector<4x256xbf16>
    %c40 = arith.constant 40 : index
    %c0_53 = arith.constant 0 : index
    %117 = vector.load %arg11[%c40, %c0_53] : memref<200x256xbf16, #tpu.memory_space<vmem>>, vector<4x256xbf16>
    tpu.vector_store %arg11[%c40, %c0_53], %116 {strides = array<i32>} : memref<200x256xbf16, #tpu.memory_space<vmem>>, vector<4x256xbf16>,
    %c0_54 = arith.constant 0 : index
    %c127 = arith.constant 127 : index
    %118 = vector.load %arg10[%c0_54, %c127] : memref<8x512xbf16, #tpu.memory_space<vmem>>, vector<4x256xbf16>
    %cst_55 = arith.constant 0.000000e+00 : bf16
    %119 = vector.broadcast %cst_55 : bf16 to vector<4x256xbf16>
    %120 = vector.shape_cast %34 : vector<1x256xi1> to vector<1x256xi1>
    %121 = vector.broadcast %120 : vector<1x256xi1> to vector<4x256xi1>
    %122 = arith.select %121, %118, %119 : vector<4x256xi1>, vector<4x256xbf16>
    %c44 = arith.constant 44 : index
    %c0_56 = arith.constant 0 : index
    %123 = vector.load %arg11[%c44, %c0_56] : memref<200x256xbf16, #tpu.memory_space<vmem>>, vector<4x256xbf16>
    tpu.vector_store %arg11[%c44, %c0_56], %122 {strides = array<i32>} : memref<200x256xbf16, #tpu.memory_space<vmem>>, vector<4x256xbf16>,
    %c0_57 = arith.constant 0 : index
    %c128_58 = arith.constant 128 : index
    %124 = vector.load %arg10[%c0_57, %c128_58] : memref<8x512xbf16, #tpu.memory_space<vmem>>, vector<4x256xbf16>
    %c48 = arith.constant 48 : index
    %c0_59 = arith.constant 0 : index
    %125 = vector.load %arg11[%c48, %c0_59] : memref<200x256xbf16, #tpu.memory_space<vmem>>, vector<4x256xbf16>
    tpu.vector_store %arg11[%c48, %c0_59], %124 {strides = array<i32>} : memref<200x256xbf16, #tpu.memory_space<vmem>>, vector<4x256xbf16>,
    %c0_60 = arith.constant 0 : index
    %c129 = arith.constant 129 : index
    %126 = vector.load %arg10[%c0_60, %c129] : memref<8x512xbf16, #tpu.memory_space<vmem>>, vector<4x256xbf16>
    %cst_61 = arith.constant 0.000000e+00 : bf16
    %127 = vector.broadcast %cst_61 : bf16 to vector<4x256xbf16>
    %128 = vector.shape_cast %43 : vector<1x256xi1> to vector<1x256xi1>
    %129 = vector.broadcast %128 : vector<1x256xi1> to vector<4x256xi1>
    %130 = arith.select %129, %126, %127 : vector<4x256xi1>, vector<4x256xbf16>
    %c52 = arith.constant 52 : index
    %c0_62 = arith.constant 0 : index
    %131 = vector.load %arg11[%c52, %c0_62] : memref<200x256xbf16, #tpu.memory_space<vmem>>, vector<4x256xbf16>
    tpu.vector_store %arg11[%c52, %c0_62], %130 {strides = array<i32>} : memref<200x256xbf16, #tpu.memory_space<vmem>>, vector<4x256xbf16>,
    %c0_63 = arith.constant 0 : index
    %c130 = arith.constant 130 : index
    %132 = vector.load %arg10[%c0_63, %c130] : memref<8x512xbf16, #tpu.memory_space<vmem>>, vector<4x256xbf16>
    %cst_64 = arith.constant 0.000000e+00 : bf16
    %133 = vector.broadcast %cst_64 : bf16 to vector<4x256xbf16>
    %134 = vector.shape_cast %52 : vector<1x256xi1> to vector<1x256xi1>
    %135 = vector.broadcast %134 : vector<1x256xi1> to vector<4x256xi1>
    %136 = arith.select %135, %132, %133 : vector<4x256xi1>, vector<4x256xbf16>
    %c56 = arith.constant 56 : index
    %c0_65 = arith.constant 0 : index
    %137 = vector.load %arg11[%c56, %c0_65] : memref<200x256xbf16, #tpu.memory_space<vmem>>, vector<4x256xbf16>
    tpu.vector_store %arg11[%c56, %c0_65], %136 {strides = array<i32>} : memref<200x256xbf16, #tpu.memory_space<vmem>>, vector<4x256xbf16>,
    %c0_66 = arith.constant 0 : index
    %c142 = arith.constant 142 : index
    %138 = vector.load %arg10[%c0_66, %c142] : memref<8x512xbf16, #tpu.memory_space<vmem>>, vector<4x256xbf16>
    %cst_67 = arith.constant 0.000000e+00 : bf16
    %139 = vector.broadcast %cst_67 : bf16 to vector<4x256xbf16>
    %140 = vector.shape_cast %25 : vector<1x256xi1> to vector<1x256xi1>
    %141 = vector.broadcast %140 : vector<1x256xi1> to vector<4x256xi1>
    %142 = arith.select %141, %138, %139 : vector<4x256xi1>, vector<4x256xbf16>
    %c60 = arith.constant 60 : index
    %c0_68 = arith.constant 0 : index
    %143 = vector.load %arg11[%c60, %c0_68] : memref<200x256xbf16, #tpu.memory_space<vmem>>, vector<4x256xbf16>
    tpu.vector_store %arg11[%c60, %c0_68], %142 {strides = array<i32>} : memref<200x256xbf16, #tpu.memory_space<vmem>>, vector<4x256xbf16>,
    %c0_69 = arith.constant 0 : index
    %c143 = arith.constant 143 : index
    %144 = vector.load %arg10[%c0_69, %c143] : memref<8x512xbf16, #tpu.memory_space<vmem>>, vector<4x256xbf16>
    %cst_70 = arith.constant 0.000000e+00 : bf16
    %145 = vector.broadcast %cst_70 : bf16 to vector<4x256xbf16>
    %146 = vector.shape_cast %34 : vector<1x256xi1> to vector<1x256xi1>
    %147 = vector.broadcast %146 : vector<1x256xi1> to vector<4x256xi1>
    %148 = arith.select %147, %144, %145 : vector<4x256xi1>, vector<4x256xbf16>
    %c64 = arith.constant 64 : index
    %c0_71 = arith.constant 0 : index
    %149 = vector.load %arg11[%c64, %c0_71] : memref<200x256xbf16, #tpu.memory_space<vmem>>, vector<4x256xbf16>
    tpu.vector_store %arg11[%c64, %c0_71], %148 {strides = array<i32>} : memref<200x256xbf16, #tpu.memory_space<vmem>>, vector<4x256xbf16>,
    %c0_72 = arith.constant 0 : index
    %c144 = arith.constant 144 : index
    %150 = vector.load %arg10[%c0_72, %c144] : memref<8x512xbf16, #tpu.memory_space<vmem>>, vector<4x256xbf16>
    %c68 = arith.constant 68 : index
    %c0_73 = arith.constant 0 : index
    %151 = vector.load %arg11[%c68, %c0_73] : memref<200x256xbf16, #tpu.memory_space<vmem>>, vector<4x256xbf16>
    tpu.vector_store %arg11[%c68, %c0_73], %150 {strides = array<i32>} : memref<200x256xbf16, #tpu.memory_space<vmem>>, vector<4x256xbf16>,
    %c0_74 = arith.constant 0 : index
    %c145 = arith.constant 145 : index
    %152 = vector.load %arg10[%c0_74, %c145] : memref<8x512xbf16, #tpu.memory_space<vmem>>, vector<4x256xbf16>
    %cst_75 = arith.constant 0.000000e+00 : bf16
    %153 = vector.broadcast %cst_75 : bf16 to vector<4x256xbf16>
    %154 = vector.shape_cast %43 : vector<1x256xi1> to vector<1x256xi1>
    %155 = vector.broadcast %154 : vector<1x256xi1> to vector<4x256xi1>
    %156 = arith.select %155, %152, %153 : vector<4x256xi1>, vector<4x256xbf16>
    %c72 = arith.constant 72 : index
    %c0_76 = arith.constant 0 : index
    %157 = vector.load %arg11[%c72, %c0_76] : memref<200x256xbf16, #tpu.memory_space<vmem>>, vector<4x256xbf16>
    tpu.vector_store %arg11[%c72, %c0_76], %156 {strides = array<i32>} : memref<200x256xbf16, #tpu.memory_space<vmem>>, vector<4x256xbf16>,
    %c0_77 = arith.constant 0 : index
    %c146 = arith.constant 146 : index
    %158 = vector.load %arg10[%c0_77, %c146] : memref<8x512xbf16, #tpu.memory_space<vmem>>, vector<4x256xbf16>
    %cst_78 = arith.constant 0.000000e+00 : bf16
    %159 = vector.broadcast %cst_78 : bf16 to vector<4x256xbf16>
    %160 = vector.shape_cast %52 : vector<1x256xi1> to vector<1x256xi1>
    %161 = vector.broadcast %160 : vector<1x256xi1> to vector<4x256xi1>
    %162 = arith.select %161, %158, %159 : vector<4x256xi1>, vector<4x256xbf16>
    %c76 = arith.constant 76 : index
    %c0_79 = arith.constant 0 : index
    %163 = vector.load %arg11[%c76, %c0_79] : memref<200x256xbf16, #tpu.memory_space<vmem>>, vector<4x256xbf16>
    tpu.vector_store %arg11[%c76, %c0_79], %162 {strides = array<i32>} : memref<200x256xbf16, #tpu.memory_space<vmem>>, vector<4x256xbf16>,
    %c0_80 = arith.constant 0 : index
    %c158 = arith.constant 158 : index
    %164 = vector.load %arg10[%c0_80, %c158] : memref<8x512xbf16, #tpu.memory_space<vmem>>, vector<4x256xbf16>
    %cst_81 = arith.constant 0.000000e+00 : bf16
    %165 = vector.broadcast %cst_81 : bf16 to vector<4x256xbf16>
    %166 = vector.shape_cast %25 : vector<1x256xi1> to vector<1x256xi1>
    %167 = vector.broadcast %166 : vector<1x256xi1> to vector<4x256xi1>
    %168 = arith.select %167, %164, %165 : vector<4x256xi1>, vector<4x256xbf16>
    %c80 = arith.constant 80 : index
    %c0_82 = arith.constant 0 : index
    %169 = vector.load %arg11[%c80, %c0_82] : memref<200x256xbf16, #tpu.memory_space<vmem>>, vector<4x256xbf16>
    tpu.vector_store %arg11[%c80, %c0_82], %168 {strides = array<i32>} : memref<200x256xbf16, #tpu.memory_space<vmem>>, vector<4x256xbf16>,
    %c0_83 = arith.constant 0 : index
    %c159 = arith.constant 159 : index
    %170 = vector.load %arg10[%c0_83, %c159] : memref<8x512xbf16, #tpu.memory_space<vmem>>, vector<4x256xbf16>
    %cst_84 = arith.constant 0.000000e+00 : bf16
    %171 = vector.broadcast %cst_84 : bf16 to vector<4x256xbf16>
    %172 = vector.shape_cast %34 : vector<1x256xi1> to vector<1x256xi1>
    %173 = vector.broadcast %172 : vector<1x256xi1> to vector<4x256xi1>
    %174 = arith.select %173, %170, %171 : vector<4x256xi1>, vector<4x256xbf16>
    %c84 = arith.constant 84 : index
    %c0_85 = arith.constant 0 : index
    %175 = vector.load %arg11[%c84, %c0_85] : memref<200x256xbf16, #tpu.memory_space<vmem>>, vector<4x256xbf16>
    tpu.vector_store %arg11[%c84, %c0_85], %174 {strides = array<i32>} : memref<200x256xbf16, #tpu.memory_space<vmem>>, vector<4x256xbf16>,
    %c0_86 = arith.constant 0 : index
    %c160 = arith.constant 160 : index
    %176 = vector.load %arg10[%c0_86, %c160] : memref<8x512xbf16, #tpu.memory_space<vmem>>, vector<4x256xbf16>
    %c88 = arith.constant 88 : index
    %c0_87 = arith.constant 0 : index
    %177 = vector.load %arg11[%c88, %c0_87] : memref<200x256xbf16, #tpu.memory_space<vmem>>, vector<4x256xbf16>
    tpu.vector_store %arg11[%c88, %c0_87], %176 {strides = array<i32>} : memref<200x256xbf16, #tpu.memory_space<vmem>>, vector<4x256xbf16>,
    %c0_88 = arith.constant 0 : index
    %c161 = arith.constant 161 : index
    %178 = vector.load %arg10[%c0_88, %c161] : memref<8x512xbf16, #tpu.memory_space<vmem>>, vector<4x256xbf16>
    %cst_89 = arith.constant 0.000000e+00 : bf16
    %179 = vector.broadcast %cst_89 : bf16 to vector<4x256xbf16>
    %180 = vector.shape_cast %43 : vector<1x256xi1> to vector<1x256xi1>
    %181 = vector.broadcast %180 : vector<1x256xi1> to vector<4x256xi1>
    %182 = arith.select %181, %178, %179 : vector<4x256xi1>, vector<4x256xbf16>
    %c92 = arith.constant 92 : index
    %c0_90 = arith.constant 0 : index
    %183 = vector.load %arg11[%c92, %c0_90] : memref<200x256xbf16, #tpu.memory_space<vmem>>, vector<4x256xbf16>
    tpu.vector_store %arg11[%c92, %c0_90], %182 {strides = array<i32>} : memref<200x256xbf16, #tpu.memory_space<vmem>>, vector<4x256xbf16>,
    %c0_91 = arith.constant 0 : index
    %c162 = arith.constant 162 : index
    %184 = vector.load %arg10[%c0_91, %c162] : memref<8x512xbf16, #tpu.memory_space<vmem>>, vector<4x256xbf16>
    %cst_92 = arith.constant 0.000000e+00 : bf16
    %185 = vector.broadcast %cst_92 : bf16 to vector<4x256xbf16>
    %186 = vector.shape_cast %52 : vector<1x256xi1> to vector<1x256xi1>
    %187 = vector.broadcast %186 : vector<1x256xi1> to vector<4x256xi1>
    %188 = arith.select %187, %184, %185 : vector<4x256xi1>, vector<4x256xbf16>
    %c96_93 = arith.constant 96 : index
    %c0_94 = arith.constant 0 : index
    %189 = vector.load %arg11[%c96_93, %c0_94] : memref<200x256xbf16, #tpu.memory_space<vmem>>, vector<4x256xbf16>
    tpu.vector_store %arg11[%c96_93, %c0_94], %188 {strides = array<i32>} : memref<200x256xbf16, #tpu.memory_space<vmem>>, vector<4x256xbf16>,
    %c0_95 = arith.constant 0 : index
    %c0_96 = arith.constant 0 : index
    %190 = vector.load %arg2[%c0_95, %c0_96] : memref<2x100xbf16, #tpu.memory_space<vmem>>, vector<2x100xbf16>
    %c0_97 = arith.constant 0 : index
    %c0_98 = arith.constant 0 : index
    %191 = vector.load %arg11[%c0_97, %c0_98] : memref<200x256xbf16, #tpu.memory_space<vmem>>, vector<100x256xbf16>
    %cst_99 = arith.constant dense<0.000000e+00> : vector<2x256xf32>
    %192 = tpu.matmul %190, %191, %cst_99 {dimension_numbers = #tpu.dot_dimension_numbers<[1], [0], [0], [1], [0, 0, 1, 1], [], []>} : vector<2x100xbf16>, vector<100x256xbf16>, vector<2x256xf32> -> vector<2x256xf32>
    %c0_100 = arith.constant 0 : index
    %c0_101 = arith.constant 0 : index
    %193 = vector.load %arg5[%c0_100, %c0_101] : memref<2x1xf32, #tpu.memory_space<vmem>>, vector<2x1xf32>
    %194 = vector.broadcast %193 : vector<2x1xf32> to vector<2x256xf32>
    %195 = arith.addf %192, %194 : vector<2x256xf32>
    %c0_102 = arith.constant 0 : index
    %196 = memref.load %arg8[%c0_102] : memref<3xf32, #tpu.memory_space<smem>>
    %cst_103 = arith.constant 0.000000e+00 : f32
    %197 = vector.broadcast %cst_103 : f32 to vector<2x256xf32>
    %198 = arith.cmpf oge, %195, %197 : vector<2x256xf32>
    %199 = vector.broadcast %196 : f32 to vector<2x256xf32>
    %200 = arith.mulf %199, %195 : vector<2x256xf32>
    %201 = arith.select %198, %195, %200 : vector<2x256xi1>, vector<2x256xf32>
    %202 = arith.truncf %201 : vector<2x256xf32> to vector<2x256xbf16>
    %c0_104 = arith.constant 0 : index
    %c128_105 = arith.constant 128 : index
    %203 = vector.load %arg10[%c0_104, %c128_105] : memref<8x512xbf16, #tpu.memory_space<vmem>>, vector<2x256xbf16>
    tpu.vector_store %arg10[%c0_104, %c128_105], %202 {strides = array<i32>} : memref<8x512xbf16, #tpu.memory_space<vmem>>, vector<2x256xbf16>,
    %c0_106 = arith.constant 0 : index
    %c94_107 = arith.constant 94 : index
    %204 = vector.load %arg10[%c0_106, %c94_107] : memref<8x512xbf16, #tpu.memory_space<vmem>>, vector<2x256xbf16>
    %cst_108 = arith.constant 0.000000e+00 : bf16
    %205 = vector.broadcast %cst_108 : bf16 to vector<2x256xbf16>
    %206 = vector.shape_cast %25 : vector<1x256xi1> to vector<1x256xi1>
    %207 = vector.broadcast %206 : vector<1x256xi1> to vector<2x256xi1>
    %208 = arith.select %207, %204, %205 : vector<2x256xi1>, vector<2x256xbf16>
    %c100 = arith.constant 100 : index
    %c0_109 = arith.constant 0 : index
    %209 = vector.load %arg11[%c100, %c0_109] : memref<200x256xbf16, #tpu.memory_space<vmem>>, vector<2x256xbf16>
    tpu.vector_store %arg11[%c100, %c0_109], %208 {strides = array<i32>} : memref<200x256xbf16, #tpu.memory_space<vmem>>, vector<2x256xbf16>,
    %c0_110 = arith.constant 0 : index
    %c95_111 = arith.constant 95 : index
    %210 = vector.load %arg10[%c0_110, %c95_111] : memref<8x512xbf16, #tpu.memory_space<vmem>>, vector<2x256xbf16>
    %cst_112 = arith.constant 0.000000e+00 : bf16
    %211 = vector.broadcast %cst_112 : bf16 to vector<2x256xbf16>
    %212 = vector.shape_cast %34 : vector<1x256xi1> to vector<1x256xi1>
    %213 = vector.broadcast %212 : vector<1x256xi1> to vector<2x256xi1>
    %214 = arith.select %213, %210, %211 : vector<2x256xi1>, vector<2x256xbf16>
    %c102 = arith.constant 102 : index
    %c0_113 = arith.constant 0 : index
    %215 = vector.load %arg11[%c102, %c0_113] : memref<200x256xbf16, #tpu.memory_space<vmem>>, vector<2x256xbf16>
    tpu.vector_store %arg11[%c102, %c0_113], %214 {strides = array<i32>} : memref<200x256xbf16, #tpu.memory_space<vmem>>, vector<2x256xbf16>,
    %c0_114 = arith.constant 0 : index
    %c96_115 = arith.constant 96 : index
    %216 = vector.load %arg10[%c0_114, %c96_115] : memref<8x512xbf16, #tpu.memory_space<vmem>>, vector<2x256xbf16>
    %c104 = arith.constant 104 : index
    %c0_116 = arith.constant 0 : index
    %217 = vector.load %arg11[%c104, %c0_116] : memref<200x256xbf16, #tpu.memory_space<vmem>>, vector<2x256xbf16>
    tpu.vector_store %arg11[%c104, %c0_116], %216 {strides = array<i32>} : memref<200x256xbf16, #tpu.memory_space<vmem>>, vector<2x256xbf16>,
    %c0_117 = arith.constant 0 : index
    %c97_118 = arith.constant 97 : index
    %218 = vector.load %arg10[%c0_117, %c97_118] : memref<8x512xbf16, #tpu.memory_space<vmem>>, vector<2x256xbf16>
    %cst_119 = arith.constant 0.000000e+00 : bf16
    %219 = vector.broadcast %cst_119 : bf16 to vector<2x256xbf16>
    %220 = vector.shape_cast %43 : vector<1x256xi1> to vector<1x256xi1>
    %221 = vector.broadcast %220 : vector<1x256xi1> to vector<2x256xi1>
    %222 = arith.select %221, %218, %219 : vector<2x256xi1>, vector<2x256xbf16>
    %c106 = arith.constant 106 : index
    %c0_120 = arith.constant 0 : index
    %223 = vector.load %arg11[%c106, %c0_120] : memref<200x256xbf16, #tpu.memory_space<vmem>>, vector<2x256xbf16>
    tpu.vector_store %arg11[%c106, %c0_120], %222 {strides = array<i32>} : memref<200x256xbf16, #tpu.memory_space<vmem>>, vector<2x256xbf16>,
    %c0_121 = arith.constant 0 : index
    %c98_122 = arith.constant 98 : index
    %224 = vector.load %arg10[%c0_121, %c98_122] : memref<8x512xbf16, #tpu.memory_space<vmem>>, vector<2x256xbf16>
    %cst_123 = arith.constant 0.000000e+00 : bf16
    %225 = vector.broadcast %cst_123 : bf16 to vector<2x256xbf16>
    %226 = vector.shape_cast %52 : vector<1x256xi1> to vector<1x256xi1>
    %227 = vector.broadcast %226 : vector<1x256xi1> to vector<2x256xi1>
    %228 = arith.select %227, %224, %225 : vector<2x256xi1>, vector<2x256xbf16>
    %c108 = arith.constant 108 : index
    %c0_124 = arith.constant 0 : index
    %229 = vector.load %arg11[%c108, %c0_124] : memref<200x256xbf16, #tpu.memory_space<vmem>>, vector<2x256xbf16>
    tpu.vector_store %arg11[%c108, %c0_124], %228 {strides = array<i32>} : memref<200x256xbf16, #tpu.memory_space<vmem>>, vector<2x256xbf16>,
    %c0_125 = arith.constant 0 : index
    %c110_126 = arith.constant 110 : index
    %230 = vector.load %arg10[%c0_125, %c110_126] : memref<8x512xbf16, #tpu.memory_space<vmem>>, vector<2x256xbf16>
    %cst_127 = arith.constant 0.000000e+00 : bf16
    %231 = vector.broadcast %cst_127 : bf16 to vector<2x256xbf16>
    %232 = vector.shape_cast %25 : vector<1x256xi1> to vector<1x256xi1>
    %233 = vector.broadcast %232 : vector<1x256xi1> to vector<2x256xi1>
    %234 = arith.select %233, %230, %231 : vector<2x256xi1>, vector<2x256xbf16>
    %c110_128 = arith.constant 110 : index
    %c0_129 = arith.constant 0 : index
    %235 = vector.load %arg11[%c110_128, %c0_129] : memref<200x256xbf16, #tpu.memory_space<vmem>>, vector<2x256xbf16>
    tpu.vector_store %arg11[%c110_128, %c0_129], %234 {strides = array<i32>} : memref<200x256xbf16, #tpu.memory_space<vmem>>, vector<2x256xbf16>,
    %c0_130 = arith.constant 0 : index
    %c111_131 = arith.constant 111 : index
    %236 = vector.load %arg10[%c0_130, %c111_131] : memref<8x512xbf16, #tpu.memory_space<vmem>>, vector<2x256xbf16>
    %cst_132 = arith.constant 0.000000e+00 : bf16
    %237 = vector.broadcast %cst_132 : bf16 to vector<2x256xbf16>
    %238 = vector.shape_cast %34 : vector<1x256xi1> to vector<1x256xi1>
    %239 = vector.broadcast %238 : vector<1x256xi1> to vector<2x256xi1>
    %240 = arith.select %239, %236, %237 : vector<2x256xi1>, vector<2x256xbf16>
    %c112_133 = arith.constant 112 : index
    %c0_134 = arith.constant 0 : index
    %241 = vector.load %arg11[%c112_133, %c0_134] : memref<200x256xbf16, #tpu.memory_space<vmem>>, vector<2x256xbf16>
    tpu.vector_store %arg11[%c112_133, %c0_134], %240 {strides = array<i32>} : memref<200x256xbf16, #tpu.memory_space<vmem>>, vector<2x256xbf16>,
    %c0_135 = arith.constant 0 : index
    %c112_136 = arith.constant 112 : index
    %242 = vector.load %arg10[%c0_135, %c112_136] : memref<8x512xbf16, #tpu.memory_space<vmem>>, vector<2x256xbf16>
    %c114_137 = arith.constant 114 : index
    %c0_138 = arith.constant 0 : index
    %243 = vector.load %arg11[%c114_137, %c0_138] : memref<200x256xbf16, #tpu.memory_space<vmem>>, vector<2x256xbf16>
    tpu.vector_store %arg11[%c114_137, %c0_138], %242 {strides = array<i32>} : memref<200x256xbf16, #tpu.memory_space<vmem>>, vector<2x256xbf16>,
    %c0_139 = arith.constant 0 : index
    %c113_140 = arith.constant 113 : index
    %244 = vector.load %arg10[%c0_139, %c113_140] : memref<8x512xbf16, #tpu.memory_space<vmem>>, vector<2x256xbf16>
    %cst_141 = arith.constant 0.000000e+00 : bf16
    %245 = vector.broadcast %cst_141 : bf16 to vector<2x256xbf16>
    %246 = vector.shape_cast %43 : vector<1x256xi1> to vector<1x256xi1>
    %247 = vector.broadcast %246 : vector<1x256xi1> to vector<2x256xi1>
    %248 = arith.select %247, %244, %245 : vector<2x256xi1>, vector<2x256xbf16>
    %c116 = arith.constant 116 : index
    %c0_142 = arith.constant 0 : index
    %249 = vector.load %arg11[%c116, %c0_142] : memref<200x256xbf16, #tpu.memory_space<vmem>>, vector<2x256xbf16>
    tpu.vector_store %arg11[%c116, %c0_142], %248 {strides = array<i32>} : memref<200x256xbf16, #tpu.memory_space<vmem>>, vector<2x256xbf16>,
    %c0_143 = arith.constant 0 : index
    %c114_144 = arith.constant 114 : index
    %250 = vector.load %arg10[%c0_143, %c114_144] : memref<8x512xbf16, #tpu.memory_space<vmem>>, vector<2x256xbf16>
    %cst_145 = arith.constant 0.000000e+00 : bf16
    %251 = vector.broadcast %cst_145 : bf16 to vector<2x256xbf16>
    %252 = vector.shape_cast %52 : vector<1x256xi1> to vector<1x256xi1>
    %253 = vector.broadcast %252 : vector<1x256xi1> to vector<2x256xi1>
    %254 = arith.select %253, %250, %251 : vector<2x256xi1>, vector<2x256xbf16>
    %c118 = arith.constant 118 : index
    %c0_146 = arith.constant 0 : index
    %255 = vector.load %arg11[%c118, %c0_146] : memref<200x256xbf16, #tpu.memory_space<vmem>>, vector<2x256xbf16>
    tpu.vector_store %arg11[%c118, %c0_146], %254 {strides = array<i32>} : memref<200x256xbf16, #tpu.memory_space<vmem>>, vector<2x256xbf16>,
    %c0_147 = arith.constant 0 : index
    %c126_148 = arith.constant 126 : index
    %256 = vector.load %arg10[%c0_147, %c126_148] : memref<8x512xbf16, #tpu.memory_space<vmem>>, vector<2x256xbf16>
    %cst_149 = arith.constant 0.000000e+00 : bf16
    %257 = vector.broadcast %cst_149 : bf16 to vector<2x256xbf16>
    %258 = vector.shape_cast %25 : vector<1x256xi1> to vector<1x256xi1>
    %259 = vector.broadcast %258 : vector<1x256xi1> to vector<2x256xi1>
    %260 = arith.select %259, %256, %257 : vector<2x256xi1>, vector<2x256xbf16>
    %c120 = arith.constant 120 : index
    %c0_150 = arith.constant 0 : index
    %261 = vector.load %arg11[%c120, %c0_150] : memref<200x256xbf16, #tpu.memory_space<vmem>>, vector<2x256xbf16>
    tpu.vector_store %arg11[%c120, %c0_150], %260 {strides = array<i32>} : memref<200x256xbf16, #tpu.memory_space<vmem>>, vector<2x256xbf16>,
    %c0_151 = arith.constant 0 : index
    %c127_152 = arith.constant 127 : index
    %262 = vector.load %arg10[%c0_151, %c127_152] : memref<8x512xbf16, #tpu.memory_space<vmem>>, vector<2x256xbf16>
    %cst_153 = arith.constant 0.000000e+00 : bf16
    %263 = vector.broadcast %cst_153 : bf16 to vector<2x256xbf16>
    %264 = vector.shape_cast %34 : vector<1x256xi1> to vector<1x256xi1>
    %265 = vector.broadcast %264 : vector<1x256xi1> to vector<2x256xi1>
    %266 = arith.select %265, %262, %263 : vector<2x256xi1>, vector<2x256xbf16>
    %c122 = arith.constant 122 : index
    %c0_154 = arith.constant 0 : index
    %267 = vector.load %arg11[%c122, %c0_154] : memref<200x256xbf16, #tpu.memory_space<vmem>>, vector<2x256xbf16>
    tpu.vector_store %arg11[%c122, %c0_154], %266 {strides = array<i32>} : memref<200x256xbf16, #tpu.memory_space<vmem>>, vector<2x256xbf16>,
    %c0_155 = arith.constant 0 : index
    %c128_156 = arith.constant 128 : index
    %268 = vector.load %arg10[%c0_155, %c128_156] : memref<8x512xbf16, #tpu.memory_space<vmem>>, vector<2x256xbf16>
    %c124 = arith.constant 124 : index
    %c0_157 = arith.constant 0 : index
    %269 = vector.load %arg11[%c124, %c0_157] : memref<200x256xbf16, #tpu.memory_space<vmem>>, vector<2x256xbf16>
    tpu.vector_store %arg11[%c124, %c0_157], %268 {strides = array<i32>} : memref<200x256xbf16, #tpu.memory_space<vmem>>, vector<2x256xbf16>,
    %c0_158 = arith.constant 0 : index
    %c129_159 = arith.constant 129 : index
    %270 = vector.load %arg10[%c0_158, %c129_159] : memref<8x512xbf16, #tpu.memory_space<vmem>>, vector<2x256xbf16>
    %cst_160 = arith.constant 0.000000e+00 : bf16
    %271 = vector.broadcast %cst_160 : bf16 to vector<2x256xbf16>
    %272 = vector.shape_cast %43 : vector<1x256xi1> to vector<1x256xi1>
    %273 = vector.broadcast %272 : vector<1x256xi1> to vector<2x256xi1>
    %274 = arith.select %273, %270, %271 : vector<2x256xi1>, vector<2x256xbf16>
    %c126_161 = arith.constant 126 : index
    %c0_162 = arith.constant 0 : index
    %275 = vector.load %arg11[%c126_161, %c0_162] : memref<200x256xbf16, #tpu.memory_space<vmem>>, vector<2x256xbf16>
    tpu.vector_store %arg11[%c126_161, %c0_162], %274 {strides = array<i32>} : memref<200x256xbf16, #tpu.memory_space<vmem>>, vector<2x256xbf16>,
    %c0_163 = arith.constant 0 : index
    %c130_164 = arith.constant 130 : index
    %276 = vector.load %arg10[%c0_163, %c130_164] : memref<8x512xbf16, #tpu.memory_space<vmem>>, vector<2x256xbf16>
    %cst_165 = arith.constant 0.000000e+00 : bf16
    %277 = vector.broadcast %cst_165 : bf16 to vector<2x256xbf16>
    %278 = vector.shape_cast %52 : vector<1x256xi1> to vector<1x256xi1>
    %279 = vector.broadcast %278 : vector<1x256xi1> to vector<2x256xi1>
    %280 = arith.select %279, %276, %277 : vector<2x256xi1>, vector<2x256xbf16>
    %c128_166 = arith.constant 128 : index
    %c0_167 = arith.constant 0 : index
    %281 = vector.load %arg11[%c128_166, %c0_167] : memref<200x256xbf16, #tpu.memory_space<vmem>>, vector<2x256xbf16>
    tpu.vector_store %arg11[%c128_166, %c0_167], %280 {strides = array<i32>} : memref<200x256xbf16, #tpu.memory_space<vmem>>, vector<2x256xbf16>,
    %c0_168 = arith.constant 0 : index
    %c142_169 = arith.constant 142 : index
    %282 = vector.load %arg10[%c0_168, %c142_169] : memref<8x512xbf16, #tpu.memory_space<vmem>>, vector<2x256xbf16>
    %cst_170 = arith.constant 0.000000e+00 : bf16
    %283 = vector.broadcast %cst_170 : bf16 to vector<2x256xbf16>
    %284 = vector.shape_cast %25 : vector<1x256xi1> to vector<1x256xi1>
    %285 = vector.broadcast %284 : vector<1x256xi1> to vector<2x256xi1>
    %286 = arith.select %285, %282, %283 : vector<2x256xi1>, vector<2x256xbf16>
    %c130_171 = arith.constant 130 : index
    %c0_172 = arith.constant 0 : index
    %287 = vector.load %arg11[%c130_171, %c0_172] : memref<200x256xbf16, #tpu.memory_space<vmem>>, vector<2x256xbf16>
    tpu.vector_store %arg11[%c130_171, %c0_172], %286 {strides = array<i32>} : memref<200x256xbf16, #tpu.memory_space<vmem>>, vector<2x256xbf16>,
    %c0_173 = arith.constant 0 : index
    %c143_174 = arith.constant 143 : index
    %288 = vector.load %arg10[%c0_173, %c143_174] : memref<8x512xbf16, #tpu.memory_space<vmem>>, vector<2x256xbf16>
    %cst_175 = arith.constant 0.000000e+00 : bf16
    %289 = vector.broadcast %cst_175 : bf16 to vector<2x256xbf16>
    %290 = vector.shape_cast %34 : vector<1x256xi1> to vector<1x256xi1>
    %291 = vector.broadcast %290 : vector<1x256xi1> to vector<2x256xi1>
    %292 = arith.select %291, %288, %289 : vector<2x256xi1>, vector<2x256xbf16>
    %c132 = arith.constant 132 : index
    %c0_176 = arith.constant 0 : index
    %293 = vector.load %arg11[%c132, %c0_176] : memref<200x256xbf16, #tpu.memory_space<vmem>>, vector<2x256xbf16>
    tpu.vector_store %arg11[%c132, %c0_176], %292 {strides = array<i32>} : memref<200x256xbf16, #tpu.memory_space<vmem>>, vector<2x256xbf16>,
    %c0_177 = arith.constant 0 : index
    %c144_178 = arith.constant 144 : index
    %294 = vector.load %arg10[%c0_177, %c144_178] : memref<8x512xbf16, #tpu.memory_space<vmem>>, vector<2x256xbf16>
    %c134 = arith.constant 134 : index
    %c0_179 = arith.constant 0 : index
    %295 = vector.load %arg11[%c134, %c0_179] : memref<200x256xbf16, #tpu.memory_space<vmem>>, vector<2x256xbf16>
    tpu.vector_store %arg11[%c134, %c0_179], %294 {strides = array<i32>} : memref<200x256xbf16, #tpu.memory_space<vmem>>, vector<2x256xbf16>,
    %c0_180 = arith.constant 0 : index
    %c145_181 = arith.constant 145 : index
    %296 = vector.load %arg10[%c0_180, %c145_181] : memref<8x512xbf16, #tpu.memory_space<vmem>>, vector<2x256xbf16>
    %cst_182 = arith.constant 0.000000e+00 : bf16
    %297 = vector.broadcast %cst_182 : bf16 to vector<2x256xbf16>
    %298 = vector.shape_cast %43 : vector<1x256xi1> to vector<1x256xi1>
    %299 = vector.broadcast %298 : vector<1x256xi1> to vector<2x256xi1>
    %300 = arith.select %299, %296, %297 : vector<2x256xi1>, vector<2x256xbf16>
    %c136 = arith.constant 136 : index
    %c0_183 = arith.constant 0 : index
    %301 = vector.load %arg11[%c136, %c0_183] : memref<200x256xbf16, #tpu.memory_space<vmem>>, vector<2x256xbf16>
    tpu.vector_store %arg11[%c136, %c0_183], %300 {strides = array<i32>} : memref<200x256xbf16, #tpu.memory_space<vmem>>, vector<2x256xbf16>,
    %c0_184 = arith.constant 0 : index
    %c146_185 = arith.constant 146 : index
    %302 = vector.load %arg10[%c0_184, %c146_185] : memref<8x512xbf16, #tpu.memory_space<vmem>>, vector<2x256xbf16>
    %cst_186 = arith.constant 0.000000e+00 : bf16
    %303 = vector.broadcast %cst_186 : bf16 to vector<2x256xbf16>
    %304 = vector.shape_cast %52 : vector<1x256xi1> to vector<1x256xi1>
    %305 = vector.broadcast %304 : vector<1x256xi1> to vector<2x256xi1>
    %306 = arith.select %305, %302, %303 : vector<2x256xi1>, vector<2x256xbf16>
    %c138 = arith.constant 138 : index
    %c0_187 = arith.constant 0 : index
    %307 = vector.load %arg11[%c138, %c0_187] : memref<200x256xbf16, #tpu.memory_space<vmem>>, vector<2x256xbf16>
    tpu.vector_store %arg11[%c138, %c0_187], %306 {strides = array<i32>} : memref<200x256xbf16, #tpu.memory_space<vmem>>, vector<2x256xbf16>,
    %c0_188 = arith.constant 0 : index
    %c158_189 = arith.constant 158 : index
    %308 = vector.load %arg10[%c0_188, %c158_189] : memref<8x512xbf16, #tpu.memory_space<vmem>>, vector<2x256xbf16>
    %cst_190 = arith.constant 0.000000e+00 : bf16
    %309 = vector.broadcast %cst_190 : bf16 to vector<2x256xbf16>
    %310 = vector.shape_cast %25 : vector<1x256xi1> to vector<1x256xi1>
    %311 = vector.broadcast %310 : vector<1x256xi1> to vector<2x256xi1>
    %312 = arith.select %311, %308, %309 : vector<2x256xi1>, vector<2x256xbf16>
    %c140 = arith.constant 140 : index
    %c0_191 = arith.constant 0 : index
    %313 = vector.load %arg11[%c140, %c0_191] : memref<200x256xbf16, #tpu.memory_space<vmem>>, vector<2x256xbf16>
    tpu.vector_store %arg11[%c140, %c0_191], %312 {strides = array<i32>} : memref<200x256xbf16, #tpu.memory_space<vmem>>, vector<2x256xbf16>,
    %c0_192 = arith.constant 0 : index
    %c159_193 = arith.constant 159 : index
    %314 = vector.load %arg10[%c0_192, %c159_193] : memref<8x512xbf16, #tpu.memory_space<vmem>>, vector<2x256xbf16>
    %cst_194 = arith.constant 0.000000e+00 : bf16
    %315 = vector.broadcast %cst_194 : bf16 to vector<2x256xbf16>
    %316 = vector.shape_cast %34 : vector<1x256xi1> to vector<1x256xi1>
    %317 = vector.broadcast %316 : vector<1x256xi1> to vector<2x256xi1>
    %318 = arith.select %317, %314, %315 : vector<2x256xi1>, vector<2x256xbf16>
    %c142_195 = arith.constant 142 : index
    %c0_196 = arith.constant 0 : index
    %319 = vector.load %arg11[%c142_195, %c0_196] : memref<200x256xbf16, #tpu.memory_space<vmem>>, vector<2x256xbf16>
    tpu.vector_store %arg11[%c142_195, %c0_196], %318 {strides = array<i32>} : memref<200x256xbf16, #tpu.memory_space<vmem>>, vector<2x256xbf16>,
    %c0_197 = arith.constant 0 : index
    %c160_198 = arith.constant 160 : index
    %320 = vector.load %arg10[%c0_197, %c160_198] : memref<8x512xbf16, #tpu.memory_space<vmem>>, vector<2x256xbf16>
    %c144_199 = arith.constant 144 : index
    %c0_200 = arith.constant 0 : index
    %321 = vector.load %arg11[%c144_199, %c0_200] : memref<200x256xbf16, #tpu.memory_space<vmem>>, vector<2x256xbf16>
    tpu.vector_store %arg11[%c144_199, %c0_200], %320 {strides = array<i32>} : memref<200x256xbf16, #tpu.memory_space<vmem>>, vector<2x256xbf16>,
    %c0_201 = arith.constant 0 : index
    %c161_202 = arith.constant 161 : index
    %322 = vector.load %arg10[%c0_201, %c161_202] : memref<8x512xbf16, #tpu.memory_space<vmem>>, vector<2x256xbf16>
    %cst_203 = arith.constant 0.000000e+00 : bf16
    %323 = vector.broadcast %cst_203 : bf16 to vector<2x256xbf16>
    %324 = vector.shape_cast %43 : vector<1x256xi1> to vector<1x256xi1>
    %325 = vector.broadcast %324 : vector<1x256xi1> to vector<2x256xi1>
    %326 = arith.select %325, %322, %323 : vector<2x256xi1>, vector<2x256xbf16>
    %c146_204 = arith.constant 146 : index
    %c0_205 = arith.constant 0 : index
    %327 = vector.load %arg11[%c146_204, %c0_205] : memref<200x256xbf16, #tpu.memory_space<vmem>>, vector<2x256xbf16>
    tpu.vector_store %arg11[%c146_204, %c0_205], %326 {strides = array<i32>} : memref<200x256xbf16, #tpu.memory_space<vmem>>, vector<2x256xbf16>,
    %c0_206 = arith.constant 0 : index
    %c162_207 = arith.constant 162 : index
    %328 = vector.load %arg10[%c0_206, %c162_207] : memref<8x512xbf16, #tpu.memory_space<vmem>>, vector<2x256xbf16>
    %cst_208 = arith.constant 0.000000e+00 : bf16
    %329 = vector.broadcast %cst_208 : bf16 to vector<2x256xbf16>
    %330 = vector.shape_cast %52 : vector<1x256xi1> to vector<1x256xi1>
    %331 = vector.broadcast %330 : vector<1x256xi1> to vector<2x256xi1>
    %332 = arith.select %331, %328, %329 : vector<2x256xi1>, vector<2x256xbf16>
    %c148 = arith.constant 148 : index
    %c0_209 = arith.constant 0 : index
    %333 = vector.load %arg11[%c148, %c0_209] : memref<200x256xbf16, #tpu.memory_space<vmem>>, vector<2x256xbf16>
    tpu.vector_store %arg11[%c148, %c0_209], %332 {strides = array<i32>} : memref<200x256xbf16, #tpu.memory_space<vmem>>, vector<2x256xbf16>,
    %c0_210 = arith.constant 0 : index
    %c0_211 = arith.constant 0 : index
    %334 = vector.load %arg3[%c0_210, %c0_211] : memref<2x150xbf16, #tpu.memory_space<vmem>>, vector<2x150xbf16>
    %c0_212 = arith.constant 0 : index
    %c0_213 = arith.constant 0 : index
    %335 = vector.load %arg11[%c0_212, %c0_213] : memref<200x256xbf16, #tpu.memory_space<vmem>>, vector<150x256xbf16>
    %cst_214 = arith.constant dense<0.000000e+00> : vector<2x256xf32>
    %336 = tpu.matmul %334, %335, %cst_214 {dimension_numbers = #tpu.dot_dimension_numbers<[1], [0], [0], [1], [0, 0, 1, 1], [], []>} : vector<2x150xbf16>, vector<150x256xbf16>, vector<2x256xf32> -> vector<2x256xf32>
    %c0_215 = arith.constant 0 : index
    %c0_216 = arith.constant 0 : index
    %337 = vector.load %arg6[%c0_215, %c0_216] : memref<2x1xf32, #tpu.memory_space<vmem>>, vector<2x1xf32>
    %338 = vector.broadcast %337 : vector<2x1xf32> to vector<2x256xf32>
    %339 = arith.addf %336, %338 : vector<2x256xf32>
    %340 = arith.addf %339, %201 : vector<2x256xf32>
    %c1 = arith.constant 1 : index
    %341 = memref.load %arg8[%c1] : memref<3xf32, #tpu.memory_space<smem>>
    %cst_217 = arith.constant 0.000000e+00 : f32
    %342 = vector.broadcast %cst_217 : f32 to vector<2x256xf32>
    %343 = arith.cmpf oge, %340, %342 : vector<2x256xf32>
    %344 = vector.broadcast %341 : f32 to vector<2x256xf32>
    %345 = arith.mulf %344, %340 : vector<2x256xf32>
    %346 = arith.select %343, %340, %345 : vector<2x256xi1>, vector<2x256xf32>
    %347 = arith.truncf %346 : vector<2x256xf32> to vector<2x256xbf16>
    %c0_218 = arith.constant 0 : index
    %c128_219 = arith.constant 128 : index
    %348 = vector.load %arg10[%c0_218, %c128_219] : memref<8x512xbf16, #tpu.memory_space<vmem>>, vector<2x256xbf16>
    tpu.vector_store %arg10[%c0_218, %c128_219], %347 {strides = array<i32>} : memref<8x512xbf16, #tpu.memory_space<vmem>>, vector<2x256xbf16>,
    %c0_220 = arith.constant 0 : index
    %c94_221 = arith.constant 94 : index
    %349 = vector.load %arg10[%c0_220, %c94_221] : memref<8x512xbf16, #tpu.memory_space<vmem>>, vector<2x256xbf16>
    %cst_222 = arith.constant 0.000000e+00 : bf16
    %350 = vector.broadcast %cst_222 : bf16 to vector<2x256xbf16>
    %351 = vector.shape_cast %25 : vector<1x256xi1> to vector<1x256xi1>
    %352 = vector.broadcast %351 : vector<1x256xi1> to vector<2x256xi1>
    %353 = arith.select %352, %349, %350 : vector<2x256xi1>, vector<2x256xbf16>
    %c150 = arith.constant 150 : index
    %c0_223 = arith.constant 0 : index
    %354 = vector.load %arg11[%c150, %c0_223] : memref<200x256xbf16, #tpu.memory_space<vmem>>, vector<2x256xbf16>
    tpu.vector_store %arg11[%c150, %c0_223], %353 {strides = array<i32>} : memref<200x256xbf16, #tpu.memory_space<vmem>>, vector<2x256xbf16>,
    %c0_224 = arith.constant 0 : index
    %c95_225 = arith.constant 95 : index
    %355 = vector.load %arg10[%c0_224, %c95_225] : memref<8x512xbf16, #tpu.memory_space<vmem>>, vector<2x256xbf16>
    %cst_226 = arith.constant 0.000000e+00 : bf16
    %356 = vector.broadcast %cst_226 : bf16 to vector<2x256xbf16>
    %357 = vector.shape_cast %34 : vector<1x256xi1> to vector<1x256xi1>
    %358 = vector.broadcast %357 : vector<1x256xi1> to vector<2x256xi1>
    %359 = arith.select %358, %355, %356 : vector<2x256xi1>, vector<2x256xbf16>
    %c152 = arith.constant 152 : index
    %c0_227 = arith.constant 0 : index
    %360 = vector.load %arg11[%c152, %c0_227] : memref<200x256xbf16, #tpu.memory_space<vmem>>, vector<2x256xbf16>
    tpu.vector_store %arg11[%c152, %c0_227], %359 {strides = array<i32>} : memref<200x256xbf16, #tpu.memory_space<vmem>>, vector<2x256xbf16>,
    %c0_228 = arith.constant 0 : index
    %c96_229 = arith.constant 96 : index
    %361 = vector.load %arg10[%c0_228, %c96_229] : memref<8x512xbf16, #tpu.memory_space<vmem>>, vector<2x256xbf16>
    %c154 = arith.constant 154 : index
    %c0_230 = arith.constant 0 : index
    %362 = vector.load %arg11[%c154, %c0_230] : memref<200x256xbf16, #tpu.memory_space<vmem>>, vector<2x256xbf16>
    tpu.vector_store %arg11[%c154, %c0_230], %361 {strides = array<i32>} : memref<200x256xbf16, #tpu.memory_space<vmem>>, vector<2x256xbf16>,
    %c0_231 = arith.constant 0 : index
    %c97_232 = arith.constant 97 : index
    %363 = vector.load %arg10[%c0_231, %c97_232] : memref<8x512xbf16, #tpu.memory_space<vmem>>, vector<2x256xbf16>
    %cst_233 = arith.constant 0.000000e+00 : bf16
    %364 = vector.broadcast %cst_233 : bf16 to vector<2x256xbf16>
    %365 = vector.shape_cast %43 : vector<1x256xi1> to vector<1x256xi1>
    %366 = vector.broadcast %365 : vector<1x256xi1> to vector<2x256xi1>
    %367 = arith.select %366, %363, %364 : vector<2x256xi1>, vector<2x256xbf16>
    %c156 = arith.constant 156 : index
    %c0_234 = arith.constant 0 : index
    %368 = vector.load %arg11[%c156, %c0_234] : memref<200x256xbf16, #tpu.memory_space<vmem>>, vector<2x256xbf16>
    tpu.vector_store %arg11[%c156, %c0_234], %367 {strides = array<i32>} : memref<200x256xbf16, #tpu.memory_space<vmem>>, vector<2x256xbf16>,
    %c0_235 = arith.constant 0 : index
    %c98_236 = arith.constant 98 : index
    %369 = vector.load %arg10[%c0_235, %c98_236] : memref<8x512xbf16, #tpu.memory_space<vmem>>, vector<2x256xbf16>
    %cst_237 = arith.constant 0.000000e+00 : bf16
    %370 = vector.broadcast %cst_237 : bf16 to vector<2x256xbf16>
    %371 = vector.shape_cast %52 : vector<1x256xi1> to vector<1x256xi1>
    %372 = vector.broadcast %371 : vector<1x256xi1> to vector<2x256xi1>
    %373 = arith.select %372, %369, %370 : vector<2x256xi1>, vector<2x256xbf16>
    %c158_238 = arith.constant 158 : index
    %c0_239 = arith.constant 0 : index
    %374 = vector.load %arg11[%c158_238, %c0_239] : memref<200x256xbf16, #tpu.memory_space<vmem>>, vector<2x256xbf16>
    tpu.vector_store %arg11[%c158_238, %c0_239], %373 {strides = array<i32>} : memref<200x256xbf16, #tpu.memory_space<vmem>>, vector<2x256xbf16>,
    %c0_240 = arith.constant 0 : index
    %c110_241 = arith.constant 110 : index
    %375 = vector.load %arg10[%c0_240, %c110_241] : memref<8x512xbf16, #tpu.memory_space<vmem>>, vector<2x256xbf16>
    %cst_242 = arith.constant 0.000000e+00 : bf16
    %376 = vector.broadcast %cst_242 : bf16 to vector<2x256xbf16>
    %377 = vector.shape_cast %25 : vector<1x256xi1> to vector<1x256xi1>
    %378 = vector.broadcast %377 : vector<1x256xi1> to vector<2x256xi1>
    %379 = arith.select %378, %375, %376 : vector<2x256xi1>, vector<2x256xbf16>
    %c160_243 = arith.constant 160 : index
    %c0_244 = arith.constant 0 : index
    %380 = vector.load %arg11[%c160_243, %c0_244] : memref<200x256xbf16, #tpu.memory_space<vmem>>, vector<2x256xbf16>
    tpu.vector_store %arg11[%c160_243, %c0_244], %379 {strides = array<i32>} : memref<200x256xbf16, #tpu.memory_space<vmem>>, vector<2x256xbf16>,
    %c0_245 = arith.constant 0 : index
    %c111_246 = arith.constant 111 : index
    %381 = vector.load %arg10[%c0_245, %c111_246] : memref<8x512xbf16, #tpu.memory_space<vmem>>, vector<2x256xbf16>
    %cst_247 = arith.constant 0.000000e+00 : bf16
    %382 = vector.broadcast %cst_247 : bf16 to vector<2x256xbf16>
    %383 = vector.shape_cast %34 : vector<1x256xi1> to vector<1x256xi1>
    %384 = vector.broadcast %383 : vector<1x256xi1> to vector<2x256xi1>
    %385 = arith.select %384, %381, %382 : vector<2x256xi1>, vector<2x256xbf16>
    %c162_248 = arith.constant 162 : index
    %c0_249 = arith.constant 0 : index
    %386 = vector.load %arg11[%c162_248, %c0_249] : memref<200x256xbf16, #tpu.memory_space<vmem>>, vector<2x256xbf16>
    tpu.vector_store %arg11[%c162_248, %c0_249], %385 {strides = array<i32>} : memref<200x256xbf16, #tpu.memory_space<vmem>>, vector<2x256xbf16>,
    %c0_250 = arith.constant 0 : index
    %c112_251 = arith.constant 112 : index
    %387 = vector.load %arg10[%c0_250, %c112_251] : memref<8x512xbf16, #tpu.memory_space<vmem>>, vector<2x256xbf16>
    %c164 = arith.constant 164 : index
    %c0_252 = arith.constant 0 : index
    %388 = vector.load %arg11[%c164, %c0_252] : memref<200x256xbf16, #tpu.memory_space<vmem>>, vector<2x256xbf16>
    tpu.vector_store %arg11[%c164, %c0_252], %387 {strides = array<i32>} : memref<200x256xbf16, #tpu.memory_space<vmem>>, vector<2x256xbf16>,
    %c0_253 = arith.constant 0 : index
    %c113_254 = arith.constant 113 : index
    %389 = vector.load %arg10[%c0_253, %c113_254] : memref<8x512xbf16, #tpu.memory_space<vmem>>, vector<2x256xbf16>
    %cst_255 = arith.constant 0.000000e+00 : bf16
    %390 = vector.broadcast %cst_255 : bf16 to vector<2x256xbf16>
    %391 = vector.shape_cast %43 : vector<1x256xi1> to vector<1x256xi1>
    %392 = vector.broadcast %391 : vector<1x256xi1> to vector<2x256xi1>
    %393 = arith.select %392, %389, %390 : vector<2x256xi1>, vector<2x256xbf16>
    %c166 = arith.constant 166 : index
    %c0_256 = arith.constant 0 : index
    %394 = vector.load %arg11[%c166, %c0_256] : memref<200x256xbf16, #tpu.memory_space<vmem>>, vector<2x256xbf16>
    tpu.vector_store %arg11[%c166, %c0_256], %393 {strides = array<i32>} : memref<200x256xbf16, #tpu.memory_space<vmem>>, vector<2x256xbf16>,
    %c0_257 = arith.constant 0 : index
    %c114_258 = arith.constant 114 : index
    %395 = vector.load %arg10[%c0_257, %c114_258] : memref<8x512xbf16, #tpu.memory_space<vmem>>, vector<2x256xbf16>
    %cst_259 = arith.constant 0.000000e+00 : bf16
    %396 = vector.broadcast %cst_259 : bf16 to vector<2x256xbf16>
    %397 = vector.shape_cast %52 : vector<1x256xi1> to vector<1x256xi1>
    %398 = vector.broadcast %397 : vector<1x256xi1> to vector<2x256xi1>
    %399 = arith.select %398, %395, %396 : vector<2x256xi1>, vector<2x256xbf16>
    %c168 = arith.constant 168 : index
    %c0_260 = arith.constant 0 : index
    %400 = vector.load %arg11[%c168, %c0_260] : memref<200x256xbf16, #tpu.memory_space<vmem>>, vector<2x256xbf16>
    tpu.vector_store %arg11[%c168, %c0_260], %399 {strides = array<i32>} : memref<200x256xbf16, #tpu.memory_space<vmem>>, vector<2x256xbf16>,
    %c0_261 = arith.constant 0 : index
    %c126_262 = arith.constant 126 : index
    %401 = vector.load %arg10[%c0_261, %c126_262] : memref<8x512xbf16, #tpu.memory_space<vmem>>, vector<2x256xbf16>
    %cst_263 = arith.constant 0.000000e+00 : bf16
    %402 = vector.broadcast %cst_263 : bf16 to vector<2x256xbf16>
    %403 = vector.shape_cast %25 : vector<1x256xi1> to vector<1x256xi1>
    %404 = vector.broadcast %403 : vector<1x256xi1> to vector<2x256xi1>
    %405 = arith.select %404, %401, %402 : vector<2x256xi1>, vector<2x256xbf16>
    %c170 = arith.constant 170 : index
    %c0_264 = arith.constant 0 : index
    %406 = vector.load %arg11[%c170, %c0_264] : memref<200x256xbf16, #tpu.memory_space<vmem>>, vector<2x256xbf16>
    tpu.vector_store %arg11[%c170, %c0_264], %405 {strides = array<i32>} : memref<200x256xbf16, #tpu.memory_space<vmem>>, vector<2x256xbf16>,
    %c0_265 = arith.constant 0 : index
    %c127_266 = arith.constant 127 : index
    %407 = vector.load %arg10[%c0_265, %c127_266] : memref<8x512xbf16, #tpu.memory_space<vmem>>, vector<2x256xbf16>
    %cst_267 = arith.constant 0.000000e+00 : bf16
    %408 = vector.broadcast %cst_267 : bf16 to vector<2x256xbf16>
    %409 = vector.shape_cast %34 : vector<1x256xi1> to vector<1x256xi1>
    %410 = vector.broadcast %409 : vector<1x256xi1> to vector<2x256xi1>
    %411 = arith.select %410, %407, %408 : vector<2x256xi1>, vector<2x256xbf16>
    %c172 = arith.constant 172 : index
    %c0_268 = arith.constant 0 : index
    %412 = vector.load %arg11[%c172, %c0_268] : memref<200x256xbf16, #tpu.memory_space<vmem>>, vector<2x256xbf16>
    tpu.vector_store %arg11[%c172, %c0_268], %411 {strides = array<i32>} : memref<200x256xbf16, #tpu.memory_space<vmem>>, vector<2x256xbf16>,
    %c0_269 = arith.constant 0 : index
    %c128_270 = arith.constant 128 : index
    %413 = vector.load %arg10[%c0_269, %c128_270] : memref<8x512xbf16, #tpu.memory_space<vmem>>, vector<2x256xbf16>
    %c174 = arith.constant 174 : index
    %c0_271 = arith.constant 0 : index
    %414 = vector.load %arg11[%c174, %c0_271] : memref<200x256xbf16, #tpu.memory_space<vmem>>, vector<2x256xbf16>
    tpu.vector_store %arg11[%c174, %c0_271], %413 {strides = array<i32>} : memref<200x256xbf16, #tpu.memory_space<vmem>>, vector<2x256xbf16>,
    %c0_272 = arith.constant 0 : index
    %c129_273 = arith.constant 129 : index
    %415 = vector.load %arg10[%c0_272, %c129_273] : memref<8x512xbf16, #tpu.memory_space<vmem>>, vector<2x256xbf16>
    %cst_274 = arith.constant 0.000000e+00 : bf16
    %416 = vector.broadcast %cst_274 : bf16 to vector<2x256xbf16>
    %417 = vector.shape_cast %43 : vector<1x256xi1> to vector<1x256xi1>
    %418 = vector.broadcast %417 : vector<1x256xi1> to vector<2x256xi1>
    %419 = arith.select %418, %415, %416 : vector<2x256xi1>, vector<2x256xbf16>
    %c176 = arith.constant 176 : index
    %c0_275 = arith.constant 0 : index
    %420 = vector.load %arg11[%c176, %c0_275] : memref<200x256xbf16, #tpu.memory_space<vmem>>, vector<2x256xbf16>
    tpu.vector_store %arg11[%c176, %c0_275], %419 {strides = array<i32>} : memref<200x256xbf16, #tpu.memory_space<vmem>>, vector<2x256xbf16>,
    %c0_276 = arith.constant 0 : index
    %c130_277 = arith.constant 130 : index
    %421 = vector.load %arg10[%c0_276, %c130_277] : memref<8x512xbf16, #tpu.memory_space<vmem>>, vector<2x256xbf16>
    %cst_278 = arith.constant 0.000000e+00 : bf16
    %422 = vector.broadcast %cst_278 : bf16 to vector<2x256xbf16>
    %423 = vector.shape_cast %52 : vector<1x256xi1> to vector<1x256xi1>
    %424 = vector.broadcast %423 : vector<1x256xi1> to vector<2x256xi1>
    %425 = arith.select %424, %421, %422 : vector<2x256xi1>, vector<2x256xbf16>
    %c178 = arith.constant 178 : index
    %c0_279 = arith.constant 0 : index
    %426 = vector.load %arg11[%c178, %c0_279] : memref<200x256xbf16, #tpu.memory_space<vmem>>, vector<2x256xbf16>
    tpu.vector_store %arg11[%c178, %c0_279], %425 {strides = array<i32>} : memref<200x256xbf16, #tpu.memory_space<vmem>>, vector<2x256xbf16>,
    %c0_280 = arith.constant 0 : index
    %c142_281 = arith.constant 142 : index
    %427 = vector.load %arg10[%c0_280, %c142_281] : memref<8x512xbf16, #tpu.memory_space<vmem>>, vector<2x256xbf16>
    %cst_282 = arith.constant 0.000000e+00 : bf16
    %428 = vector.broadcast %cst_282 : bf16 to vector<2x256xbf16>
    %429 = vector.shape_cast %25 : vector<1x256xi1> to vector<1x256xi1>
    %430 = vector.broadcast %429 : vector<1x256xi1> to vector<2x256xi1>
    %431 = arith.select %430, %427, %428 : vector<2x256xi1>, vector<2x256xbf16>
    %c180 = arith.constant 180 : index
    %c0_283 = arith.constant 0 : index
    %432 = vector.load %arg11[%c180, %c0_283] : memref<200x256xbf16, #tpu.memory_space<vmem>>, vector<2x256xbf16>
    tpu.vector_store %arg11[%c180, %c0_283], %431 {strides = array<i32>} : memref<200x256xbf16, #tpu.memory_space<vmem>>, vector<2x256xbf16>,
    %c0_284 = arith.constant 0 : index
    %c143_285 = arith.constant 143 : index
    %433 = vector.load %arg10[%c0_284, %c143_285] : memref<8x512xbf16, #tpu.memory_space<vmem>>, vector<2x256xbf16>
    %cst_286 = arith.constant 0.000000e+00 : bf16
    %434 = vector.broadcast %cst_286 : bf16 to vector<2x256xbf16>
    %435 = vector.shape_cast %34 : vector<1x256xi1> to vector<1x256xi1>
    %436 = vector.broadcast %435 : vector<1x256xi1> to vector<2x256xi1>
    %437 = arith.select %436, %433, %434 : vector<2x256xi1>, vector<2x256xbf16>
    %c182 = arith.constant 182 : index
    %c0_287 = arith.constant 0 : index
    %438 = vector.load %arg11[%c182, %c0_287] : memref<200x256xbf16, #tpu.memory_space<vmem>>, vector<2x256xbf16>
    tpu.vector_store %arg11[%c182, %c0_287], %437 {strides = array<i32>} : memref<200x256xbf16, #tpu.memory_space<vmem>>, vector<2x256xbf16>,
    %c0_288 = arith.constant 0 : index
    %c144_289 = arith.constant 144 : index
    %439 = vector.load %arg10[%c0_288, %c144_289] : memref<8x512xbf16, #tpu.memory_space<vmem>>, vector<2x256xbf16>
    %c184 = arith.constant 184 : index
    %c0_290 = arith.constant 0 : index
    %440 = vector.load %arg11[%c184, %c0_290] : memref<200x256xbf16, #tpu.memory_space<vmem>>, vector<2x256xbf16>
    tpu.vector_store %arg11[%c184, %c0_290], %439 {strides = array<i32>} : memref<200x256xbf16, #tpu.memory_space<vmem>>, vector<2x256xbf16>,
    %c0_291 = arith.constant 0 : index
    %c145_292 = arith.constant 145 : index
    %441 = vector.load %arg10[%c0_291, %c145_292] : memref<8x512xbf16, #tpu.memory_space<vmem>>, vector<2x256xbf16>
    %cst_293 = arith.constant 0.000000e+00 : bf16
    %442 = vector.broadcast %cst_293 : bf16 to vector<2x256xbf16>
    %443 = vector.shape_cast %43 : vector<1x256xi1> to vector<1x256xi1>
    %444 = vector.broadcast %443 : vector<1x256xi1> to vector<2x256xi1>
    %445 = arith.select %444, %441, %442 : vector<2x256xi1>, vector<2x256xbf16>
    %c186 = arith.constant 186 : index
    %c0_294 = arith.constant 0 : index
    %446 = vector.load %arg11[%c186, %c0_294] : memref<200x256xbf16, #tpu.memory_space<vmem>>, vector<2x256xbf16>
    tpu.vector_store %arg11[%c186, %c0_294], %445 {strides = array<i32>} : memref<200x256xbf16, #tpu.memory_space<vmem>>, vector<2x256xbf16>,
    %c0_295 = arith.constant 0 : index
    %c146_296 = arith.constant 146 : index
    %447 = vector.load %arg10[%c0_295, %c146_296] : memref<8x512xbf16, #tpu.memory_space<vmem>>, vector<2x256xbf16>
    %cst_297 = arith.constant 0.000000e+00 : bf16
    %448 = vector.broadcast %cst_297 : bf16 to vector<2x256xbf16>
    %449 = vector.shape_cast %52 : vector<1x256xi1> to vector<1x256xi1>
    %450 = vector.broadcast %449 : vector<1x256xi1> to vector<2x256xi1>
    %451 = arith.select %450, %447, %448 : vector<2x256xi1>, vector<2x256xbf16>
    %c188 = arith.constant 188 : index
    %c0_298 = arith.constant 0 : index
    %452 = vector.load %arg11[%c188, %c0_298] : memref<200x256xbf16, #tpu.memory_space<vmem>>, vector<2x256xbf16>
    tpu.vector_store %arg11[%c188, %c0_298], %451 {strides = array<i32>} : memref<200x256xbf16, #tpu.memory_space<vmem>>, vector<2x256xbf16>,
    %c0_299 = arith.constant 0 : index
    %c158_300 = arith.constant 158 : index
    %453 = vector.load %arg10[%c0_299, %c158_300] : memref<8x512xbf16, #tpu.memory_space<vmem>>, vector<2x256xbf16>
    %cst_301 = arith.constant 0.000000e+00 : bf16
    %454 = vector.broadcast %cst_301 : bf16 to vector<2x256xbf16>
    %455 = vector.shape_cast %25 : vector<1x256xi1> to vector<1x256xi1>
    %456 = vector.broadcast %455 : vector<1x256xi1> to vector<2x256xi1>
    %457 = arith.select %456, %453, %454 : vector<2x256xi1>, vector<2x256xbf16>
    %c190 = arith.constant 190 : index
    %c0_302 = arith.constant 0 : index
    %458 = vector.load %arg11[%c190, %c0_302] : memref<200x256xbf16, #tpu.memory_space<vmem>>, vector<2x256xbf16>
    tpu.vector_store %arg11[%c190, %c0_302], %457 {strides = array<i32>} : memref<200x256xbf16, #tpu.memory_space<vmem>>, vector<2x256xbf16>,
    %c0_303 = arith.constant 0 : index
    %c159_304 = arith.constant 159 : index
    %459 = vector.load %arg10[%c0_303, %c159_304] : memref<8x512xbf16, #tpu.memory_space<vmem>>, vector<2x256xbf16>
    %cst_305 = arith.constant 0.000000e+00 : bf16
    %460 = vector.broadcast %cst_305 : bf16 to vector<2x256xbf16>
    %461 = vector.shape_cast %34 : vector<1x256xi1> to vector<1x256xi1>
    %462 = vector.broadcast %461 : vector<1x256xi1> to vector<2x256xi1>
    %463 = arith.select %462, %459, %460 : vector<2x256xi1>, vector<2x256xbf16>
    %c192 = arith.constant 192 : index
    %c0_306 = arith.constant 0 : index
    %464 = vector.load %arg11[%c192, %c0_306] : memref<200x256xbf16, #tpu.memory_space<vmem>>, vector<2x256xbf16>
    tpu.vector_store %arg11[%c192, %c0_306], %463 {strides = array<i32>} : memref<200x256xbf16, #tpu.memory_space<vmem>>, vector<2x256xbf16>,
    %c0_307 = arith.constant 0 : index
    %c160_308 = arith.constant 160 : index
    %465 = vector.load %arg10[%c0_307, %c160_308] : memref<8x512xbf16, #tpu.memory_space<vmem>>, vector<2x256xbf16>
    %c194 = arith.constant 194 : index
    %c0_309 = arith.constant 0 : index
    %466 = vector.load %arg11[%c194, %c0_309] : memref<200x256xbf16, #tpu.memory_space<vmem>>, vector<2x256xbf16>
    tpu.vector_store %arg11[%c194, %c0_309], %465 {strides = array<i32>} : memref<200x256xbf16, #tpu.memory_space<vmem>>, vector<2x256xbf16>,
    %c0_310 = arith.constant 0 : index
    %c161_311 = arith.constant 161 : index
    %467 = vector.load %arg10[%c0_310, %c161_311] : memref<8x512xbf16, #tpu.memory_space<vmem>>, vector<2x256xbf16>
    %cst_312 = arith.constant 0.000000e+00 : bf16
    %468 = vector.broadcast %cst_312 : bf16 to vector<2x256xbf16>
    %469 = vector.shape_cast %43 : vector<1x256xi1> to vector<1x256xi1>
    %470 = vector.broadcast %469 : vector<1x256xi1> to vector<2x256xi1>
    %471 = arith.select %470, %467, %468 : vector<2x256xi1>, vector<2x256xbf16>
    %c196 = arith.constant 196 : index
    %c0_313 = arith.constant 0 : index
    %472 = vector.load %arg11[%c196, %c0_313] : memref<200x256xbf16, #tpu.memory_space<vmem>>, vector<2x256xbf16>
    tpu.vector_store %arg11[%c196, %c0_313], %471 {strides = array<i32>} : memref<200x256xbf16, #tpu.memory_space<vmem>>, vector<2x256xbf16>,
    %c0_314 = arith.constant 0 : index
    %c162_315 = arith.constant 162 : index
    %473 = vector.load %arg10[%c0_314, %c162_315] : memref<8x512xbf16, #tpu.memory_space<vmem>>, vector<2x256xbf16>
    %cst_316 = arith.constant 0.000000e+00 : bf16
    %474 = vector.broadcast %cst_316 : bf16 to vector<2x256xbf16>
    %475 = vector.shape_cast %52 : vector<1x256xi1> to vector<1x256xi1>
    %476 = vector.broadcast %475 : vector<1x256xi1> to vector<2x256xi1>
    %477 = arith.select %476, %473, %474 : vector<2x256xi1>, vector<2x256xbf16>
    %c198 = arith.constant 198 : index
    %c0_317 = arith.constant 0 : index
    %478 = vector.load %arg11[%c198, %c0_317] : memref<200x256xbf16, #tpu.memory_space<vmem>>, vector<2x256xbf16>
    tpu.vector_store %arg11[%c198, %c0_317], %477 {strides = array<i32>} : memref<200x256xbf16, #tpu.memory_space<vmem>>, vector<2x256xbf16>,
    %c0_318 = arith.constant 0 : index
    %c0_319 = arith.constant 0 : index
    %479 = vector.load %arg4[%c0_318, %c0_319] : memref<4x200xbf16, #tpu.memory_space<vmem>>, vector<4x200xbf16>
    %c0_320 = arith.constant 0 : index
    %c0_321 = arith.constant 0 : index
    %480 = vector.load %arg11[%c0_320, %c0_321] : memref<200x256xbf16, #tpu.memory_space<vmem>>, vector<200x256xbf16>
    %cst_322 = arith.constant dense<0.000000e+00> : vector<4x256xf32>
    %481 = tpu.matmul %479, %480, %cst_322 {dimension_numbers = #tpu.dot_dimension_numbers<[1], [0], [0], [1], [0, 0, 1, 1], [], []>} : vector<4x200xbf16>, vector<200x256xbf16>, vector<4x256xf32> -> vector<4x256xf32>
    %c0_323 = arith.constant 0 : index
    %c0_324 = arith.constant 0 : index
    %482 = vector.load %arg7[%c0_323, %c0_324] : memref<4x1xf32, #tpu.memory_space<vmem>>, vector<4x1xf32>
    %483 = vector.broadcast %482 : vector<4x1xf32> to vector<4x256xf32>
    %484 = arith.addf %481, %483 : vector<4x256xf32>
    %c2 = arith.constant 2 : index
    %485 = memref.load %arg8[%c2] : memref<3xf32, #tpu.memory_space<smem>>
    %cst_325 = arith.constant 0.000000e+00 : f32
    %486 = vector.broadcast %cst_325 : f32 to vector<4x256xf32>
    %487 = arith.cmpf oge, %484, %486 : vector<4x256xf32>
    %488 = vector.broadcast %485 : f32 to vector<4x256xf32>
    %489 = arith.mulf %488, %484 : vector<4x256xf32>
    %490 = arith.select %487, %484, %489 : vector<4x256xi1>, vector<4x256xf32>
    %c0_326 = arith.constant 0 : index
    %c0_327 = arith.constant 0 : index
    %c0_328 = arith.constant 0 : index
    %491 = vector.load %arg1[%c0_326, %c0_327, %c0_328] : memref<1x4x256xf32, #tpu.memory_space<vmem>>, vector<1x4x256xf32>
    %492 = vector.shape_cast %491 : vector<1x4x256xf32> to vector<4x256xf32>
    %493 = arith.addf %490, %492 : vector<4x256xf32>
    %c0_329 = arith.constant 0 : index
    %c0_330 = arith.constant 0 : index
    %c0_331 = arith.constant 0 : index
    %494 = vector.load %arg9[%c0_329, %c0_330, %c0_331] : memref<1x4x256xf32, #tpu.memory_space<vmem>>, vector<1x4x256xf32>
    %495 = vector.shape_cast %494 : vector<1x4x256xf32> to vector<4x256xf32>
    %496 = vector.shape_cast %493 : vector<4x256xf32> to vector<1x4x256xf32>
    tpu.vector_store %arg9[%c0_329, %c0_330, %c0_331], %496 {strides = array<i32>} : memref<1x4x256xf32, #tpu.memory_space<vmem>>, vector<1x4x256xf32>,
    return
  }
  func.func @transform_0(%arg0: i32) -> (i32, i32, i32) {
    %c0_i32 = arith.constant 0 : i32
    %c0_i32_0 = arith.constant 0 : i32
    %c0_i32_1 = arith.constant 0 : i32
    return %arg0, %c0_i32, %c0_i32_0 : i32, i32, i32
  }
  func.func @transform_1(%arg0: i32) -> (i32, i32) {
    %c0_i32 = arith.constant 0 : i32
    %c0_i32_0 = arith.constant 0 : i32
    %c0_i32_1 = arith.constant 0 : i32
    return %c0_i32, %c0_i32_0 : i32, i32
  }
  func.func @transform_2(%arg0: i32) -> (i32, i32) {
    %c0_i32 = arith.constant 0 : i32
    %c0_i32_0 = arith.constant 0 : i32
    %c0_i32_1 = arith.constant 0 : i32
    return %c0_i32, %c0_i32_0 : i32, i32
  }
  func.func @transform_3(%arg0: i32) -> (i32, i32) {
    %c0_i32 = arith.constant 0 : i32
    %c0_i32_0 = arith.constant 0 : i32
    %c0_i32_1 = arith.constant 0 : i32
    return %c0_i32, %c0_i32_0 : i32, i32
  }
  func.func @transform_4(%arg0: i32) -> (i32, i32) {
    %c0_i32 = arith.constant 0 : i32
    %c0_i32_0 = arith.constant 0 : i32
    %c0_i32_1 = arith.constant 0 : i32
    return %c0_i32, %c0_i32_0 : i32, i32
  }
  func.func @transform_5(%arg0: i32) -> (i32, i32) {
    %c0_i32 = arith.constant 0 : i32
    %c0_i32_0 = arith.constant 0 : i32
    %c0_i32_1 = arith.constant 0 : i32
    return %c0_i32, %c0_i32_0 : i32, i32
  }
  func.func @transform_6(%arg0: i32) -> (i32, i32) {
    %c0_i32 = arith.constant 0 : i32
    %c0_i32_0 = arith.constant 0 : i32
    %c0_i32_1 = arith.constant 0 : i32
    return %c0_i32, %c0_i32_0 : i32, i32
  }
  func.func @transform_7(%arg0: i32) -> i32 {
    %c0_i32 = arith.constant 0 : i32
    %c0_i32_0 = arith.constant 0 : i32
    return %c0_i32 : i32
  }
  func.func @transform_8(%arg0: i32) -> (i32, i32, i32) {
    %c0_i32 = arith.constant 0 : i32
    %c0_i32_0 = arith.constant 0 : i32
    %c0_i32_1 = arith.constant 0 : i32
    return %arg0, %c0_i32, %c0_i32_0 : i32, i32, i32
  }
}

</mosaic_0001>

<bundles_post_ra>
// kernel: tpu_custom_call.1
= control target key start
LH: loop header
LB: loop body
LE: loop exit
PB: predicated region body
PF: predicated region fallthrough
CT: control target
= control target key end

     0   :  { %s4645_s0 = inlined_call_operand.hbm [shape: f32[2,4,256], index: 0, kind: input, shape index: {}]   ;;  %s4646_s1 = inlined_call_operand.vmem [shape: bf16[2,100], index: 1, kind: input, shape index: {}]   ;;  %s4647_s2 = inlined_call_operand.vmem [shape: bf16[2,150], index: 2, kind: input, shape index: {}]   ;;  %s4648_s3 = inlined_call_operand.vmem [shape: bf16[4,200], index: 3, kind: input, shape index: {}]   ;;  %s4649_s4 = inlined_call_operand.vmem [shape: f32[2,1], index: 4, kind: input, shape index: {}]   ;;  %s4650_s5 = inlined_call_operand.vmem [shape: f32[2,1], index: 5, kind: input, shape index: {}]   ;;  %s4651_s6 = inlined_call_operand.vmem [shape: f32[4,1], index: 6, kind: input, shape index: {}]   ;;  %s4652_s7 = inlined_call_operand.vmem [shape: f32[3], index: 7, kind: input, shape index: {}]   ;;  %s4653_s8 = inlined_call_operand.hbm [shape: f32[2,4,256], index: 8, kind: output, shape index: {}]  }
   0x1   :  { %4796 = sst [smem:[#allocation23_spill]] %s4645_s0 }
   0x2   :  { %4797 = sst [smem:[#allocation24_spill]] %s4646_s1 }
   0x3   :  { %4798 = sst [smem:[#allocation25_spill]] %s4649_s4 }
   0x4   :  { %4799 = sst [smem:[#allocation26_spill]] %s4652_s7 }
   0x5   :  { %4800 = sst [smem:[#allocation27_spill]] %s4653_s8 }
   0x6   :  { %13 = vsyncpa [#allocation5], 0 }
   0x7   :  { %15 = vsyncpa [#allocation5 + $0x1], 0 }
   0x8   :  { %16 = vsyncpa [#allocation7], 0 }
   0x9   :  { %17 = vsyncpa [#allocation6], 0 }
   0xa   :  { %19 = vsyncpa [#allocation6 + $0x1], 0  ;;  %s3302_s27 = smov 0   ;;  %s3304_s28 = smov 0  }
   0xb   :  { %s3306_s29 = smov 0   ;;  %s3308_s30 = smov 0  }
   0xc LB: > { %4801 = sst [smem:[#allocation13_spill]] %s3217_s27  ;;  %s3323_s9 = sadd.s32 4294967295, %s3229_s30   ;;  %s3229_s30 = sphi %s3308_s30, %s5170_s30   ;;  %s3225_s29 = sphi %s3306_s29, %s5173_s29   ;;  %s3221_s28 = sphi %s3304_s28, %s5172_s28   ;;  %s3217_s27 = sphi %s3302_s27, %s5171_s27  }
   0xd   : > { %4802 = sst [smem:[#allocation14_spill]] %s3221_s28  ;;  %s2734_s10 = sadd.s32 4294967294, %s3229_s30  }
   0xe   : > { %4803 = sst [smem:[#allocation15_spill]] %s3225_s29  ;;  %p45_p0 = scmp.ne.s32.totalorder %s3221_s28, %s3217_s27 }
   0xf   : > { %4804 = sst [smem:[#allocation16_spill]] %s3229_s30  ;;  %p46_p1 = scmp.eq.s32.totalorder %s3323_s9, 0 }
  0x10   : > { %4805 = sst [smem:[#allocation17_spill]] %s3323_s9  ;;  %p216_p2 = scmp.eq.s32.totalorder %s3323_s9, 1 }
  0x11   : > { %p222_p3 = scmp.eq.s32.totalorder %s2734_s10, 1  ;;  %p3332_p4 = por %p46_p1, %p45_p0 }
  0x12   : > { %p2735_p5 = scmp.ge.s32.totalorder %s3229_s30, 1  ;;  %p229_p7 = scmp.lt.s32.totalorder %s3229_s30, 3 }
  0x13   : > { %p3337_p6 = por %p222_p3, %p45_p0  ;;  %s4809_s7 = sld [smem:[#allocation26_spill]] }
  0x14   : > { %p3345_p8 = pnand %p2735_p5, %p229_p7  ;;  %s3353_s17 = sadd.s32 1, %s3229_s30  }
  0x15   : > { %s4807_s12 = scalar_select %p3337_p6, 1, 0 }
  0x16   : > { %p3038_p10 = pneg %p3345_p8  ;;  %4811 = sst [smem:[#allocation19_spill]] %s3353_s17 }
  0x17   : > { %4808 = sst [smem:[#allocation18_spill]] %s4807_s12  ;;  %s29_s18 = ssub.s32 %s3229_s30, %s3353_s17 }
  0x18   : > { %p3039_p11 = pnand %p3038_p10, %p46_p1  ;;  %p30_p12 = scmp.eq.s32.totalorder %s29_s18, 0 }
  0x19   : > { %s259_s15 = sshll.u32 %s4809_s7, 4  ;;  %s32_s19 = sadd.s32 1, %s3225_s29  ;;  %s260_s15 = int_to_ptr.vmem [resolvable:$true] %s259_s15 }
  0x1a   : > { %p39_p13 = scmp.ne.s32.totalorder %s3225_s29, %s3221_s28  ;;  %s3231_s20 = smov [#allocation8]  }
  0x1b   : > { %3041 = dma.vmem_to_smem (!%p3039_p11), %s260_s15, 16, %s3231_s20, [#allocation7]  }
  0x1c   : > { %s3363_s21 = scalar_select %p30_p12, %s3225_s29, %s32_s19  }
  0x1d   : > { %p40_p0 = scmp.eq.s32.totalorder %s3229_s30, 0  ;;  %p3368_p3 = por %p216_p2, %p39_p13 }
  0x1e   : > { %4812 = sst [smem:[#allocation20_spill]] %s3363_s21  ;;  %s270_s23 = sand.u32 1, %s3225_s29  }
  0x1f   : > { %s4813_s22 = scalar_select %p3368_p3, 1, 0 }
  0x20   : > { %p41_p5 = por %p40_p0, %p39_p13  ;;  %p3051_p7 = scmp.lt.s32.totalorder %s3229_s30, 2 }
  0x21   : > { %4814 = sst [smem:[#allocation21_spill]] %s4813_s22  ;;  %s2738_s24 = sshll.u32 %s270_s23, 3 }
  0x22   : > { %s2974_s25 = sshll.u32 %s3229_s30, 3  ;;  %s4815_s0 = sld [smem:[#allocation23_spill]] }
  0x23   : > { %s274_s18 = scalar_lea.vmem [#allocation4], %s2738_s24  ;;  %p3378_p10 = pnand %p3051_p7, %p41_p5 }
  0x24   : > { %s283_s15 = sshll.u32 %s274_s18, 4  ;;  %s271_s20 = scalar_lea.sflag [#allocation5], %s270_s23  ;;  %s284_s15 = int_to_ptr.vmem [resolvable:$true] %s283_s15 }
  0x25   : > { %p3133_p11 = pneg %p3378_p10 }
  0x28   : > { %s279_s13 = scalar_lea.hbm %s4815_s0, %s2974_s25  ;;  %s3136_s24 = scalar_lea.hbm %s4815_s0, 16 }
  0x29   : > { %s281_s14 = sshll.u32 %s279_s13, 4  ;;  %s282_s14 = int_to_ptr.hbm [resolvable:$true] %s281_s14 }
  0x2a   : > { %s3129_s7 = sshra.s32 %s282_s14, 4  ;;  %s3130_s7 = int_to_ptr.hbm [resolvable:$true] %s3129_s7 }
  0x2b   : > { %s3131_s21 = scalar_lea.hbm %s3130_s7, 8  ;;  %p3137_p0 = scmp.lt.s32.totalorder %s3130_s7, %s4815_s0 }
  0x2c   : > { %p3132_p2 = scmp.ne.s32.totalorder %s3130_s7, %s3131_s21  ;;  %p3138_p5 = scmp.lt.s32.totalorder %s3136_s24, %s3131_s21 }
  0x2e   : > { %p3134_p12 = pnand %p3133_p11, %p3132_p2  ;;  %p3139_p7 = por %p3138_p5, %p3137_p0 }
  0x30   : > { %p3135_p13 = pneg %p3134_p12 }
  0x32   : > { %p3140_p9 = pnand %p3139_p7, %p3135_p13 }
  0x34   : > { %3143 = shalt.err (!%p3140_p9)
}
  0x35   : > { %3045 = dma.hbm_to_vmem [thread:$0]  (!%p3378_p10), %s282_s14, 128, %s284_s15, %s271_s20  }
  0x36   : > { %292 = sbr.rel (%p3345_p8) target bundleno = 1384 (0x568), region = 52 }
  0x3b   : > { %s3395_s23 = sand.u32 1, %s3221_s28  }
  0x3c   : > { %4817 = sst [smem:[#allocation22_spill]] %s3395_s23  ;;  %s4654_s18 = sshll.u32 %s3395_s23, 3 }
  0x3d   : > { %s295_s25 = scalar_lea.sflag [#allocation5], %s3395_s23  ;;  %s3401_s7 = scalar_lea.vmem [#allocation4], %s4654_s18 }
  0x3e   : > { %3204 = dma.done.wait (%p3332_p4), %s295_s25, 128  }
  0x3f   : > { %3206 = vsyncadd (%p3332_p4), %s295_s25, 4294967168 }
  0x40   : > { %3208 = dma.done.wait (%p46_p1), [#allocation7], 16  }
  0x41   : > { %3210 = vsyncadd (%p46_p1), [#allocation7], 4294967280 }
  0x42   : > { %309 = sfence }
  0x43   : > { %v341_v0 = vlaneseq  ;;  %v3232_v1 = vmov 0   ;;  %s4657_s11 = smov 34   ;;  %s4663_s16 = smov 18   ;;  %v402_v18 = vld [vmem:[%s3401_s7] sm:$0xff]  ;;  %v4818_v37 = vmov 0  ;;  %v4820_v44 = vmov 0 }
  0x44   : > { %400 = vst [vmem:[#allocation2] sm:$0xf] %v3232_v1  ;;  %3112 = vset.pattern.permute.xlu2 %v3232_v1  ;;  %3113 = vset.pattern.permute.xlu0 %v3232_v1  ;;  %s4659_s21 = smov 33   ;;  %s4655_s14 = smov 31   ;;  %v3447_v31 = vunpack.c.l.b16 %v3232_v1  ;;  %v3450_v32 = vunpack.c.h.b16 %v3232_v1  ;;  %v4822_v53 = vmov 0  ;;  %v4824_v60 = vmov 0 }
  0x45   : > { %v342_v2 = vand.u32 127, %v341_v0  ;;  %401 = vst [vmem:[#allocation2 + $0xc] sm:$0xf] %v3232_v1  ;;  %s4747_s15 = smov 15   ;;  %s4738_s19 = smov 30  }
  0x46   : > { %s4661_s20 = smov 17   ;;  %s4667_s26 = smov 14   ;;  %404 = vst [vmem:[#allocation1] ss:$2 sm:$0xff] %v402_v18  ;;  %v4828_v18 = vmov 0 }
  0x47   : > { %v343_v3 = vadd.s32 128, %v342_v2  ;;  %v348_v4 = vand.u32 15, %v342_v2  ;;  %s4671_s24 = smov 1   ;;  %s4753_s10 = smov 2  }
  0x48   : > { %s4757_s13 = smov 127   ;;  %s4665_s25 = smov 114  }
  0x49   : > { %v355_v5 = vand.u32 15, %v343_v3  ;;  %v392_v6 = vadd.s32 2, %v348_v4  ;;  %v384_v7 = vadd.s32 1, %v348_v4  ;;  %v376_v10 = vadd.s32 4294967295, %v348_v4  ;;  %s4736_s18 = smov 113   ;;  %s4952_s4 = sld [smem:[#allocation25_spill]] }
  0x4a   : > { %v368_v12 = vadd.s32 4294967294, %v348_v4  ;;  %s4969_s0 = smov 94   ;;  %s5000_s1 = sld [smem:[#allocation24_spill]] }
  0x4b   : > { %v393_v8 = vadd.s32 2, %v355_v5  ;;  %vm396_vm0 = vcmp.lt.s32.totalorder %v392_v6, 16  ;;  %v385_v9 = vadd.s32 1, %v355_v5  ;;  %vm388_vm1 = vcmp.lt.s32.totalorder %v384_v7, 16  ;;  %s1344_s28 = sld [smem:[#allocation8]]  ;;  %s5007_s29 = smov 16  }
  0x4c   : > { %v377_v11 = vadd.s32 4294967295, %v355_v5  ;;  %v369_v13 = vadd.s32 4294967294, %v355_v5  ;;  %vm378_vm6 = vcmp.ge.s32.totalorder %v376_v10, 0  ;;  %vm370_vm8 = vcmp.ge.s32.totalorder %v368_v12, 0  ;;  %v1138_v23 = vld [vmem:[#allocation2 + $0xc] sm:$0x3] }
  0x4d   : > { %vm397_vm2 = vcmp.lt.s32.totalorder %v393_v8, 16  ;;  %vm389_vm3 = vcmp.lt.s32.totalorder %v385_v9, 16  ;;  %v405_v19 = vld.sshfl [vmem:[#allocation1] sm:$0xff pattern:$0x75316420]  ;;  %s5016_s17 = smov 113  }
  0x4e   : > { %vm563_vm4 = vmpackc.low %vm397_vm2, %vm396_vm0  ;;  %vm379_vm7 = vcmp.ge.s32.totalorder %v377_v11, 0  ;;  %vm371_vm9 = vcmp.ge.s32.totalorder %v369_v13, 0  ;;  %v406_v20 = vld.sshfl [vmem:[#allocation1 + $0x8] sm:$0xff pattern:$0x75316420]  ;;  %s5021_s30 = smov 111  }
  0x4f   : > { %v564_v14 = vsel %vm563_vm4, 65537, %v3232_v1  ;;  %vm519_vm5 = vmpackc.low %vm389_vm3, %vm388_vm1  ;;  %v409_v21 = vpack.c.bf16 %v406_v20, %v405_v19  ;;  %v981_v27 = vld [vmem:[#allocation2 + $0xc] sm:$0x3]  ;;  %s5022_s12 = smov 112   ;;  %s5028_s27 = smov 95  }
  0x50   : > { %1190 = vrot.lane.b32.xlu0 %v564_v14, %s4657_s11  ;;  %v520_v15 = vsel %vm519_vm5, 65537, %v3232_v1  ;;  %1033 = vrot.lane.b32.xlu2 %v564_v14, %s4663_s16  ;;  %vm460_vm10 = vmpackc.low %vm379_vm7, %vm378_vm6  ;;  %s4759_s11 = smov 126   ;;  %s4728_s16 = smov 111   ;;  %v985_v28 = vrot.slane %v981_v27, 6  ;;  %v947_v36 = vld [vmem:[#allocation2 + $0xc] sm:$0x3] }
  0x51   : > { %1154 = vrot.lane.b32.xlu1 %v520_v15, %s4659_s21  ;;  %vm417_vm11 = vmpackc.low %vm371_vm9, %vm370_vm8  ;;  %v461_v16 = vsel %vm460_vm10, 65537, %v3232_v1  ;;  %s4703_s21 = smov 98   ;;  %410 = vst [vmem:[#allocation2 + $0x4] sm:$0x33] %v409_v21  ;;  %v1189_v43 = vld [vmem:[#allocation2 + $0xc] sm:$0x3] }
  0x52   : > { %v418_v17 = vsel %vm417_vm11, 65537, %v3232_v1  ;;  %v1068_v51 = vld [vmem:[#allocation2 + $0xc] sm:$0x3]  ;;  %vm4677_vm9 = vcmask 121856   ;;  %s5037_s22 = smov 97   ;;  %s5038_s8 = smov 98  }
  0x53   : > { %v998_v59 = vld [vmem:[#allocation2 + $0xc] sm:$0x3]  ;;  %s2869_s9 = sld [smem:[#allocation8 + $0x1]] }
  0x54   : > { %v877_v3 = vld [vmem:[#allocation2 + $0xc] sm:$0x3] }
  0x55   : > { %v2217_v4 = vld [vmem:[#allocation2 + $0xc] sm:$0x1] }
  0x58   : > { %1103 = vrot.lane.b32.xlu0 %v461_v16, %s4655_s14  ;;  %948 = vrot.lane.b32.xlu2 %v461_v16, %s4747_s15  ;;  %s4669_s14 = smov 110   ;;  %v1137_v22 = vld [vmem:[#allocation2 + $0x4] sm:$0x33] }
  0x59   : > { %1069 = vrot.lane.b32.xlu1 %v418_v17, %s4738_s19  ;;  %v980_v24 = vld [vmem:[#allocation2 + $0x4] sm:$0x33] }
  0x5a   : > { %v984_v25 = vrot.slane %v980_v24, 6 }
  0x60   : > { %999 = vrot.lane.b32.xlu0 %v520_v15, %s4661_s20  ;;  %912 = vrot.lane.b32.xlu2 %v418_v17, %s4667_s26  ;;  %s4768_s20 = smov 95   ;;  %s4755_s26 = smov 94  }
  0x61   : > { %842 = vrot.lane.b32.xlu1 %v520_v15, %s4671_s24  ;;  %s4710_s24 = smov 112  }
  0x68   : > { %878 = vrot.lane.b32.xlu0 %v564_v14, %s4753_s10  ;;  %802 = vrot.lane.b32.xlu2 %v461_v16, %s4757_s13 }
  0x69   : > { %728 = vrot.lane.b32.xlu1 %v564_v14, %s4665_s25  ;;  %s4715_s25 = smov 97  }
  0x70   : > { %692 = vrot.lane.b32.xlu0 %v520_v15, %s4736_s18  ;;  %601 = vrot.lane.b32.xlu2 %v418_v17, %s4669_s14  ;;  %s4761_s14 = smov 96  }
  0x71   : > { %766 = vrot.lane.b32.xlu1 %v418_v17, %s4759_s11 }
  0x78   : > { %565 = vrot.lane.b32.xlu0 %v564_v14, %s4703_s21  ;;  %462 = vrot.lane.b32.xlu2 %v461_v16, %s4768_s20  ;;  %v691_v14 = vld [vmem:[#allocation2 + $0x8] sm:$0x3] }
  0x79   : > { %639 = vrot.lane.b32.xlu1 %v461_v16, %s4728_s16 }
  0x80   : > { %521 = vrot.lane.b32.xlu0 %v520_v15, %s4715_s25  ;;  %1141 = vrot.lane.b32.xlu2 %v1137_v22, %s4761_s14  ;;  %v765_v22 = vld [vmem:[#allocation2 + $0x8] sm:$0x3] }
  0x81   : > { %419 = vrot.lane.b32.xlu1 %v418_v17, %s4755_s26 }
  0x88   : > { %1143 = vrot.lane.b32.xlu0 %v1138_v23, %s4761_s14  ;;  %986 = vrot.lane.b32.xlu2 %v984_v25, %s4710_s24  ;;  %s4957_s14 = smov 32  }
  0x90   : > { %988 = vrot.lane.b32.xlu0 %v985_v28, %s4710_s24  ;;  %s4887_s24 = smov 14  }
  0xaa   : > { %v3443_v26 = vpop.permute.xlu2 %1033 }
  0xb2   : > { %v949_v29 = vpop.permute.xlu2 %948 }
  0xb3   : > { %v950_v30 = vrot.slane %v949_v29, 4 }
  0xb5   : > { %v959_v33 = vunpack.c.l.b16 %v950_v30  ;;  %v960_v34 = vunpack.c.h.b16 %v950_v30  ;;  %v951_v7 = vsel %vm4677_vm9, %v950_v30, %v949_v29  ;;  %v4830_v29 = vmov 0 }
  0xb6   : > { %v952_v13 = vunpack.c.l.b16 %v951_v7  ;;  %v953_v17 = vunpack.c.h.b16 %v951_v7  ;;  %vm4680_vm9 = vcmask 924672  }
  0xb7   : > { %vm963_vm12 = vcmp.ne.s32.totalorder %v959_v33, %v3447_v31  ;;  %vm964_vm13 = vcmp.ne.s32.totalorder %v960_v34, %v3450_v32 }
  0xb8   : > { %vm3456_vm14 = vmpackc.low %vm964_vm13, %vm963_vm12  ;;  %vm4674_vm12 = vcmask 244736   ;;  %vm4673_vm13 = vcmask 277504  }
  0xb9   : > { %v4819_v37 = vsel %vm3456_vm14, 4294967295, %v4818_v37  ;;  %v967_v40 = vsel %vm3456_vm14, %v947_v36, 0 }
  0xba   : > { %972 = vrot.lane.b32.xlu1 %v967_v40, %s4736_s18  ;;  %v3542_v20 = vpop.permute.xlu2 %912 }
  0xc2   : > { %v3454_v35 = vpop.permute.xlu0 %1190 }
  0xc3   : > { %v3461_v38 = vrot.slane %v3454_v35, 4  ;;  %v3463_v39 = vpop.permute.xlu1 %1154 }
  0xc5   : > { %v1201_v41 = vunpack.c.l.b16 %v3461_v38  ;;  %v1202_v42 = vunpack.c.h.b16 %v3461_v38  ;;  %v1193_v23 = vsel %vm4673_vm13, %v3461_v38, %v3454_v35 }
  0xc6   : > { %v1194_v34 = vunpack.c.l.b16 %v1193_v23  ;;  %v1195_v35 = vunpack.c.h.b16 %v1193_v23 }
  0xc7   : > { %vm1205_vm15 = vcmp.ne.s32.totalorder %v1201_v41, %v3447_v31  ;;  %vm1206_vm0 = vcmp.ne.s32.totalorder %v1202_v42, %v3450_v32  ;;  %v946_v42 = vld [vmem:[#allocation2 + $0x4] sm:$0x33] }
  0xc8   : > { %vm3472_vm1 = vmpackc.low %vm1206_vm0, %vm1205_vm15 }
  0xc9   : > { %v4821_v44 = vsel %vm3472_vm1, 4294967295, %v4820_v44  ;;  %v1209_v46 = vsel %vm3472_vm1, %v1189_v43, 0  ;;  %v4832_v43 = vmov 0 }
  0xca   : > { %v3476_v45 = vpop.permute.xlu0 %1103  ;;  %1214 = vrot.lane.b32.xlu0 %v1209_v46, %s4755_s26  ;;  %v558_v46 = vld [vmem:[#allocation2 + $0x8] sm:$0x3] }
  0xcb   : > { %v1070_v47 = vpop.permute.xlu1 %1069 }
  0xcc   : > { %v1071_v48 = vrot.slane %v1070_v47, 4 }
  0xce   : > { %v1080_v49 = vunpack.c.l.b16 %v1071_v48  ;;  %v1081_v50 = vunpack.c.h.b16 %v1071_v48  ;;  %v1072_v16 = vsel %vm4674_vm12, %v1071_v48, %v1070_v47 }
  0xcf   : > { %v1073_v24 = vunpack.c.l.b16 %v1072_v16  ;;  %v1074_v25 = vunpack.c.h.b16 %v1072_v16  ;;  %v997_v16 = vld [vmem:[#allocation2 + $0x4] sm:$0x33] }
  0xd0   : > { %vm1084_vm2 = vcmp.ne.s32.totalorder %v1080_v49, %v3447_v31  ;;  %vm1085_vm3 = vcmp.ne.s32.totalorder %v1081_v50, %v3450_v32  ;;  %v4834_v49 = vmov 0 }
  0xd1   : > { %vm3485_vm4 = vmpackc.low %vm1085_vm3, %vm1084_vm2  ;;  %vm1078_vm13 = vcmp.ne.s32.totalorder %v1074_v25, %v3450_v32  ;;  %v4849_v25 = vmov 0 }
  0xd2   : > { %v3483_v52 = vpop.permute.xlu0 %999  ;;  %v4823_v53 = vsel %vm3485_vm4, 4294967295, %v4822_v53  ;;  %v1088_v55 = vsel %vm3485_vm4, %v1068_v51, 0 }
  0xd3   : > { %v3490_v54 = vrot.slane %v3483_v52, 4  ;;  %v3494_v56 = vpop.permute.xlu1 %842  ;;  %1093 = vrot.lane.b32.xlu2 %v1088_v55, %s4703_s21 }
  0xd4   : > { %v3572_v41 = vrot.slane %v3494_v56, 4 }
  0xd5   : > { %v1010_v57 = vunpack.c.l.b16 %v3490_v54  ;;  %v1011_v58 = vunpack.c.h.b16 %v3490_v54 }
  0xd7   : > { %vm1014_vm5 = vcmp.ne.s32.totalorder %v1010_v57, %v3447_v31  ;;  %vm1015_vm6 = vcmp.ne.s32.totalorder %v1011_v58, %v3450_v32 }
  0xd8   : > { %vm3501_vm7 = vmpackc.low %vm1015_vm6, %vm1014_vm5  ;;  %vm4675_vm5 = vcmask 1031168  }
  0xd9   : > { %v4825_v60 = vsel %vm3501_vm7, 4294967295, %v4824_v60  ;;  %v1018_v62 = vsel %vm3501_vm7, %v998_v59, 0  ;;  %v853_v59 = vunpack.c.l.b16 %v3572_v41 }
  0xda   : > { %v3505_v61 = vpop.permute.xlu0 %878 }
  0xdb   : > { %v3510_v63 = vrot.slane %v3505_v61, 4  ;;  %v3512_v0 = vpop.permute.xlu1 %728  ;;  %1023 = vrot.lane.b32.xlu2 %v1018_v62, %s4728_s16  ;;  %v3603_v62 = vpop.permute.xlu2 %802 }
  0xdc   : > { %v3621_v7 = vrot.slane %v3603_v62, 4 }
  0xdd   : > { %v889_v1 = vunpack.c.l.b16 %v3510_v63  ;;  %v890_v2 = vunpack.c.h.b16 %v3510_v63 }
  0xdf   : > { %vm893_vm8 = vcmp.ne.s32.totalorder %v889_v1, %v3447_v31  ;;  %vm894_vm10 = vcmp.ne.s32.totalorder %v890_v2, %v3450_v32  ;;  %v854_v1 = vunpack.c.h.b16 %v3572_v41 }
  0xe0   : > { %vm3519_vm11 = vmpackc.low %vm894_vm10, %vm893_vm8  ;;  %vm4676_vm8 = vcmask 138240  }
  0xe1   : > { %v897_v6 = vsel %vm3519_vm11, %v877_v3, 0  ;;  %v1002_v40 = vsel %vm4676_vm8, %v3490_v54, %v3483_v52  ;;  %v1067_v52 = vld [vmem:[#allocation2 + $0x4] sm:$0x33]  ;;  %v4836_v54 = vmov 0  ;;  %vm858_vm7 = vcmp.ne.s32.totalorder %v854_v1, %v3450_v32 }
  0xe2   : > { %v3523_v5 = vpop.permute.xlu0 %692  ;;  %v1003_v57 = vunpack.c.l.b16 %v1002_v40  ;;  %v1004_v58 = vunpack.c.h.b16 %v1002_v40  ;;  %v4852_v40 = vmov 0  ;;  %v4861_v1 = vmov 0 }
  0xe3   : > { %v3529_v8 = vrot.slane %v3523_v5, 4  ;;  %v767_v9 = vpop.permute.xlu1 %766  ;;  %902 = vrot.lane.b32.xlu2 %v897_v6, %s4759_s11  ;;  %v4840_v6 = vmov 0 }
  0xe4   : > { %v768_v10 = vrot.slane %v767_v9, 4 }
  0xe5   : > { %v704_v11 = vunpack.c.l.b16 %v3529_v8  ;;  %v705_v12 = vunpack.c.h.b16 %v3529_v8  ;;  %v696_v2 = vsel %vm4680_vm9, %v3529_v8, %v3523_v5  ;;  %vm1007_vm9 = vcmp.ne.s32.totalorder %v1003_v57, %v3447_v31  ;;  %v764_v5 = vld [vmem:[#allocation2] sm:$0x33] }
  0xe6   : > { %v778_v15 = vunpack.c.l.b16 %v768_v10  ;;  %v779_v19 = vunpack.c.h.b16 %v768_v10  ;;  %v770_v30 = vsel %vm4675_vm5, %v768_v10, %v767_v9  ;;  %v3624_v9 = vrot.slane %v3463_v39, 4  ;;  %v1188_v10 = vld [vmem:[#allocation2 + $0x4] sm:$0x33] }
  0xe7   : > { %vm708_vm15 = vcmp.ne.s32.totalorder %v704_v11, %v3447_v31  ;;  %vm709_vm0 = vcmp.ne.s32.totalorder %v705_v12, %v3450_v32  ;;  %v771_v47 = vunpack.c.l.b16 %v770_v30  ;;  %v772_v48 = vunpack.c.h.b16 %v770_v30  ;;  %v876_v57 = vld [vmem:[#allocation2 + $0x4] sm:$0x33] }
  0xe8   : > { %vm3537_vm2 = vmpackc.low %vm709_vm0, %vm708_vm15  ;;  %vm782_vm3 = vcmp.ne.s32.totalorder %v778_v15, %v3447_v31  ;;  %vm783_vm6 = vcmp.ne.s32.totalorder %v779_v19, %v3450_v32  ;;  %vm956_vm15 = vcmp.ne.s32.totalorder %v952_v13, %v3447_v31  ;;  %vm957_vm0 = vcmp.ne.s32.totalorder %v953_v17, %v3450_v32 }
  0xe9   : > { %v4829_v18 = vsel %vm3537_vm2, 4294967295, %v4828_v18  ;;  %v712_v21 = vsel %vm3537_vm2, %v691_v14, 0  ;;  %vm3556_vm10 = vmpackc.low %vm783_vm6, %vm782_vm3  ;;  %vm1077_vm6 = vcmp.ne.s32.totalorder %v1073_v24, %v3447_v31  ;;  %v4842_v8 = vmov 0  ;;  %v841_v24 = vld [vmem:[#allocation2 + $0xc] sm:$0x3] }
  0xea   : > { %717 = vrot.lane.b32.xlu0 %v712_v21, %s4747_s15  ;;  %v3550_v27 = vpop.permute.xlu0 %565  ;;  %v4831_v29 = vsel %vm3556_vm10, 4294967295, %v4830_v29  ;;  %v786_v33 = vsel %vm3556_vm10, %v765_v22, 0  ;;  %vm3574_vm3 = vmpackc.low %vm957_vm0, %vm956_vm15  ;;  %vm3595_vm0 = vcmp.ne.s32.totalorder %v1194_v34, %v3447_v31  ;;  %v697_v13 = vunpack.c.l.b16 %v696_v2 }
  0xeb   : > { %v3554_v28 = vrot.slane %v3550_v27, 4  ;;  %791 = vrot.lane.b32.xlu1 %v786_v33, %s4753_s10  ;;  %v4833_v43 = vsel %vm3574_vm3, 4294967295, %v4832_v43  ;;  %v966_v50 = vsel %vm3574_vm3, %v946_v42, 0  ;;  %vm3590_vm15 = vmpackc.low %vm1078_vm13, %vm1077_vm6  ;;  %vm775_vm13 = vcmp.ne.s32.totalorder %v771_v47, %v3447_v31 }
  0xec   : > { %v4837_v54 = vsel %vm3590_vm15, 4294967295, %v4836_v54  ;;  %v1087_v3 = vsel %vm3590_vm15, %v1067_v52, 0  ;;  %vm1008_vm6 = vcmp.ne.s32.totalorder %v1004_v58, %v3450_v32  ;;  %v698_v14 = vunpack.c.h.b16 %v696_v2 }
  0xed   : > { %v577_v36 = vunpack.c.l.b16 %v3554_v28  ;;  %v578_v38 = vunpack.c.h.b16 %v3554_v28  ;;  %v4847_v17 = vmov 0  ;;  %v814_v21 = vunpack.c.l.b16 %v3621_v7 }
  0xee   : > { %v815_v22 = vunpack.c.h.b16 %v3621_v7  ;;  %v1165_v30 = vunpack.c.l.b16 %v3624_v9  ;;  %v1166_v33 = vunpack.c.h.b16 %v3624_v9  ;;  %vm4851_vm3 = vcmask 252928  }
  0xef   : > { %vm581_vm12 = vcmp.ne.s32.totalorder %v577_v36, %v3447_v31  ;;  %vm582_vm5 = vcmp.ne.s32.totalorder %v578_v38, %v3450_v32  ;;  %v690_v38 = vld [vmem:[#allocation2] sm:$0x33]  ;;  %v3683_v42 = vrot.slane %v3512_v0, 4  ;;  %v1035_v2 = vrot.slane %v3443_v26, 4 }
  0xf0   : > { %vm3582_vm8 = vmpackc.low %vm582_vm5, %vm581_vm12  ;;  %vm1199_vm12 = vcmp.ne.s32.totalorder %v1195_v35, %v3450_v32  ;;  %vm776_vm5 = vcmp.ne.s32.totalorder %v772_v48, %v3450_v32  ;;  %vm3689_vm14 = vcmp.ne.s32.totalorder %v1165_v30, %v3447_v31  ;;  %v801_v48 = vld [vmem:[#allocation2 + $0x8] sm:$0x3]  ;;  %vm4865_vm2 = vcmask 7168  }
  0xf1   : > { %v4835_v49 = vsel %vm3582_vm8, 4294967295, %v4834_v49  ;;  %v585_v51 = vsel %vm3582_vm8, %v558_v46, 0  ;;  %vm3616_vm4 = vmpackc.low %vm1199_vm12, %vm3595_vm0  ;;  %vm3633_vm0 = vcmp.ne.s32.totalorder %v853_v59, %v3447_v31  ;;  %vm4846_vm12 = vcmask 15360   ;;  %v1153_v59 = vld [vmem:[#allocation2 + $0xc] sm:$0x3] }
  0xf2   : > { %970 = vrot.lane.b32.xlu0 %v966_v50, %s4736_s18  ;;  %590 = vrot.lane.b32.xlu2 %v585_v51, %s4738_s19  ;;  %v4841_v6 = vsel %vm3616_vm4, 4294967295, %v4840_v6  ;;  %vm3628_vm15 = vmpackc.low %vm776_vm5, %vm775_vm13  ;;  %v881_v12 = vsel %vm4846_vm12, %v3510_v63, %v3505_v61  ;;  %v1208_v15 = vsel %vm3616_vm4, %v1188_v10, 0  ;;  %v3652_v61 = vrot.slane %v3476_v45, 4  ;;  %s4930_s18 = smov 18  }
  0xf3   : > { %1091 = vrot.lane.b32.xlu1 %v1087_v3, %s4703_s21  ;;  %v4843_v8 = vsel %vm3628_vm15, 4294967295, %v4842_v8  ;;  %vm3643_vm13 = vmpackc.low %vm1008_vm6, %vm1007_vm9  ;;  %v785_v19 = vsel %vm3628_vm15, %v764_v5, 0  ;;  %v882_v63 = vunpack.c.l.b16 %v881_v12  ;;  %v883_v23 = vunpack.c.h.b16 %v881_v12  ;;  %s4870_s21 = smov 1  }
  0xf4   : > { %v4848_v17 = vsel %vm3643_vm13, 4294967295, %v4847_v17  ;;  %vm3658_vm9 = vmpackc.low %vm858_vm7, %vm3633_vm0  ;;  %vm701_vm6 = vcmp.ne.s32.totalorder %v697_v13, %v3447_v31  ;;  %vm702_vm12 = vcmp.ne.s32.totalorder %v698_v14, %v3450_v32  ;;  %v1017_v34 = vsel %vm3643_vm13, %v997_v16, 0 }
  0xf5   : > { %v4850_v25 = vsel %vm3658_vm9, 4294967295, %v4849_v25  ;;  %v861_v35 = vsel %vm3658_vm9, %v841_v24, 0  ;;  %vm818_vm7 = vcmp.ne.s32.totalorder %v814_v21, %v3447_v31  ;;  %vm819_vm0 = vcmp.ne.s32.totalorder %v815_v22, %v3450_v32  ;;  %vm3676_vm4 = vmpackc.low %vm702_vm12, %vm701_vm6 }
  0xf6   : > { %v1106_v36 = vsel %vm4851_vm3, %v3652_v61, %v3476_v45  ;;  %v4853_v40 = vsel %vm3676_vm4, 4294967295, %v4852_v40  ;;  %vm886_vm5 = vcmp.ne.s32.totalorder %v882_v63, %v3447_v31  ;;  %vm887_vm13 = vcmp.ne.s32.totalorder %v883_v23, %v3450_v32  ;;  %vm3694_vm6 = vmpackc.low %vm819_vm0, %vm818_vm7  ;;  %v557_v23 = vld [vmem:[#allocation2] sm:$0x33] }
  0xf7   : > { %vm4854_vm8 = vcmask 801792   ;;  %vm1170_vm3 = vcmp.ne.s32.totalorder %v1166_v33, %v3450_v32  ;;  %v865_v45 = vrot.slane %v861_v35, 6  ;;  %v4857_v50 = vmov 0  ;;  %v727_v33 = vld [vmem:[#allocation2 + $0x8] sm:$0x3] }
  0xf8   : > { %v569_v46 = vsel %vm4854_vm8, %v3554_v28, %v3550_v27  ;;  %v4858_v50 = vsel %vm3694_vm6, 4294967295, %v4857_v50  ;;  %v1107_v51 = vunpack.c.l.b16 %v1106_v36  ;;  %v1108_v52 = vunpack.c.h.b16 %v1106_v36  ;;  %vm3700_vm8 = vmpackc.low %vm887_vm13, %vm886_vm5 }
  0xf9   : > { %v711_v55 = vsel %vm3676_vm4, %v690_v38, 0  ;;  %v4859_v27 = vmov 0  ;;  %v570_v28 = vunpack.c.l.b16 %v569_v46  ;;  %v571_v58 = vunpack.c.h.b16 %v569_v46  ;;  %vm3708_vm12 = vmpackc.low %vm1170_vm3, %vm3689_vm14 }
  0xfa   : > { %1212 = vrot.lane.b32.xlu2 %v1208_v15, %s4755_s26  ;;  %789 = vrot.lane.b32.xlu0 %v785_v19, %s4753_s10  ;;  %v4860_v27 = vsel %vm3700_vm8, 4294967295, %v4859_v27  ;;  %v4862_v1 = vsel %vm3708_vm12, 4294967295, %v4861_v1  ;;  %v740_v3 = vunpack.c.l.b16 %v3683_v42  ;;  %v741_v10 = vunpack.c.h.b16 %v3683_v42  ;;  %v3729_v15 = vpop.permute.xlu2 %601  ;;  %s4948_s10 = smov 33   ;;  %s4949_s26 = smov 34  }
  0xfb   : > { %1021 = vrot.lane.b32.xlu1 %v1017_v34, %s4728_s16  ;;  %v822_v5 = vsel %vm3694_vm6, %v801_v48, 0  ;;  %vm4705_vm13 = vcmask 146432   ;;  %v896_v11 = vsel %vm3700_vm8, %v876_v57, 0  ;;  %vm3720_vm7 = vcmp.ne.s32.totalorder %v1107_v51, %v3447_v31  ;;  %v1102_v48 = vld [vmem:[#allocation2 + $0xc] sm:$0x3]  ;;  %s4920_s16 = smov 114  }
  0xfc   : > { %vm1112_vm14 = vcmp.ne.s32.totalorder %v1108_v52, %v3450_v32  ;;  %v1114_v13 = vunpack.c.l.b16 %v3652_v61  ;;  %v1173_v14 = vsel %vm3708_vm12, %v1153_v59, 0  ;;  %v1115_v16 = vunpack.c.h.b16 %v3652_v61 }
  0xfd   : > { %vm574_vm0 = vcmp.ne.s32.totalorder %v570_v28, %v3447_v31  ;;  %vm575_vm3 = vcmp.ne.s32.totalorder %v571_v58, %v3450_v32  ;;  %v826_v19 = vrot.slane %v822_v5, 6  ;;  %v1036_v21 = vsel %vm4705_vm13, %v1035_v2, %v3443_v26  ;;  %vm3743_vm10 = vmpackc.low %vm1112_vm14, %vm3720_vm7 }
  0xfe   : > { %vm744_vm5 = vcmp.ne.s32.totalorder %v740_v3, %v3447_v31  ;;  %vm745_vm6 = vcmp.ne.s32.totalorder %v741_v10, %v3450_v32  ;;  %v845_v22 = vsel %vm4865_vm2, %v3572_v41, %v3494_v56  ;;  %v1177_v63 = vrot.slane %v1173_v14, 6  ;;  %vm3747_vm8 = vmpackc.low %vm575_vm3, %vm574_vm0  ;;  %v1101_v41 = vld [vmem:[#allocation2 + $0x4] sm:$0x33] }
  0xff   : > { %v4866_v61 = vmov 0  ;;  %v4868_v24 = vmov 0  ;;  %v1037_v26 = vunpack.c.l.b16 %v1036_v21  ;;  %v1038_v30 = vunpack.c.h.b16 %v1036_v21  ;;  %vm3753_vm2 = vmpackc.low %vm745_vm6, %vm744_vm5 }
 0x100   : > { %v4867_v61 = vsel %vm3743_vm10, 4294967295, %v4866_v61  ;;  %v4869_v24 = vsel %vm3747_vm8, 4294967295, %v4868_v24  ;;  %v4871_v56 = vmov 0  ;;  %vm1118_vm7 = vcmp.ne.s32.totalorder %v1114_v13, %v3447_v31  ;;  %v840_v13 = vld [vmem:[#allocation2 + $0x4] sm:$0x33] }
 0x101   : > { %v4872_v56 = vsel %vm3753_vm2, 4294967295, %v4871_v56  ;;  %vm1119_vm14 = vcmp.ne.s32.totalorder %v1115_v16, %v3450_v32  ;;  %v846_v34 = vunpack.c.l.b16 %v845_v22  ;;  %v847_v35 = vunpack.c.h.b16 %v845_v22  ;;  %v1031_v16 = vld [vmem:[#allocation2 + $0x4] sm:$0x33] }
 0x102   : > { %715 = vrot.lane.b32.xlu2 %v711_v55, %s4747_s15  ;;  %868 = vrot.lane.b32.xlu0 %v865_v45, %s4757_s13  ;;  %v1044_v36 = vunpack.c.l.b16 %v1035_v2  ;;  %v3760_v38 = vrot.slane %v3542_v20, 4  ;;  %v584_v46 = vsel %vm3747_vm8, %v557_v23, 0  ;;  %v1045_v47 = vunpack.c.h.b16 %v1035_v2  ;;  %vm3767_vm5 = vmpackc.low %vm1119_vm14, %vm1118_vm7  ;;  %v3788_v58 = vpop.permute.xlu2 %462  ;;  %v1032_v23 = vld [vmem:[#allocation2 + $0xc] sm:$0x3]  ;;  %s4770_s15 = smov 16  }
 0x103   : > { %900 = vrot.lane.b32.xlu1 %v896_v11, %s4759_s11  ;;  %v748_v45 = vsel %vm3753_vm2, %v727_v33, 0  ;;  %v4873_v51 = vmov 0  ;;  %v1121_v52 = vsel %vm3743_vm10, %v1101_v41, 0  ;;  %vm1041_vm3 = vcmp.ne.s32.totalorder %v1037_v26, %v3447_v31  ;;  %s4956_s11 = smov 96  }
 0x104   : > { %v4874_v51 = vsel %vm3767_vm5, 4294967295, %v4873_v51  ;;  %vm1042_vm13 = vcmp.ne.s32.totalorder %v1038_v30, %v3450_v32  ;;  %vm3776_vm0 = vcmp.ne.s32.totalorder %v846_v34, %v3447_v31  ;;  %vm3781_vm6 = vcmp.ne.s32.totalorder %v847_v35, %v3450_v32  ;;  %v3839_v35 = vpop.permute.xlu0 %521 }
 0x105   : > { %vm4879_vm7 = vcmask 1039360   ;;  %vm4880_vm14 = vcmask 113664   ;;  %v752_v2 = vrot.slane %v748_v45, 6  ;;  %v1122_v3 = vsel %vm3767_vm5, %v1102_v48, 0  ;;  %vm3808_vm8 = vmpackc.low %vm1042_vm13, %vm1041_vm3 }
 0x106   : > { %v806_v28 = vsel %vm4879_vm7, %v3621_v7, %v3603_v62  ;;  %v915_v59 = vsel %vm4880_vm14, %v3760_v38, %v3542_v20  ;;  %v1125_v10 = vrot.slane %v1121_v52, 6  ;;  %v3796_v5 = vrot.slane %v3729_v15, 4  ;;  %vm3818_vm5 = vmpackc.low %vm3781_vm6, %vm3776_vm0 }
 0x107   : > { %vm3799_vm10 = vcmp.ne.s32.totalorder %v1044_v36, %v3447_v31  ;;  %vm3804_vm7 = vcmp.ne.s32.totalorder %v1045_v47, %v3450_v32  ;;  %v4885_v20 = vmov 0  ;;  %v807_v7 = vunpack.c.l.b16 %v806_v28 }
 0x108   : > { %v4886_v20 = vsel %vm3808_vm8, 4294967295, %v4885_v20  ;;  %v808_v12 = vunpack.c.h.b16 %v806_v28  ;;  %vm4714_vm14 = vcmask 900096   ;;  %v4888_v14 = vmov 0  ;;  %vm3826_vm3 = vmpackc.low %vm3804_vm7, %vm3799_vm10  ;;  %v800_v28 = vld [vmem:[#allocation2] sm:$0x33] }
 0x109   : > { %v4889_v14 = vsel %vm3818_vm5, 4294967295, %v4888_v14  ;;  %v917_v21 = vunpack.c.h.b16 %v915_v59  ;;  %v1126_v22 = vrot.slane %v1122_v3, 6  ;;  %v4890_v26 = vmov 0 }
 0x10a   : > { %1180 = vrot.lane.b32.xlu2 %v1177_v63, %s4768_s20  ;;  %829 = vrot.lane.b32.xlu0 %v826_v19, %s4870_s21  ;;  %v916_v19 = vunpack.c.l.b16 %v915_v59  ;;  %v640_v63 = vpop.permute.xlu1 %639  ;;  %v4891_v26 = vsel %vm3826_vm3, 4294967295, %v4890_v26  ;;  %v923_v30 = vunpack.c.l.b16 %v3760_v38  ;;  %v605_v33 = vsel %vm4714_vm14, %v3796_v5, %v3729_v15  ;;  %v1142_v57 = vpop.permute.xlu2 %1141 }
 0x10b   : > { %588 = vrot.lane.b32.xlu1 %v584_v46, %s4738_s19  ;;  %v860_v41 = vsel %vm3818_vm5, %v840_v13, 0  ;;  %v1051_v34 = vsel %vm3808_vm8, %v1031_v16, 0  ;;  %v924_v36 = vunpack.c.h.b16 %v3760_v38  ;;  %vm811_vm10 = vcmp.ne.s32.totalorder %v807_v7, %v3447_v31  ;;  %v637_v13 = vld [vmem:[#allocation2] sm:$0x33]  ;;  %s4931_s19 = smov 17  }
 0x10c   : > { %vm812_vm0 = vcmp.ne.s32.totalorder %v808_v12, %v3450_v32  ;;  %v3844_v46 = vrot.slane %v640_v63, 4  ;;  %vm3847_vm6 = vcmp.ne.s32.totalorder %v916_v19, %v3447_v31  ;;  %vm3852_vm7 = vcmp.ne.s32.totalorder %v917_v21, %v3450_v32 }
 0x10d   : > { %v1052_v45 = vsel %vm3826_vm3, %v1032_v23, 0  ;;  %vm4721_vm14 = vcmask 908288   ;;  %v606_v38 = vunpack.c.l.b16 %v605_v33  ;;  %v607_v48 = vunpack.c.h.b16 %v605_v33  ;;  %vm3858_vm13 = vmpackc.low %vm812_vm0, %vm811_vm10  ;;  %v1144_v23 = vpop.permute.xlu0 %1143 }
 0x10e   : > { %v864_v52 = vrot.slane %v860_v41, 6  ;;  %v1055_v55 = vrot.slane %v1051_v34, 6  ;;  %v4896_v59 = vmov 0  ;;  %vm3867_vm8 = vcmp.ne.s32.totalorder %v923_v30, %v3447_v31  ;;  %vm3876_vm10 = vmpackc.low %vm3852_vm7, %vm3847_vm6 }
 0x10f   : > { %v4897_v59 = vsel %vm3858_vm13, 4294967295, %v4896_v59  ;;  %vm928_vm3 = vcmp.ne.s32.totalorder %v924_v36, %v3450_v32  ;;  %v4901_v11 = vmov 0  ;;  %vm4903_vm0 = vcmask 269312  }
 0x110   : > { %v4902_v11 = vsel %vm3876_vm10, 4294967295, %v4901_v11  ;;  %v1157_v62 = vsel %vm4903_vm0, %v3624_v9, %v3463_v39  ;;  %v1056_v7 = vrot.slane %v1052_v45, 6  ;;  %vm3884_vm5 = vcmp.ne.s32.totalorder %v606_v38, %v3447_v31  ;;  %v911_v9 = vld [vmem:[#allocation2 + $0xc] sm:$0x3]  ;;  %vm3898_vm6 = vmpackc.low %vm928_vm3, %vm3867_vm8  ;;  %v599_v45 = vld [vmem:[#allocation2] sm:$0x33] }
 0x111   : > { %vm3889_vm2 = vcmp.ne.s32.totalorder %v607_v48, %v3450_v32  ;;  %v1145_v16 = vrot.slane %v1142_v57, 4  ;;  %v821_v19 = vsel %vm3858_vm13, %v800_v28, 0  ;;  %vm4727_vm7 = vcmask 1043456   ;;  %v674_v28 = vld [vmem:[#allocation2 + $0x8] sm:$0x3] }
 0x112   : > { %755 = vrot.lane.b32.xlu2 %v752_v2, %s4887_s24  ;;  %1127 = vrot.lane.b32.xlu0 %v1125_v10, %s4715_s25  ;;  %v643_v2 = vsel %vm4721_vm14, %v3844_v46, %v640_v63  ;;  %v910_v10 = vld [vmem:[#allocation2 + $0x4] sm:$0x33]  ;;  %vm4726_vm14 = vcmask 932864   ;;  %v1158_v30 = vunpack.c.l.b16 %v1157_v62  ;;  %v1159_v33 = vunpack.c.h.b16 %v1157_v62  ;;  %vm3913_vm8 = vmpackc.low %vm3889_vm2, %vm3884_vm5  ;;  %v420_v62 = vpop.permute.xlu1 %419 }
 0x113   : > { %1129 = vrot.lane.b32.xlu1 %v1126_v22, %s4715_s25  ;;  %s4898_s25 = smov 110   ;;  %v644_v21 = vunpack.c.l.b16 %v643_v2  ;;  %v645_v39 = vunpack.c.h.b16 %v643_v2  ;;  %v4908_v22 = vmov 0  ;;  %v930_v63 = vsel %vm3876_vm10, %v910_v10, 0  ;;  %v987_v10 = vpop.permute.xlu2 %986 }
 0x114   : > { %v4909_v22 = vsel %vm3898_vm6, 4294967295, %v4908_v22  ;;  %vm4730_vm0 = vcmask 785408   ;;  %v1146_v41 = vrot.slane %v1144_v23, 4  ;;  %v732_v34 = vsel %vm4726_vm14, %v3683_v42, %v3512_v0 }
 0x115   : > { %v825_v36 = vrot.slane %v821_v19, 6  ;;  %v931_v15 = vsel %vm3898_vm6, %v911_v9, 0  ;;  %v934_v47 = vrot.slane %v930_v63, 6  ;;  %v4910_v38 = vmov 0 }
 0x116   : > { %v4911_v38 = vsel %vm3913_vm8, 4294967295, %v4910_v38  ;;  %v1147_v48 = vsel %vm4727_vm7, %v1145_v16, %v1146_v41  ;;  %vm3922_vm3 = vcmp.ne.s32.totalorder %v644_v21, %v3447_v31  ;;  %vm3927_vm14 = vcmp.ne.s32.totalorder %v645_v39, %v3450_v32  ;;  %v1152_v39 = vld [vmem:[#allocation2 + $0x4] sm:$0x33] }
 0x117   : > { %vm3933_vm2 = vcmp.ne.s32.totalorder %v1158_v30, %v3447_v31  ;;  %vm3938_vm5 = vcmp.ne.s32.totalorder %v1159_v33, %v3450_v32  ;;  %vm4733_vm7 = vcmask 777216   ;;  %v935_v3 = vrot.slane %v931_v15, 6  ;;  %v989_v30 = vpop.permute.xlu0 %988 }
 0x118   : > { %v990_v12 = vrot.slane %v987_v10, 4  ;;  %v4921_v16 = vmov 0  ;;  %v734_v19 = vunpack.c.h.b16 %v732_v34  ;;  %vm3962_vm10 = vmpackc.low %vm3938_vm5, %vm3933_vm2  ;;  %v4923_v9 = vmov 0 }
 0x119   : > { %v4924_v9 = vsel %vm3962_vm10, 4294967295, %v4923_v9  ;;  %v651_v63 = vunpack.c.l.b16 %v3844_v46  ;;  %v652_v23 = vunpack.c.h.b16 %v3844_v46  ;;  %v3968_v41 = vrot.slane %v420_v62, 4 }
 0x11a   : > { %866 = vrot.lane.b32.xlu2 %v864_v52, %s4757_s13  ;;  %1057 = vrot.lane.b32.xlu0 %v1055_v55, %s4898_s25  ;;  %v3919_v52 = vrot.slane %v3788_v58, 4  ;;  %v1149_v55 = vsel %vm4730_vm0, %v1142_v57, %v1147_v48  ;;  %v620_v57 = vsel %vm3913_vm8, %v599_v45, 0  ;;  %vm3950_vm0 = vmpackc.low %vm3927_vm14, %vm3922_vm3  ;;  %vm4740_vm14 = vcmask 916480   ;;  %s4763_s13 = smov 32  }
 0x11b   : > { %1059 = vrot.lane.b32.xlu1 %v1056_v7, %s4898_s25  ;;  %1151 = vst [vmem:[#allocation3 + $0x58] sm:$0x33] %v1149_v55  ;;  %v733_v7 = vunpack.c.l.b16 %v732_v34  ;;  %v4922_v16 = vsel %vm3950_vm0, 4294967295, %v4921_v16  ;;  %v624_v33 = vrot.slane %v620_v57, 6  ;;  %v658_v34 = vsel %vm3950_vm0, %v637_v13, 0 }
 0x11c   : > { %v466_v21 = vsel %vm4733_vm7, %v3919_v52, %v3788_v58  ;;  %v991_v58 = vrot.slane %v989_v30, 4  ;;  %v1172_v15 = vsel %vm3962_vm10, %v1152_v39, 0  ;;  %vm4925_vm2 = vcmask 1043456  }
 0x11d   : > { %v468_v45 = vunpack.c.h.b16 %v466_v21  ;;  %vm655_vm5 = vcmp.ne.s32.totalorder %v651_v63, %v3447_v31  ;;  %vm656_vm7 = vcmp.ne.s32.totalorder %v652_v23, %v3450_v32  ;;  %vm3979_vm6 = vcmp.ne.s32.totalorder %v733_v7, %v3447_v31  ;;  %v454_v23 = vld [vmem:[#allocation2] sm:$0x33] }
 0x11e   : > { %vm3984_vm3 = vcmp.ne.s32.totalorder %v734_v19, %v3450_v32  ;;  %v1176_v55 = vrot.slane %v1172_v15, 6  ;;  %v613_v2 = vunpack.c.l.b16 %v3796_v5  ;;  %v4933_v57 = vmov 0  ;;  %v600_v15 = vld [vmem:[#allocation2 + $0x8] sm:$0x3] }
 0x11f   : > { %vm472_vm8 = vcmp.ne.s32.totalorder %v468_v45, %v3450_v32  ;;  %v678_v13 = vrot.slane %v674_v28, 6  ;;  %v411_v45 = vld [vmem:[#allocation2] sm:$0x33]  ;;  %v431_v63 = vunpack.c.l.b16 %v3968_v41 }
 0x122   : > { %827 = vrot.lane.b32.xlu2 %v825_v36, %s4870_s21  ;;  %936 = vrot.lane.b32.xlu0 %v934_v47, %s4920_s16  ;;  %v467_v36 = vunpack.c.l.b16 %v466_v21  ;;  %v992_v47 = vsel %vm4925_vm2, %v990_v12, %v991_v58  ;;  %vm4932_vm2 = vcmask 769024   ;;  %v726_v12 = vld [vmem:[#allocation2] sm:$0x33]  ;;  %v475_v58 = vunpack.c.h.b16 %v3919_v52 }
 0x123   : > { %938 = vrot.lane.b32.xlu1 %v935_v3, %s4920_s16  ;;  %v994_v46 = vsel %vm4740_vm14, %v987_v10, %v992_v47  ;;  %v423_v42 = vsel %vm4932_vm2, %v3968_v41, %v420_v62  ;;  %v614_v3 = vunpack.c.h.b16 %v3796_v5  ;;  %v638_v10 = vld [vmem:[#allocation2 + $0x8] sm:$0x3]  ;;  %vm3994_vm14 = vmpackc.low %vm656_vm7, %vm655_vm5  ;;  %v4935_v5 = vmov 0 }
 0x124   : > { %996 = vst [vmem:[#allocation3 + $0x40] sm:$0xcc] %v994_v46  ;;  %v4934_v57 = vsel %vm3994_vm14, 4294967295, %v4933_v57  ;;  %vm471_vm10 = vcmp.ne.s32.totalorder %v467_v36, %v3447_v31  ;;  %v424_v7 = vunpack.c.l.b16 %v423_v42  ;;  %v425_v62 = vunpack.c.h.b16 %v423_v42  ;;  %vm4005_vm2 = vmpackc.low %vm3984_vm3, %vm3979_vm6 }
 0x125   : > { %v4936_v5 = vsel %vm4005_vm2, 4294967295, %v4935_v5  ;;  %v659_v19 = vsel %vm3994_vm14, %v638_v10, 0  ;;  %v747_v39 = vsel %vm4005_vm2, %v726_v12, 0  ;;  %vm4016_vm7 = vcmp.ne.s32.totalorder %v613_v2, %v3447_v31  ;;  %vm4021_vm6 = vmpackc.low %vm472_vm8, %vm471_vm10  ;;  %v455_v2 = vld [vmem:[#allocation2 + $0x8] sm:$0x3] }
 0x126   : > { %vm618_vm5 = vcmp.ne.s32.totalorder %v614_v3, %v3450_v32  ;;  %vm428_vm3 = vcmp.ne.s32.totalorder %v424_v7, %v3447_v31  ;;  %vm429_vm2 = vcmp.ne.s32.totalorder %v425_v62, %v3450_v32  ;;  %v751_v36 = vrot.slane %v747_v39, 6  ;;  %v673_v12 = vld [vmem:[#allocation2] sm:$0x33] }
 0x127   : > { %vm4036_vm8 = vmpackc.low %vm618_vm5, %vm4016_vm7  ;;  %v4943_v46 = vmov 0  ;;  %vm479_vm10 = vcmp.ne.s32.totalorder %v475_v58, %v3450_v32  ;;  %vm4945_vm7 = vcmask 793600   ;;  %v4946_v3 = vmov 0 }
 0x128   : > { %vm4042_vm13 = vmpackc.low %vm429_vm2, %vm428_vm3  ;;  %v621_v0 = vsel %vm4036_vm8, %v600_v15, 0  ;;  %v4950_v39 = vmov 0  ;;  %v677_v58 = vrot.slane %v673_v12, 6 }
 0x129   : > { %v4944_v46 = vsel %vm4042_vm13, 4294967295, %v4943_v46  ;;  %v625_v62 = vrot.slane %v621_v0, 6 }
 0x12a   : > { %626 = vrot.lane.b32.xlu0 %v624_v33, %s4930_s18  ;;  %662 = vrot.lane.b32.xlu2 %v658_v34, %s4931_s19  ;;  %v474_v33 = vunpack.c.l.b16 %v3919_v52  ;;  %v4032_v34 = vrot.slane %v3839_v35, 4  ;;  %v481_v52 = vsel %vm4021_vm6, %v454_v23, 0  ;;  %v432_v23 = vunpack.c.h.b16 %v3968_v41  ;;  %v1236_v41 = vld [vmem:[%s4952_s4] sm:$0x3]  ;;  %s5001_s4 = smov 2  }
 0x12b   : > { %1178 = vrot.lane.b32.xlu1 %v1176_v55, %s4768_s20  ;;  %v485_v42 = vrot.slane %v481_v52, 6  ;;  %v438_v55 = vsel %vm4042_vm13, %v411_v45, 0  ;;  %v412_v45 = vld [vmem:[#allocation2 + $0x8] sm:$0x3] }
 0x12c   : > { %vm478_vm4 = vcmp.ne.s32.totalorder %v474_v33, %v3447_v31  ;;  %v525_v48 = vsel %vm4945_vm7, %v4032_v34, %v3839_v35  ;;  %v513_v33 = vld [vmem:[#allocation2] sm:$0x33]  ;;  %vm436_vm7 = vcmp.ne.s32.totalorder %v432_v23, %v3450_v32 }
 0x12d   : > { %v4011_v21 = vpop.permute.xlu2 %1093  ;;  %vm4058_vm2 = vmpackc.low %vm479_vm10, %vm478_vm4  ;;  %v526_v10 = vunpack.c.l.b16 %v525_v48  ;;  %v527_v7 = vunpack.c.h.b16 %v525_v48  ;;  %vm435_vm10 = vcmp.ne.s32.totalorder %v431_v63, %v3447_v31  ;;  %v4953_v48 = vmov 0 }
 0x12e   : > { %v4947_v3 = vsel %vm4058_vm2, 4294967295, %v4946_v3  ;;  %v482_v35 = vsel %vm4058_vm2, %v455_v2, 0 }
 0x12f   : > { %vm530_vm5 = vcmp.ne.s32.totalorder %v526_v10, %v3447_v31  ;;  %vm531_vm3 = vcmp.ne.s32.totalorder %v527_v7, %v3450_v32  ;;  %v533_v10 = vunpack.c.l.b16 %v4032_v34  ;;  %v534_v7 = vunpack.c.h.b16 %v4032_v34 }
 0x130   : > { %vm4069_vm4 = vmpackc.low %vm531_vm3, %vm530_vm5  ;;  %v4958_v34 = vmov 0 }
 0x131   : > { %v4951_v39 = vsel %vm4069_vm4, 4294967295, %v4950_v39  ;;  %v540_v15 = vsel %vm4069_vm4, %v513_v33, 0  ;;  %vm4087_vm5 = vmpackc.low %vm436_vm7, %vm435_vm10  ;;  %vm537_vm3 = vcmp.ne.s32.totalorder %v533_v10, %v3447_v31  ;;  %vm538_vm10 = vcmp.ne.s32.totalorder %v534_v7, %v3450_v32  ;;  %v973_v33 = vpop.permute.xlu1 %972  ;;  %v1566_v7 = vld [vmem:[#allocation2 + $0xc] sm:$0x1] }
 0x132   : > { %664 = vrot.lane.b32.xlu0 %v659_v19, %s4931_s19  ;;  %681 = vrot.lane.b32.xlu2 %v678_v13, %s4770_s15  ;;  %v486_v13 = vrot.slane %v482_v35, 6  ;;  %v499_v19 = vld [vmem:[#allocation2 + $0x8] sm:$0x3]  ;;  %v544_v52 = vrot.slane %v540_v15, 6  ;;  %v4954_v48 = vsel %vm4087_vm5, 4294967295, %v4953_v48  ;;  %v439_v0 = vsel %vm4087_vm5, %v412_v45, 0  ;;  %vm4106_vm7 = vmpackc.low %vm538_vm10, %vm537_vm3 }
 0x133   : > { %753 = vrot.lane.b32.xlu1 %v751_v36, %s4887_s24  ;;  %v4959_v34 = vsel %vm4106_vm7, 4294967295, %v4958_v34  ;;  %v1584_v15 = vld [vmem:[#allocation2 + $0xc] sm:$0x1]  ;;  %vm4961_vm4 = vcmask 769024   ;;  %vm1311_vm3 = vcmask 1041408  }
 0x134   : > { %v1586_v32 = vsel %vm3519_vm11, %v1584_v15, 0 }
 0x135   : > { %v4056_v28 = vpop.permute.xlu2 %1023 }
 0x13a   : > { %487 = vrot.lane.b32.xlu2 %v485_v42, %s4948_s10  ;;  %442 = vrot.lane.b32.xlu0 %v438_v55, %s4949_s26  ;;  %v1736_v42 = vld [vmem:[#allocation2 + $0xc] sm:$0x1] }
 0x13b   : > { %628 = vrot.lane.b32.xlu1 %v625_v62, %s4930_s18  ;;  %v1738_v2 = vsel %vm3708_vm12, %v1736_v42, 0  ;;  %v1722_v62 = vld [vmem:[#allocation2 + $0xc] sm:$0x1]  ;;  %vm4960_vm12 = vcmask 1043456  }
 0x13c   : > { %v1742_v35 = vrot.slane %v1738_v2, 7  ;;  %v1215_v12 = vpop.permute.xlu0 %1214  ;;  %vm4965_vm10 = vmmov %vm4960_vm12 }
 0x13d   : > { %v4077_v36 = vpop.permute.xlu2 %902  ;;  %v1217_v63 = vrot.slane %v1215_v12, 4 }
 0x142   : > { %504 = vrot.lane.b32.xlu2 %v499_v19, %s4763_s13  ;;  %489 = vrot.lane.b32.xlu0 %v486_v13, %s4948_s10  ;;  %s4955_s13 = smov 31   ;;  %v498_v13 = vld [vmem:[#allocation2] sm:$0x33] }
 0x143   : > { %679 = vrot.lane.b32.xlu1 %v677_v58, %s4770_s15  ;;  %v514_v58 = vld [vmem:[#allocation2 + $0x8] sm:$0x3]  ;;  %s4964_s15 = smov 127  }
 0x144   : > { %v541_v31 = vsel %vm4106_vm7, %v514_v58, 0 }
 0x145   : > { %v545_v45 = vrot.slane %v541_v31, 6 }
 0x14a   : > { %1239 = vperm.xlu2 %3112, %v1236_v41   ;;  %546 = vrot.lane.b32.xlu0 %v544_v52, %s4955_s13 }
 0x14b   : > { %444 = vrot.lane.b32.xlu1 %v439_v0, %s4949_s26 }
 0x14c   : > { %v4094_v55 = vpop.permute.xlu2 %590 }
 0x152   : > { %1745 = vrot.lane.b32.xlu2 %v1742_v35, %s4768_s20  ;;  %1727 = vrot.lane.b32.xlu0 %v1722_v62, %s4956_s11  ;;  %s4962_s20 = smov 126  }
 0x153   : > { %502 = vrot.lane.b32.xlu1 %v498_v13, %s4957_s14  ;;  %v1568_v13 = vsel %vm3658_vm9, %v1566_v7, 0  ;;  %vm4968_vm9 = vcmask 801792  }
 0x154   : > { %v1213_v19 = vpop.permute.xlu2 %1212  ;;  %v1572_v58 = vrot.slane %v1568_v13, 5 }
 0x155   : > { %v1216_v23 = vrot.slane %v1213_v19, 4 }
 0x157   : > { %v1218_v52 = vsel %vm4960_vm12, %v1216_v23, %v1217_v63 }
 0x158   : > { %v1219_v41 = vsel %vm4961_vm4, %v1213_v19, %v1218_v52  ;;  %vm4963_vm4 = vcmask 121856  }
 0x159   : > { %1221 = vst [vmem:[#allocation3 + $0x60] sm:$0x33] %v1219_v41 }
 0x15a   : > { %1591 = vrot.lane.b32.xlu0 %v1586_v32, %s4962_s20  ;;  %v975_v32 = vrot.slane %v973_v33, 4 }
 0x15b   : > { %548 = vrot.lane.b32.xlu1 %v545_v45, %s4955_s13 }
 0x15c   : > { %v718_v0 = vpop.permute.xlu0 %717  ;;  %v716_v42 = vpop.permute.xlu2 %715 }
 0x15d   : > { %v720_v2 = vrot.slane %v718_v0, 4  ;;  %v719_v10 = vrot.slane %v716_v42, 4  ;;  %v792_v35 = vpop.permute.xlu1 %791 }
 0x15f   : > { %v721_v62 = vsel %vm4960_vm12, %v719_v10, %v720_v2  ;;  %v1754_v2 = vld [vmem:[#allocation2 + $0xc] sm:$0x1]  ;;  %vm4966_vm12 = vcmask 924672  }
 0x160   : > { %v723_v12 = vsel %vm4963_vm4, %v716_v42, %v721_v62  ;;  %v1235_v19 = vld [vmem:[#allocation3 + $0x60] sm:$0x33]  ;;  %v1096_v62 = vrot.slane %v4011_v21, 4  ;;  %vm4967_vm4 = vmmov %vm4965_vm10 }
 0x161   : > { %725 = vst [vmem:[#allocation3 + $0x20] sm:$0x33] %v723_v12  ;;  %v1279_v63 = vunpack.c.l.b16 %v1235_v19  ;;  %v1280_v23 = vunpack.c.h.b16 %v1235_v19  ;;  %v1756_v19 = vsel %vm3472_vm1, %v1754_v2, 0  ;;  %vm4977_vm1 = vcmask 1031168  }
 0x163   : > { %v1293_v15 = vpack.c.b16 %v1279_v63, %v1279_v63  ;;  %v1294_v52 = vpack.c.b16 %v1280_v23, %v1280_v23  ;;  %1575 = vrot.lane.b32.xlu1 %v1572_v58, %s4964_s15  ;;  %v1760_v23 = vrot.slane %v1756_v19, 6 }
 0x164   : > { %v971_v41 = vpop.permute.xlu0 %970  ;;  %v4122_v31 = vpop.permute.xlu2 %1180 }
 0x165   : > { %v974_v45 = vrot.slane %v971_v41, 4  ;;  %v1313_v0 = vsel %vm1311_vm3, %v1293_v15, 0  ;;  %v1316_v42 = vsel %vm1311_vm3, %v1294_v52, 0  ;;  %v1092_v7 = vpop.permute.xlu1 %1091  ;;  %v794_v52 = vrot.slane %v792_v35, 4  ;;  %vm4970_vm3 = vmmov %vm4967_vm4 }
 0x166   : > { %1319 = vmatpush.bf16.msra.mxu0 %v1313_v0  ;;  %1332 = vmatpush.bf16.msra.mxu1 %v1316_v42  ;;  %v1095_v13 = vrot.slane %v1092_v7, 4 }
 0x167   : > { %v976_v10 = vsel %vm4965_vm10, %v974_v45, %v975_v32  ;;  %v1026_v45 = vrot.slane %v4056_v28, 4  ;;  %vm4971_vm10 = vcmask 15360  }
 0x168   : > { %v977_v12 = vsel %vm4966_vm12, %v971_v41, %v976_v10  ;;  %v1097_v33 = vsel %vm4967_vm4, %v1095_v13, %v1096_v62  ;;  %vm4972_vm12 = vmmov %vm4970_vm3 }
 0x169   : > { %979 = vst [vmem:[#allocation3 + $0x40] sm:$0x33] %v977_v12  ;;  %v1098_v63 = vsel %vm4968_vm9, %v1092_v7, %v1097_v33  ;;  %vm4973_vm9 = vcmask 908288   ;;  %vm4974_vm4 = vmmov %vm4970_vm3  ;;  %v905_v33 = vrot.slane %v4077_v36, 4 }
 0x16a   : > { %1100 = vst [vmem:[#allocation3 + $0x50] sm:$0x33] %v1098_v63 }
 0x16b   : > { %1763 = vrot.lane.b32.xlu1 %v1760_v23, %s4969_s0 }
 0x16c   : > { %v4132_v58 = vpop.permute.xlu2 %755  ;;  %v790_v15 = vpop.permute.xlu0 %789 }
 0x16d   : > { %v793_v21 = vrot.slane %v790_v15, 4  ;;  %v1022_v32 = vpop.permute.xlu1 %1021 }
 0x16e   : > { %v1025_v42 = vrot.slane %v1022_v32, 4 }
 0x16f   : > { %v795_v41 = vsel %vm4970_vm3, %v793_v21, %v794_v52  ;;  %vm4975_vm3 = vcmask 1039360  }
 0x170   : > { %v797_v0 = vsel %vm4971_vm10, %v790_v15, %v795_v41  ;;  %v1027_v2 = vsel %vm4972_vm12, %v1025_v42, %v1026_v45  ;;  %vm4976_vm10 = vmmov %vm4974_vm4  ;;  %v593_v42 = vrot.slane %v4094_v55, 4 }
 0x171   : > { %799 = vst [vmem:[#allocation3 + $0x28] sm:$0x33] %v797_v0  ;;  %v1028_v10 = vsel %vm4973_vm9, %v1022_v32, %v1027_v2  ;;  %vm4978_vm12 = vmmov %vm4974_vm4  ;;  %vm4979_vm9 = vcmask 7168  }
 0x172   : > { %1030 = vst [vmem:[#allocation3 + $0x48] sm:$0x33] %v1028_v10  ;;  %v838_v10 = vld [vmem:[#allocation2 + $0x4] sm:$0x33] }
 0x173   : > { %839 = vst [vmem:[#allocation3 + $0x30] sm:$0x33] %v838_v10 }
 0x174   : > { %v867_v7 = vpop.permute.xlu2 %866  ;;  %v869_v62 = vpop.permute.xlu0 %868 }
 0x175   : > { %v870_v35 = vrot.slane %v867_v7, 4  ;;  %v871_v12 = vrot.slane %v869_v62, 4  ;;  %v901_v19 = vpop.permute.xlu1 %900 }
 0x176   : > { %v904_v63 = vrot.slane %v901_v19, 4 }
 0x177   : > { %v872_v13 = vsel %vm4974_vm4, %v870_v35, %v871_v12 }
 0x178   : > { %v873_v28 = vsel %vm4975_vm3, %v867_v7, %v872_v13  ;;  %v906_v23 = vsel %vm4976_vm10, %v904_v63, %v905_v33  ;;  %vm4980_vm3 = vcmask 244736   ;;  %vm4982_vm10 = vcmask 793600  }
 0x179   : > { %875 = vst [vmem:[#allocation3 + $0x30] sm:$0xcc] %v873_v28  ;;  %v907_v15 = vsel %vm4977_vm1, %v901_v19, %v906_v23  ;;  %vm4981_vm1 = vmmov %vm4974_vm4 }
 0x17a   : > { %909 = vst [vmem:[#allocation3 + $0x38] sm:$0x33] %v907_v15 }
 0x17c   : > { %v828_v52 = vpop.permute.xlu2 %827  ;;  %v830_v21 = vpop.permute.xlu0 %829 }
 0x17d   : > { %v831_v41 = vrot.slane %v828_v52, 4  ;;  %v832_v32 = vrot.slane %v830_v21, 4  ;;  %v589_v0 = vpop.permute.xlu1 %588 }
 0x17e   : > { %v592_v2 = vrot.slane %v589_v0, 4 }
 0x17f   : > { %v833_v45 = vsel %vm4978_vm12, %v831_v41, %v832_v32  ;;  %vm4983_vm12 = vmmov %vm4981_vm1 }
 0x180   : > { %v835_v36 = vsel %vm4979_vm9, %v828_v52, %v833_v45  ;;  %v594_v7 = vsel %vm4974_vm4, %v592_v2, %v593_v42  ;;  %vm4984_vm9 = vcmask 900096   ;;  %vm4985_vm4 = vmmov %vm4981_vm1 }
 0x181   : > { %837 = vst [vmem:[#allocation3 + $0x28] sm:$0xcc] %v835_v36  ;;  %v596_v62 = vsel %vm4980_vm3, %v589_v0, %v594_v7  ;;  %vm4986_vm3 = vcmask 932864   ;;  %v1183_v7 = vrot.slane %v4122_v31, 4 }
 0x182   : > { %598 = vst [vmem:[#allocation3 + $0x10] sm:$0x33] %v596_v62 }
 0x184   : > { %v1128_v35 = vpop.permute.xlu0 %1127  ;;  %v663_v62 = vpop.permute.xlu2 %662 }
 0x185   : > { %v1131_v12 = vrot.slane %v1128_v35, 4  ;;  %v1130_v13 = vpop.permute.xlu1 %1129 }
 0x186   : > { %v1132_v19 = vrot.slane %v1130_v13, 4 }
 0x188   : > { %v1133_v33 = vsel %vm4981_vm1, %v1131_v12, %v1132_v19 }
 0x189   : > { %v1134_v28 = vsel %vm4982_vm10, %v1128_v35, %v1133_v33  ;;  %vm4987_vm10 = vcmask 777216   ;;  %v666_v33 = vrot.slane %v663_v62, 4 }
 0x18a   : > { %1136 = vst [vmem:[#allocation3 + $0x50] sm:$0xcc] %v1134_v28 }
 0x18c   : > { %v1058_v55 = vpop.permute.xlu0 %1057  ;;  %v682_v31 = vpop.permute.xlu2 %681 }
 0x18d   : > { %v1061_v63 = vrot.slane %v1058_v55, 4  ;;  %v1060_v23 = vpop.permute.xlu1 %1059 }
 0x18e   : > { %v1062_v15 = vrot.slane %v1060_v23, 4  ;;  %v758_v23 = vrot.slane %v4132_v58, 4 }
 0x190   : > { %v1063_v52 = vsel %vm4983_vm12, %v1061_v63, %v1062_v15  ;;  %vm4988_vm12 = vmmov %vm4981_vm1 }
 0x191   : > { %v1064_v21 = vsel %vm4984_vm9, %v1058_v55, %v1063_v52  ;;  %vm4989_vm9 = vcmask 138240  }
 0x192   : > { %1066 = vst [vmem:[#allocation3 + $0x48] sm:$0xcc] %v1064_v21 }
 0x194   : > { %v937_v41 = vpop.permute.xlu0 %936 }
 0x195   : > { %v940_v32 = vrot.slane %v937_v41, 4  ;;  %v939_v45 = vpop.permute.xlu1 %938 }
 0x196   : > { %v941_v0 = vrot.slane %v939_v45, 4 }
 0x198   : > { %v942_v42 = vsel %vm4985_vm4, %v940_v32, %v941_v0  ;;  %vm4990_vm4 = vmmov %vm4981_vm1  ;;  %v2985_v0 = vld [vmem:[#allocation3 + $0x54] sm:$0xf] }
 0x199   : > { %v943_v36 = vsel %vm4986_vm3, %v937_v41, %v942_v42  ;;  %v2787_v41 = vld [vmem:[#allocation3 + $0x50] sm:$0xf]  ;;  %vm4991_vm3 = vcmask 113664  }
 0x19a   : > { %945 = vst [vmem:[#allocation3 + $0x38] sm:$0xcc] %v943_v36 }
 0x19c   : > { %v627_v2 = vpop.permute.xlu0 %626 }
 0x19d   : > { %v1179_v10 = vpop.permute.xlu1 %1178 }
 0x19e   : > { %v1182_v35 = vrot.slane %v1179_v10, 4 }
 0x1a0   : > { %v1184_v12 = vsel %vm4981_vm1, %v1182_v35, %v1183_v7  ;;  %v2984_v35 = vld [vmem:[#allocation3 + $0x44] sm:$0xf0] }
 0x1a1   : > { %v1185_v13 = vsel %vm4987_vm10, %v1179_v10, %v1184_v12  ;;  %v2781_v12 = vld [vmem:[#allocation3 + $0x48] sm:$0xf0]  ;;  %vm4992_vm10 = vcmask 146432  }
 0x1a2   : > { %1187 = vst [vmem:[#allocation3 + $0x58] sm:$0xcc] %v1185_v13  ;;  %v2983_v13 = vld [vmem:[#allocation3 + $0x44] sm:$0xf] }
 0x1a4   : > { %v665_v19 = vpop.permute.xlu0 %664 }
 0x1a5   : > { %v667_v28 = vrot.slane %v665_v19, 4  ;;  %v754_v63 = vpop.permute.xlu1 %753  ;;  %v630_v19 = vrot.slane %v627_v2, 4 }
 0x1a6   : > { %v757_v52 = vrot.slane %v754_v63, 4 }
 0x1a7   : > { %v668_v55 = vsel %vm4988_vm12, %v666_v33, %v667_v28  ;;  %vm4993_vm12 = vmmov %vm4981_vm1 }
 0x1a8   : > { %v670_v15 = vsel %vm4989_vm9, %v663_v62, %v668_v55  ;;  %v759_v21 = vsel %vm4990_vm4, %v757_v52, %v758_v23  ;;  %v2779_v62 = vld [vmem:[#allocation3 + $0x40] sm:$0xf]  ;;  %v2784_v55 = vor.u32 %v2983_v13, %v2781_v12  ;;  %v2982_v23 = vld [vmem:[#allocation3 + $0x34] sm:$0xf0]  ;;  %v684_v12 = vrot.slane %v682_v31, 4 }
 0x1a9   : > { %672 = vst [vmem:[#allocation3 + $0x18] sm:$0x33] %v670_v15  ;;  %v761_v32 = vsel %vm4991_vm3, %v754_v63, %v759_v21  ;;  %v2986_v45 = vld [vmem:[#allocation3 + $0x54] sm:$0xf0]  ;;  %v2789_v42 = vld [vmem:[#allocation3 + $0x58] sm:$0xf0]  ;;  %v2780_v28 = vor.u32 %v2984_v35, %v2779_v62  ;;  %vm4995_vm3 = vmmov %vm4981_vm1 }
 0x1aa   : > { %763 = vst [vmem:[#allocation3 + $0x20] sm:$0xcc] %v761_v32  ;;  %v2788_v36 = vor.u32 %v2986_v45, %v2787_v41  ;;  %v2792_v10 = vor.u32 %v2985_v0, %v2789_v42  ;;  %v2773_v63 = vld [vmem:[#allocation3 + $0x38] sm:$0xf0]  ;;  %v2771_v21 = vld [vmem:[#allocation3 + $0x30] sm:$0xf]  ;;  %v488_v32 = vpop.permute.xlu2 %487 }
 0x1ab   : > { %v2981_v41 = vld [vmem:[#allocation3 + $0x34] sm:$0xf]  ;;  %v2772_v45 = vor.u32 %v2982_v23, %v2771_v21  ;;  %vm4776_vm9 = vcmask 130048   ;;  %vm4994_vm4 = vcmask 269312  }
 0x1ac   : > { %v443_v7 = vpop.permute.xlu0 %442  ;;  %1320 = vmatpush.bf16.msra.mxu0 %v2788_v36  ;;  %1333 = vmatpush.bf16.msra.mxu1 %v2792_v10  ;;  %v2776_v0 = vor.u32 %v2981_v41, %v2773_v63  ;;  %v491_v36 = vrot.slane %v488_v32, 4 }
 0x1ad   : > { %v629_v58 = vpop.permute.xlu1 %628 }
 0x1ae   : > { %v631_v33 = vrot.slane %v629_v58, 4 }
 0x1b0   : > { %v632_v15 = vsel %vm4981_vm1, %v630_v19, %v631_v33  ;;  %1321 = vmatpush.bf16.msra.mxu0 %v2780_v28  ;;  %1334 = vmatpush.bf16.msra.mxu1 %v2784_v55  ;;  %v2980_v19 = vld [vmem:[#allocation3 + $0x24] sm:$0xf0] }
 0x1b1   : > { %v634_v52 = vsel %vm4992_vm10, %v627_v2, %v632_v15  ;;  %v2763_v58 = vld [vmem:[#allocation3 + $0x20] sm:$0xf]  ;;  %v2979_v35 = vld [vmem:[#allocation3 + $0x24] sm:$0xf]  ;;  %v2765_v2 = vld [vmem:[#allocation3 + $0x28] sm:$0xf0] }
 0x1b2   : > { %636 = vst [vmem:[#allocation3 + $0x10] sm:$0xcc] %v634_v52  ;;  %v2764_v55 = vor.u32 %v2980_v19, %v2763_v58  ;;  %v2768_v23 = vor.u32 %v2979_v35, %v2765_v2  ;;  %v446_v52 = vrot.slane %v443_v7, 4  ;;  %vm4996_vm10 = vcmask 277504   ;;  %v505_v35 = vpop.permute.xlu2 %504 }
 0x1b4   : > { %v490_v42 = vpop.permute.xlu0 %489  ;;  %1322 = vmatpush.bf16.msra.mxu0 %v2772_v45  ;;  %1335 = vmatpush.bf16.msra.mxu1 %v2776_v0 }
 0x1b5   : > { %v492_v10 = vrot.slane %v490_v42, 4  ;;  %v680_v13 = vpop.permute.xlu1 %679 }
 0x1b6   : > { %v683_v28 = vrot.slane %v680_v13, 4 }
 0x1b7   : > { %v493_v62 = vsel %vm4993_vm12, %v491_v36, %v492_v10  ;;  %vm4777_vm12 = vcmask 261120  }
 0x1b8   : > { %v495_v33 = vsel %vm4994_vm4, %v488_v32, %v493_v62  ;;  %v685_v63 = vsel %vm4995_vm3, %v683_v28, %v684_v12  ;;  %1323 = vmatpush.bf16.msra.mxu0 %v2764_v55  ;;  %1336 = vmatpush.bf16.msra.mxu1 %v2768_v23  ;;  %v507_v12 = vrot.slane %v505_v35, 4  ;;  %vm4997_vm4 = vmmov %vm4981_vm1 }
 0x1b9   : > { %497 = vst [vmem:[#allocation3] sm:$0xcc] %v495_v33  ;;  %v687_v31 = vsel %vm4776_vm9, %v680_v13, %v685_v63  ;;  %v2755_v45 = vld [vmem:[#allocation3 + $0x10] sm:$0xf]  ;;  %v2977_v42 = vld [vmem:[#allocation3 + $0x14] sm:$0xf]  ;;  %vm4998_vm3 = vmmov %vm4981_vm1  ;;  %vm5008_vm9 = vnez %v4829_v18 }
 0x1ba   : > { %689 = vst [vmem:[#allocation3 + $0x18] sm:$0xcc] %v687_v31 }
 0x1bc   : > { %v547_v33 = vpop.permute.xlu0 %546 }
 0x1bd   : > { %v445_v15 = vpop.permute.xlu1 %444  ;;  %v550_v28 = vrot.slane %v547_v33, 4 }
 0x1be   : > { %v447_v21 = vrot.slane %v445_v15, 4 }
 0x1c0   : > { %v449_v41 = vsel %vm4981_vm1, %v446_v52, %v447_v21  ;;  %vm4999_vm1 = vcmask 252928  }
 0x1c1   : > { %v451_v0 = vsel %vm4996_vm10, %v443_v7, %v449_v41  ;;  %v2978_v32 = vld [vmem:[#allocation3 + $0x14] sm:$0xf0]  ;;  %v2757_v36 = vld [vmem:[#allocation3 + $0x18] sm:$0xf0]  ;;  %vm1307_vm10 = vcmask 818176  }
 0x1c2   : > { %453 = vst [vmem:[#allocation3] sm:$0x33] %v451_v0  ;;  %v2756_v10 = vor.u32 %v2978_v32, %v2755_v45  ;;  %v2760_v58 = vor.u32 %v2977_v42, %v2757_v36  ;;  %v1222_v0 = vld [vmem:[%s5000_s1] sm:$0x1]  ;;  %v1240_v32 = vpop.permute.xlu2 %1239  ;;  %v1347_v36 = vstv %s1344_s28  ;;  %s5004_s28 = smov 15   ;;  %s5014_s1 = smov 30  }
 0x1c4   : > { %1324 = vmatpush.bf16.msra.mxu0 %v2756_v10  ;;  %1337 = vmatpush.bf16.msra.mxu1 %v2760_v58 }
 0x1c5   : > { %v503_v62 = vpop.permute.xlu1 %502 }
 0x1c6   : > { %v506_v13 = vrot.slane %v503_v62, 4 }
 0x1c8   : > { %v508_v19 = vsel %vm4997_vm4, %v506_v13, %v507_v12 }
 0x1c9   : > { %v510_v2 = vsel %vm4777_vm12, %v503_v62, %v508_v19  ;;  %v2747_v31 = vld [vmem:[#allocation3] sm:$0xf]  ;;  %v2975_v52 = vld [vmem:[#allocation3 + $0x4] sm:$0xf]  ;;  %vm5009_vm12 = vnez %v4897_v59 }
 0x1ca   : > { %512 = vst [vmem:[#allocation3 + $0x8] sm:$0x33] %v510_v2 }
 0x1cd   : > { %v549_v7 = vpop.permute.xlu1 %548 }
 0x1ce   : > { %v551_v55 = vrot.slane %v549_v7, 4 }
 0x1d0   : > { %v552_v23 = vsel %vm4998_vm3, %v550_v28, %v551_v55 }
 0x1d1   : > { %v554_v63 = vsel %vm4999_vm1, %v547_v33, %v552_v23  ;;  %vm5002_vm1 = vnez %v4853_v40 }
 0x1d2   : > { %556 = vst [vmem:[#allocation3 + $0x8] sm:$0xcc] %v554_v63 }
 0x1d9   : > { %v2976_v15 = vld [vmem:[#allocation3 + $0x4] sm:$0xf0]  ;;  %v2749_v21 = vld [vmem:[#allocation3 + $0x8] sm:$0xf0] }
 0x1da   : > { %v2748_v41 = vor.u32 %v2976_v15, %v2747_v31  ;;  %v2752_v45 = vor.u32 %v2975_v52, %v2749_v21 }
 0x1dc   : > { %1325 = vmatpush.bf16.msra.mxu0 %v2748_v41  ;;  %1338 = vmatpush.bf16.msra.mxu1 %v2752_v45 }
 0x1df   : > { %2793 = vmatmul.msk.bf16.vlgmr.msra.gmra.mxu0 %vm1307_vm10, %v1222_v0  ;;  %2794 = vmatmul.msk.bf16.vlgmr.msra.gmra.mxu1 %vm1307_vm10, %v1222_v0  ;;  %vm5003_vm10 = vnez %v4860_v27 }
 0x25c   : > { %v1327_v42 = vpop.f32.mrf.mxu0  ;;  %v1340_v10 = vpop.f32.mrf.mxu1 }
 0x25d   : > { %v1328_v58 = vadd.f32 %v1327_v42, %v1240_v32  ;;  %v1341_v35 = vadd.f32 %v1340_v10, %v1240_v32 }
 0x25f   : > { %vm1345_vm4 = vcmp.ge.f32.partialorder %v1328_v58, 0.0  ;;  %v1348_v12 = vmul.f32 %v1347_v36, %v1328_v58  ;;  %vm1346_vm3 = vcmp.ge.f32.partialorder %v1341_v35, 0.0  ;;  %v1349_v62 = vmul.f32 %v1347_v36, %v1341_v35 }
 0x261   : > { %v4179_v13 = vsel %vm1345_vm4, %v1328_v58, %v1348_v12  ;;  %v4181_v19 = vsel %vm1346_vm3, %v1341_v35, %v1349_v62  ;;  %vm5005_vm4 = vnez %v4831_v29  ;;  %vm5006_vm3 = vnez %v4872_v56 }
 0x262   : > { %v1352_v2 = vpack.c.bf16 %v4181_v19, %v4179_v13 }
 0x264   : > { %1353 = vst [vmem:[#allocation2 + $0x4] sm:$0x11] %v1352_v2  ;;  %v1329_v33 = vpop.f32.mrf.mxu0  ;;  %v1342_v7 = vpop.f32.mrf.mxu1 }
 0x26b   : > { %v1721_v28 = vld [vmem:[#allocation2 + $0x4] sm:$0x11] }
 0x26c   : > { %v1391_v55 = vld [vmem:[#allocation2 + $0x8] sm:$0x1]  ;;  %v1390_v23 = vld [vmem:[#allocation2] sm:$0x11]  ;;  %1725 = vrot.lane.b32.xlu2 %v1721_v28, %s4956_s11 }
 0x26d   : > { %1396 = vrot.lane.b32.xlu1 %v1391_v55, %s4957_s14  ;;  %1394 = vrot.lane.b32.xlu0 %v1390_v23, %s4957_s14  ;;  %v1526_v63 = vld [vmem:[#allocation2] sm:$0x11]  ;;  %v1459_v31 = vld [vmem:[#allocation2 + $0x8] sm:$0x1] }
 0x26e   : > { %v1458_v15 = vld [vmem:[#allocation2] sm:$0x11]  ;;  %v1528_v52 = vsel %vm3628_vm15, %v1526_v63, 0  ;;  %v1461_v21 = vsel %vm3994_vm14, %v1459_v31, 0  ;;  %v1527_v42 = vld [vmem:[#allocation2 + $0x8] sm:$0x1]  ;;  %vm5011_vm15 = vnez %v4858_v50  ;;  %vm5027_vm14 = vnez %v4833_v43 }
 0x26f   : > { %v1460_v41 = vsel %vm3950_vm0, %v1458_v15, 0  ;;  %v1490_v45 = vld [vmem:[#allocation2] sm:$0x11]  ;;  %v1529_v58 = vsel %vm5005_vm4, %v1527_v42, 0  ;;  %v1509_v35 = vld [vmem:[#allocation2 + $0x8] sm:$0x1]  ;;  %vm5010_vm4 = vnez %v4936_v5  ;;  %vm5023_vm0 = vnez %v4891_v26 }
 0x270   : > { %v1492_v0 = vsel %vm5002_vm1, %v1490_v45, 0  ;;  %v1583_v32 = vld [vmem:[#allocation2 + $0x4] sm:$0x11]  ;;  %v1511_v62 = vsel %vm5006_vm3, %v1509_v35, 0  ;;  %vm5026_vm1 = vnez %v4924_v9 }
 0x271   : > { %v1496_v36 = vrot.slane %v1492_v0, 6  ;;  %v1585_v10 = vsel %vm5003_vm10, %v1583_v32, 0  ;;  %v1474_v12 = vld [vmem:[#allocation2] sm:$0x11]  ;;  %v1475_v2 = vld [vmem:[#allocation2 + $0x8] sm:$0x1]  ;;  %vm5029_vm10 = vnez %v4902_v11 }
 0x272   : > { %v1478_v33 = vrot.slane %v1474_v12, 7  ;;  %v1515_v7 = vrot.slane %v1511_v62, 5  ;;  %v1560_v28 = vld [vmem:[#allocation2 + $0x4] sm:$0x11]  ;;  %v1479_v55 = vrot.slane %v1475_v2, 7 }
 0x273   : > { %v1562_v23 = vrot.slane %v1560_v28, 6  ;;  %v1491_v63 = vld [vmem:[#allocation2 + $0x8] sm:$0x1]  ;;  %v1542_v31 = vld [vmem:[#allocation2] sm:$0x11] }
 0x274   : > { %1532 = vrot.lane.b32.xlu2 %v1528_v52, %s5001_s4  ;;  %v1508_v15 = vld [vmem:[#allocation2] sm:$0x11]  ;;  %v1493_v52 = vsel %vm5008_vm9, %v1491_v63, 0  ;;  %v1543_v42 = vld [vmem:[#allocation2 + $0x8] sm:$0x1]  ;;  %vm5025_vm9 = vnez %v4841_v6 }
 0x275   : > { %1466 = vrot.lane.b32.xlu1 %v1461_v21, %s4931_s19  ;;  %1464 = vrot.lane.b32.xlu0 %v1460_v41, %s4931_s19  ;;  %1564 = vst [vmem:[#allocation3 + $0x78] sm:$0x44] %v1562_v23  ;;  %v1544_v21 = vsel %vm5009_vm12, %v1542_v31, 0  ;;  %v1510_v41 = vsel %vm5010_vm4, %v1508_v15, 0  ;;  %v1497_v45 = vrot.slane %v1493_v52, 6  ;;  %vm5012_vm12 = vnez %v4889_v14 }
 0x276   : > { %v1548_v0 = vrot.slane %v1544_v21, 7  ;;  %v1514_v32 = vrot.slane %v1510_v41, 5  ;;  %v1354_v28 = vld [vmem:[#allocation2] sm:$0x11]  ;;  %v1618_v41 = vld [vmem:[#allocation2 + $0xc] sm:$0x1] }
 0x277   : > { %v1356_v63 = vsel %vm4042_vm13, %v1354_v28, 0  ;;  %vm5017_vm13 = vnez %v4951_v39  ;;  %vm5042_vm4 = vcmask 1031168  }
 0x278   : > { %v1360_v52 = vrot.slane %v1356_v63, 6 }
 0x27c   : > { %1589 = vrot.lane.b32.xlu2 %v1585_v10, %s4962_s20  ;;  %v1565_v10 = vld [vmem:[#allocation2 + $0x4] sm:$0x11] }
 0x27d   : > { %1498 = vrot.lane.b32.xlu1 %v1496_v36, %s5004_s28  ;;  %1534 = vrot.lane.b32.xlu0 %v1529_v58, %s5001_s4  ;;  %v1372_v36 = vld [vmem:[#allocation2] sm:$0x11]  ;;  %v1545_v58 = vsel %vm5011_vm15, %v1543_v42, 0  ;;  %v1567_v12 = vsel %vm5012_vm12, %v1565_v10, 0  ;;  %vm5013_vm15 = vnez %v4869_v24 }
 0x27e   : > { %v1374_v35 = vsel %vm4021_vm6, %v1372_v36, 0  ;;  %v1549_v62 = vrot.slane %v1545_v58, 7 }
 0x27f   : > { %v1378_v2 = vrot.slane %v1374_v35, 5 }
 0x284   : > { %1480 = vrot.lane.b32.xlu2 %v1478_v33, %s5007_s29  ;;  %v1571_v33 = vrot.slane %v1567_v12, 5  ;;  %v1441_v12 = vld [vmem:[#allocation2 + $0x8] sm:$0x1] }
 0x285   : > { %1518 = vrot.lane.b32.xlu1 %v1515_v7, %s4887_s24  ;;  %1482 = vrot.lane.b32.xlu0 %v1479_v55, %s5007_s29  ;;  %v1422_v7 = vld [vmem:[#allocation2] sm:$0x11]  ;;  %v1355_v55 = vld [vmem:[#allocation2 + $0x8] sm:$0x1] }
 0x286   : > { %v1424_v23 = vsel %vm5013_vm15, %v1422_v7, 0  ;;  %v1357_v31 = vsel %vm4087_vm5, %v1355_v55, 0  ;;  %vm5015_vm15 = vnez %v4819_v37  ;;  %vm5019_vm5 = vnez %v4835_v49 }
 0x287   : > { %v1428_v15 = vrot.slane %v1424_v23, 6  ;;  %v1361_v21 = vrot.slane %v1357_v31, 6  ;;  %v1423_v31 = vld [vmem:[#allocation2 + $0x8] sm:$0x1] }
 0x28c   : > { %1500 = vrot.lane.b32.xlu2 %v1497_v45, %s5004_s28  ;;  %v1373_v45 = vld [vmem:[#allocation2 + $0x8] sm:$0x1] }
 0x28d   : > { %1550 = vrot.lane.b32.xlu1 %v1548_v0, %s4870_s21  ;;  %1516 = vrot.lane.b32.xlu0 %v1514_v32, %s4887_s24  ;;  %v1405_v0 = vld [vmem:[#allocation2 + $0x8] sm:$0x1]  ;;  %v1620_v32 = vsel %vm5015_vm15, %v1618_v41, 0  ;;  %v1375_v42 = vsel %vm4058_vm2, %v1373_v45, 0  ;;  %vm5033_vm2 = vnez %v4825_v60  ;;  %v2235_v60 = vld [vmem:[#allocation2 + $0xc] sm:$0x1] }
 0x28e   : > { %v1407_v36 = vsel %vm4106_vm7, %v1405_v0, 0  ;;  %v1624_v10 = vrot.slane %v1620_v32, 6  ;;  %v1379_v58 = vrot.slane %v1375_v42, 5  ;;  %vm5018_vm7 = vnez %v4911_v38  ;;  %v1668_v32 = vld [vmem:[#allocation2 + $0xc] sm:$0x1] }
 0x28f   : > { %v1411_v35 = vrot.slane %v1407_v36, 7  ;;  %v1600_v42 = vld [vmem:[#allocation2 + $0xc] sm:$0x1]  ;;  %v1753_v36 = vld [vmem:[#allocation2 + $0x4] sm:$0x11] }
 0x294   : > { %1552 = vrot.lane.b32.xlu2 %v1549_v62, %s4870_s21  ;;  %v1404_v62 = vld [vmem:[#allocation2] sm:$0x11] }
 0x295   : > { %1380 = vrot.lane.b32.xlu1 %v1378_v2, %s4948_s10  ;;  %1573 = vrot.lane.b32.xlu0 %v1571_v33, %s4964_s15  ;;  %v1440_v2 = vld [vmem:[#allocation2] sm:$0x11]  ;;  %v1443_v33 = vsel %vm4036_vm8, %v1441_v12, 0  ;;  %v1406_v7 = vsel %vm5017_vm13, %v1404_v62, 0  ;;  %vm5020_vm13 = vnez %v4848_v17 }
 0x296   : > { %v1442_v28 = vsel %vm5018_vm7, %v1440_v2, 0  ;;  %v1447_v55 = vrot.slane %v1443_v33, 5  ;;  %v1410_v23 = vrot.slane %v1406_v7, 7  ;;  %v1735_v33 = vld [vmem:[#allocation2 + $0x4] sm:$0x11] }
 0x297   : > { %v1446_v63 = vrot.slane %v1442_v28, 5  ;;  %v1617_v7 = vld [vmem:[#allocation2 + $0x4] sm:$0x11]  ;;  %v4272_v28 = vpop.permute.xlu2 %1745 }
 0x29c   : > { %1362 = vrot.lane.b32.xlu2 %v1360_v52, %s4949_s26  ;;  %v1425_v52 = vsel %vm5019_vm5, %v1423_v31, 0  ;;  %vm5024_vm5 = vnez %v4909_v22 }
 0x29d   : > { %1430 = vrot.lane.b32.xlu1 %v1428_v15, %s5014_s1  ;;  %1364 = vrot.lane.b32.xlu0 %v1361_v21, %s4949_s26  ;;  %v1636_v15 = vld [vmem:[#allocation2 + $0xc] sm:$0x1]  ;;  %v1651_v21 = vld [vmem:[#allocation2 + $0x4] sm:$0x11]  ;;  %v1429_v45 = vrot.slane %v1425_v52, 6 }
 0x29e   : > { %v1640_v41 = vrot.slane %v1636_v15, 5  ;;  %v1653_v0 = vsel %vm5020_vm13, %v1651_v21, 0  ;;  %v1728_v21 = vpop.permute.xlu0 %1727  ;;  %vm5031_vm13 = vcmask 1043456  }
 0x2a4   : > { %1382 = vrot.lane.b32.xlu2 %v1379_v58, %s4948_s10  ;;  %v1602_v58 = vsel %vm5024_vm5, %v1600_v42, 0 }
 0x2a5   : > { %1627 = vrot.lane.b32.xlu1 %v1624_v10, %s5016_s17  ;;  %1414 = vrot.lane.b32.xlu0 %v1411_v35, %s4955_s13  ;;  %v1670_v10 = vsel %vm5023_vm0, %v1668_v32, 0  ;;  %v1755_v35 = vsel %vm5025_vm9, %v1753_v36, 0  ;;  %v1606_v62 = vrot.slane %v1602_v58, 7  ;;  %v1652_v58 = vld [vmem:[#allocation2 + $0xc] sm:$0x1]  ;;  %vm5041_vm9 = vcmask 1043456  }
 0x2a6   : > { %v1674_v12 = vrot.slane %v1670_v10, 7  ;;  %v1759_v2 = vrot.slane %v1755_v35, 6 }
 0x2ac   : > { %1412 = vrot.lane.b32.xlu2 %v1410_v23, %s4955_s13  ;;  %v1635_v23 = vld [vmem:[#allocation2 + $0x4] sm:$0x11] }
 0x2ad   : > { %1450 = vrot.lane.b32.xlu1 %v1447_v55, %s4930_s18  ;;  %1448 = vrot.lane.b32.xlu0 %v1446_v63, %s4930_s18  ;;  %v1737_v55 = vsel %vm5026_vm1, %v1735_v33, 0  ;;  %v1619_v63 = vsel %vm5027_vm14, %v1617_v7, 0  ;;  %v1639_v15 = vrot.slane %v1635_v23, 5  ;;  %vm5030_vm14 = vnez %v4886_v20  ;;  %v4289_v7 = vpop.permute.xlu1 %1575  ;;  %v1685_v23 = vld [vmem:[#allocation2 + $0x4] sm:$0x11] }
 0x2ae   : > { %v1741_v31 = vrot.slane %v1737_v55, 7  ;;  %v1623_v52 = vrot.slane %v1619_v63, 6  ;;  %vm5032_vm1 = vcmask 785408   ;;  %v1654_v33 = vsel %vm5033_vm2, %v1652_v58, 0  ;;  %v1703_v55 = vld [vmem:[#allocation2 + $0x4] sm:$0x11] }
 0x2af   : > { %v1686_v63 = vld [vmem:[#allocation2 + $0xc] sm:$0x1] }
 0x2b4   : > { %1432 = vrot.lane.b32.xlu2 %v1429_v45, %s5014_s1  ;;  %v1730_v45 = vrot.slane %v1728_v21, 4 }
 0x2b5   : > { %1657 = vrot.lane.b32.xlu1 %v1653_v0, %s5021_s30  ;;  %1643 = vrot.lane.b32.xlu0 %v1640_v41, %s5022_s12  ;;  %v1599_v41 = vld [vmem:[#allocation2 + $0x4] sm:$0x11] }
 0x2b6   : > { %v1667_v0 = vld [vmem:[#allocation2 + $0x4] sm:$0x11]  ;;  %v1601_v36 = vsel %vm5029_vm10, %v1599_v41, 0  ;;  %vm5040_vm10 = vnez %v4874_v51  ;;  %v2253_v51 = vld [vmem:[#allocation2 + $0xc] sm:$0x1] }
 0x2b7   : > { %v1669_v10 = vsel %vm5030_vm14, %v1667_v0, 0  ;;  %vm5036_vm14 = vnez %v4823_v53 }
 0x2b8   : > { %v1688_v21 = vsel %vm5036_vm14, %v1686_v63, 0  ;;  %v1791_v63 = vld [vmem:[%s4650_s5] sm:$0x3] }
 0x2b9   : > { %v1692_v0 = vrot.slane %v1688_v21, 6 }
 0x2bc   : > { %1609 = vrot.lane.b32.xlu2 %v1606_v62, %s4920_s16  ;;  %v1605_v62 = vrot.slane %v1601_v36, 7  ;;  %v1704_v36 = vld [vmem:[#allocation2 + $0xc] sm:$0x1] }
 0x2bd   : > { %1677 = vrot.lane.b32.xlu1 %v1674_v12, %s4898_s25  ;;  %1761 = vrot.lane.b32.xlu0 %v1759_v2, %s4969_s0  ;;  %v1673_v2 = vrot.slane %v1669_v10, 7  ;;  %v4305_v10 = vpop.permute.xlu1 %1763 }
 0x2c4   : > { %1641 = vrot.lane.b32.xlu2 %v1639_v15, %s5022_s12 }
 0x2c5   : > { %1743 = vrot.lane.b32.xlu1 %v1741_v31, %s5028_s27  ;;  %1625 = vrot.lane.b32.xlu0 %v1623_v52, %s5016_s17 }
 0x2c6   : > { %v1726_v32 = vpop.permute.xlu2 %1725 }
 0x2c7   : > { %v1729_v42 = vrot.slane %v1726_v32, 4 }
 0x2c9   : > { %v1731_v35 = vsel %vm5031_vm13, %v1729_v42, %v1730_v45  ;;  %vm5034_vm13 = vnez %v4867_v61  ;;  %v2353_v42 = vld [vmem:[#allocation2 + $0xc] sm:$0x1] }
 0x2ca   : > { %v1732_v12 = vsel %vm5032_vm1, %v1726_v32, %v1731_v35  ;;  %v1705_v15 = vsel %vm5034_vm13, %v1703_v55, 0  ;;  %vm5035_vm1 = vnez %v4837_v54  ;;  %v1592_v32 = vpop.permute.xlu0 %1591 }
 0x2cb   : > { %1734 = vst [vmem:[#allocation3 + $0x90] sm:$0x11] %v1732_v12  ;;  %v1687_v52 = vsel %vm5035_vm1, %v1685_v23, 0  ;;  %v1709_v41 = vrot.slane %v1705_v15, 5  ;;  %v1594_v35 = vrot.slane %v1592_v32, 4  ;;  %vm5039_vm1 = vnez %v4862_v1 }
 0x2cc   : > { %1659 = vrot.lane.b32.xlu2 %v1654_v33, %s5021_s30  ;;  %v1691_v45 = vrot.slane %v1687_v52, 6  ;;  %v2199_v1 = vld [vmem:[#allocation2 + $0xc] sm:$0x1] }
 0x2cd   : > { %1607 = vrot.lane.b32.xlu1 %v1605_v62, %s4920_s16  ;;  %1675 = vrot.lane.b32.xlu0 %v1673_v2, %s4898_s25  ;;  %v2355_v62 = vsel %vm5039_vm1, %v2353_v42, 0  ;;  %v1706_v2 = vsel %vm5040_vm10, %v1704_v36, 0  ;;  %v2371_v52 = vld [vmem:[#allocation2 + $0xc] sm:$0x1]  ;;  %v2201_v32 = vsel %vm3519_vm11, %v2199_v1, 0  ;;  %vm5045_vm1 = vcmask 261120  }
 0x2ce   : > { %v4294_v31 = vpop.permute.xlu2 %1532  ;;  %v2359_v23 = vrot.slane %v2355_v62, 6  ;;  %v1710_v15 = vrot.slane %v1706_v2, 5 }
 0x2d4   : > { %1693 = vrot.lane.b32.xlu2 %v1691_v45, %s5038_s8 }
 0x2d5   : > { %1711 = vrot.lane.b32.xlu1 %v1709_v41, %s5037_s22  ;;  %1695 = vrot.lane.b32.xlu0 %v1692_v0, %s5038_s8 }
 0x2d6   : > { %v1590_v58 = vpop.permute.xlu2 %1589 }
 0x2d7   : > { %v1593_v12 = vrot.slane %v1590_v58, 4 }
 0x2d9   : > { %v1595_v33 = vsel %vm5041_vm9, %v1593_v12, %v1594_v35  ;;  %vm5043_vm9 = vnez %v4821_v44  ;;  %v2205_v12 = vrot.slane %v2201_v32, 7  ;;  %v2337_v44 = vld [vmem:[#allocation2 + $0xc] sm:$0x1] }
 0x2da   : > { %v1596_v55 = vsel %vm5042_vm4, %v1590_v58, %v1595_v33  ;;  %v2373_v36 = vsel %vm5043_vm9, %v2371_v52, 0  ;;  %v2321_v58 = vld [vmem:[#allocation2 + $0xc] sm:$0x1]  ;;  %vm5044_vm4 = vcmask 1043456   ;;  %v2219_v52 = vsel %vm5024_vm5, %v2217_v4, 0 }
 0x2db   : > { %1598 = vst [vmem:[#allocation3 + $0x80] sm:$0x11] %v1596_v55  ;;  %v2377_v2 = vrot.slane %v2373_v36, 5  ;;  %v2323_v33 = vsel %vm5040_vm10, %v2321_v58, 0  ;;  %vm5046_vm11 = vmmov %vm5044_vm4  ;;  %vm5047_vm10 = vcmask 138240   ;;  %v2223_v32 = vrot.slane %v2219_v52, 6 }
 0x2dc   : > { %1713 = vrot.lane.b32.xlu2 %v1710_v15, %s5037_s22  ;;  %v2267_v36 = vld [vmem:[#allocation2 + $0xc] sm:$0x1]  ;;  %vm5048_vm5 = vmmov %vm5044_vm4 }
 0x2dd   : > { %2362 = vrot.lane.b32.xlu1 %v2359_v23, %s5028_s27  ;;  %1794 = vperm.xlu0 %3113, %v1791_v63   ;;  %vm5049_vm9 = vmmov %vm5044_vm4 }
 0x2de   : > { %v4318_v21 = vpop.permute.xlu2 %1480 }
 0x2df   : > { %v1397_v41 = vpop.permute.xlu1 %1396  ;;  %v1395_v45 = vpop.permute.xlu0 %1394 }
 0x2e0   : > { %v1399_v0 = vrot.slane %v1397_v41, 4  ;;  %v1398_v42 = vrot.slane %v1395_v45, 4  ;;  %v2341_v41 = vrot.slane %v2337_v44, 7  ;;  %v2269_v44 = vsel %vm5033_vm2, %v2267_v36, 0  ;;  %vm5053_vm2 = vmmov %vm5048_vm5 }
 0x2e1   : > { %v2273_v53 = vrot.slane %v2269_v44, 7 }
 0x2e2   : > { %v1400_v35 = vsel %vm5044_vm4, %v1398_v42, %v1399_v0  ;;  %v2303_v42 = vld [vmem:[#allocation2 + $0xc] sm:$0x1]  ;;  %vm5050_vm4 = vcmask 121856  }
 0x2e3   : > { %v1401_v62 = vsel %vm5045_vm1, %v1395_v45, %v1400_v35  ;;  %vm5051_vm1 = vcmask 15360  }
 0x2e4   : > { %1403 = vst [vmem:[#allocation3 + $0x68] sm:$0x11] %v1401_v62  ;;  %2328 = vrot.lane.b32.xlu2 %v2323_v33, %s5037_s22  ;;  %v1536_v33 = vrot.slane %v4294_v31, 4 }
 0x2e5   : > { %2208 = vrot.lane.b32.xlu1 %v2205_v12, %s4962_s20  ;;  %2380 = vrot.lane.b32.xlu0 %v2377_v2, %s4969_s0  ;;  %v2305_v2 = vsel %vm5036_vm14, %v2303_v42, 0  ;;  %vm5052_vm14 = vnez %v4850_v25 }
 0x2e6   : > { %v1501_v55 = vpop.permute.xlu2 %1500  ;;  %v2309_v52 = vrot.slane %v2305_v2, 5 }
 0x2e7   : > { %v1467_v23 = vpop.permute.xlu1 %1466  ;;  %v1465_v63 = vpop.permute.xlu0 %1464  ;;  %v1503_v22 = vrot.slane %v1501_v55, 4 }
 0x2e8   : > { %v1469_v15 = vrot.slane %v1467_v23, 4  ;;  %v1468_v1 = vrot.slane %v1465_v63, 4  ;;  %v2183_v23 = vld [vmem:[#allocation2 + $0xc] sm:$0x1] }
 0x2ea   : > { %v1470_v45 = vsel %vm5046_vm11, %v1468_v1, %v1469_v15  ;;  %vm5054_vm11 = vcmask 130048  }
 0x2eb   : > { %v1471_v0 = vsel %vm5047_vm10, %v1465_v63, %v1470_v45  ;;  %vm5056_vm10 = vmmov %vm5053_vm2 }
 0x2ec   : > { %1473 = vst [vmem:[#allocation3 + $0x70] sm:$0x11] %v1471_v0  ;;  %2344 = vrot.lane.b32.xlu2 %v2341_v41, %s4956_s11  ;;  %v2185_v41 = vsel %vm5052_vm14, %v2183_v23, 0  ;;  %vm5062_vm14 = vcmask 1039360  }
 0x2ed   : > { %2258 = vrot.lane.b32.xlu1 %v2253_v51, %s5022_s12  ;;  %2226 = vrot.lane.b32.xlu0 %v2223_v32, %s4920_s16  ;;  %v2237_v32 = vsel %vm5015_vm15, %v2235_v60, 0  ;;  %vm5055_vm15 = vmmov %vm5053_vm2  ;;  %v1578_v60 = vrot.slane %v4289_v7, 4 }
 0x2ee   : > { %v1553_v58 = vpop.permute.xlu2 %1552  ;;  %v2241_v36 = vrot.slane %v2237_v32, 5 }
 0x2ef   : > { %v1499_v35 = vpop.permute.xlu1 %1498  ;;  %v1535_v12 = vpop.permute.xlu0 %1534  ;;  %v1555_v2 = vrot.slane %v1553_v58, 4 }
 0x2f0   : > { %v1502_v62 = vrot.slane %v1499_v35, 4  ;;  %v1537_v4 = vrot.slane %v1535_v12, 4 }
 0x2f2   : > { %v1504_v63 = vsel %vm5048_vm5, %v1502_v62, %v1503_v22  ;;  %v1538_v15 = vsel %vm5049_vm9, %v1536_v33, %v1537_v4  ;;  %v2285_v22 = vld [vmem:[#allocation2 + $0xc] sm:$0x1]  ;;  %vm5057_vm5 = vcmask 7168   ;;  %vm5058_vm9 = vcmask 113664  }
 0x2f3   : > { %v1505_v1 = vsel %vm5050_vm4, %v1499_v35, %v1504_v63  ;;  %v1539_v55 = vsel %vm5051_vm1, %v4294_v31, %v1538_v15  ;;  %v1484_v31 = vrot.slane %v4318_v21, 4  ;;  %v2287_v37 = vsel %vm5023_vm0, %v2285_v22, 0  ;;  %vm5059_vm0 = vmmov %vm5053_vm2 }
 0x2f4   : > { %1507 = vst [vmem:[#allocation3 + $0x70] sm:$0x44] %v1505_v1  ;;  %2190 = vrot.lane.b32.xlu2 %v2185_v41, %s4964_s15  ;;  %v2291_v1 = vrot.slane %v2287_v37, 6  ;;  %vm5060_vm4 = vmmov %vm5059_vm0  ;;  %vm5061_vm1 = vcmask 269312  }
 0x2f5   : > { %1541 = vst [vmem:[#allocation3 + $0x78] sm:$0x11] %v1539_v55  ;;  %2312 = vrot.lane.b32.xlu1 %v2309_v52, %s5038_s8  ;;  %2276 = vrot.lane.b32.xlu0 %v2273_v53, %s5021_s30 }
 0x2f6   : > { %v1363_v51 = vpop.permute.xlu2 %1362 }
 0x2f7   : > { %v1519_v45 = vpop.permute.xlu1 %1518  ;;  %v1483_v0 = vpop.permute.xlu0 %1482 }
 0x2f8   : > { %v1485_v42 = vrot.slane %v1483_v0, 4  ;;  %v1521_v44 = vrot.slane %v1519_v45, 4 }
 0x2fa   : > { %v1486_v25 = vsel %vm5053_vm2, %v1484_v31, %v1485_v42  ;;  %vm5063_vm2 = vmmov %vm5059_vm0 }
 0x2fb   : > { %v1487_v35 = vsel %vm5054_vm11, %v4318_v21, %v1486_v25  ;;  %vm5064_vm11 = vmmov %vm5059_vm0 }
 0x2fc   : > { %1489 = vst [vmem:[#allocation3 + $0x70] sm:$0x22] %v1487_v35  ;;  %2244 = vrot.lane.b32.xlu2 %v2241_v36, %s5016_s17 }
 0x2fe   : > { %v1383_v12 = vpop.permute.xlu2 %1382 }
 0x2ff   : > { %v1551_v62 = vpop.permute.xlu1 %1550  ;;  %v1517_v33 = vpop.permute.xlu0 %1516  ;;  %v1385_v53 = vrot.slane %v1383_v12, 4 }
 0x300   : > { %v1554_v4 = vrot.slane %v1551_v62, 4  ;;  %v1520_v23 = vrot.slane %v1517_v33, 4 }
 0x302   : > { %v1556_v63 = vsel %vm5055_vm15, %v1554_v4, %v1555_v2  ;;  %v1522_v15 = vsel %vm5056_vm10, %v1520_v23, %v1521_v44  ;;  %vm5065_vm15 = vcmask 244736   ;;  %vm5066_vm10 = vcmask 277504  }
 0x303   : > { %v1557_v21 = vsel %vm5057_vm5, %v1551_v62, %v1556_v63  ;;  %v1523_v52 = vsel %vm5058_vm9, %v1517_v33, %v1522_v15  ;;  %v1366_v62 = vrot.slane %v1363_v51, 4  ;;  %vm5067_vm5 = vmmov %vm5059_vm0  ;;  %vm5068_vm9 = vcmask 252928  }
 0x304   : > { %1559 = vst [vmem:[#allocation3 + $0x78] sm:$0x22] %v1557_v21  ;;  %2294 = vrot.lane.b32.xlu2 %v2291_v1, %s4898_s25 }
 0x305   : > { %1525 = vst [vmem:[#allocation3 + $0x70] sm:$0x88] %v1523_v52 }
 0x306   : > { %v1413_v58 = vpop.permute.xlu2 %1412 }
 0x307   : > { %v1381_v55 = vpop.permute.xlu1 %1380  ;;  %v1574_v26 = vpop.permute.xlu0 %1573 }
 0x308   : > { %v1384_v41 = vrot.slane %v1381_v55, 4  ;;  %v1577_v45 = vrot.slane %v1574_v26, 4 }
 0x30a   : > { %v1386_v0 = vsel %vm5059_vm0, %v1384_v41, %v1385_v53  ;;  %v1579_v32 = vsel %vm5060_vm4, %v1577_v45, %v1578_v60  ;;  %v1416_v45 = vrot.slane %v1413_v58, 4  ;;  %vm5069_vm4 = vcmask 146432  }
 0x30b   : > { %v1387_v31 = vsel %vm5061_vm1, %v1381_v55, %v1386_v0  ;;  %v1580_v42 = vsel %vm5062_vm14, %v1574_v26, %v1579_v32  ;;  %vm5070_vm1 = vmmov %vm5059_vm0 }
 0x30c   : > { %1389 = vst [vmem:[#allocation3 + $0x60] sm:$0x88] %v1387_v31  ;;  %v2853_v37 = vld [vmem:[#allocation3 + $0x70] sm:$0xf]  ;;  %v3001_v44 = vld [vmem:[#allocation3 + $0x74] sm:$0xf]  ;;  %vm5071_vm14 = vmmov %vm5059_vm0 }
 0x30d   : > { %1582 = vst [vmem:[#allocation3 + $0x78] sm:$0x88] %v1580_v42  ;;  %v2928_v52 = vld [vmem:[#allocation3 + $0x70] sm:$0xf] }
 0x30e   : > { %v1433_v25 = vpop.permute.xlu2 %1432 }
 0x30f   : > { %v1431_v36 = vpop.permute.xlu1 %1430  ;;  %v1365_v35 = vpop.permute.xlu0 %1364  ;;  %v1435_v22 = vrot.slane %v1433_v25, 4 }
 0x310   : > { %v1434_v12 = vrot.slane %v1431_v36, 4  ;;  %v1367_v2 = vrot.slane %v1365_v35, 4 }
 0x312   : > { %v1436_v7 = vsel %vm5063_vm2, %v1434_v12, %v1435_v22  ;;  %v1368_v33 = vsel %vm5064_vm11, %v1366_v62, %v1367_v2  ;;  %vm5072_vm2 = vcmask 908288   ;;  %vm5073_vm11 = vcmask 916480  }
 0x313   : > { %v1437_v4 = vsel %vm5065_vm15, %v1431_v36, %v1436_v7  ;;  %v1369_v23 = vsel %vm5066_vm10, %v1363_v51, %v1368_v33  ;;  %vm5074_vm15 = vmmov %vm5059_vm0  ;;  %vm5075_vm10 = vcmask 769024  }
 0x314   : > { %1439 = vst [vmem:[#allocation3 + $0x68] sm:$0x44] %v1437_v4  ;;  %v3002_v63 = vld [vmem:[#allocation3 + $0x74] sm:$0xf0]  ;;  %v2855_v15 = vld [vmem:[#allocation3 + $0x78] sm:$0xf0] }
 0x315   : > { %1371 = vst [vmem:[#allocation3 + $0x60] sm:$0x44] %v1369_v23  ;;  %v2854_v21 = vor.u32 %v3002_v63, %v2853_v37  ;;  %v2858_v1 = vor.u32 %v3001_v44, %v2855_v15  ;;  %v3020_v55 = vld [vmem:[#allocation3 + $0x74] sm:$0xf0] }
 0x316   : > { %v2929_v53 = vor.u32 %v3020_v55, %v2928_v52  ;;  %v4376_v26 = vpop.permute.xlu2 %1609 }
 0x317   : > { %1907 = vmatpush.bf16.msra.mxu2 %v2854_v21  ;;  %1933 = vmatpush.bf16.msra.mxu3 %v2858_v1  ;;  %v4378_v41 = vpop.permute.xlu1 %1627  ;;  %v1415_v60 = vpop.permute.xlu0 %1414 }
 0x318   : > { %2560 = vmatpush.bf16.msrb.mxu1 %v2929_v53  ;;  %v1417_v0 = vrot.slane %v1415_v60, 4 }
 0x31a   : > { %v1418_v51 = vsel %vm5067_vm5, %v1416_v45, %v1417_v0  ;;  %vm5076_vm5 = vmmov %vm5059_vm0 }
 0x31b   : > { %v1419_v32 = vsel %vm5068_vm9, %v1413_v58, %v1418_v51  ;;  %v1771_v51 = vld [vmem:[%s4647_s2] sm:$0x3]  ;;  %vm5077_vm9 = vmmov %vm5059_vm0 }
 0x31c   : > { %1421 = vst [vmem:[#allocation3 + $0x68] sm:$0x22] %v1419_v32  ;;  %v2845_v15 = vld [vmem:[#allocation3 + $0x60] sm:$0xf]  ;;  %v2999_v21 = vld [vmem:[#allocation3 + $0x64] sm:$0xf] }
 0x31d   : > { %v2920_v1 = vld [vmem:[#allocation3 + $0x60] sm:$0xf]  ;;  %1798 = vst [vmem:[#allocation1] ss:$9 sm:$0xff] %v1771_v51  ;;  %v2821_v51 = vld [vmem:[#allocation3 + $0x30] sm:$0xf] }
 0x31e   : > { %v1642_v31 = vpop.permute.xlu2 %1641 }
 0x31f   : > { %v1451_v42 = vpop.permute.xlu1 %1450  ;;  %v1449_v25 = vpop.permute.xlu0 %1448  ;;  %v1645_v37 = vrot.slane %v1642_v31, 4 }
 0x320   : > { %v1453_v36 = vrot.slane %v1451_v42, 4  ;;  %v1452_v35 = vrot.slane %v1449_v25, 4  ;;  %v2998_v42 = vld [vmem:[#allocation3 + $0x54] sm:$0xf0] }
 0x322   : > { %v1454_v22 = vsel %vm5059_vm0, %v1452_v35, %v1453_v36  ;;  %vm5078_vm0 = vcmask 777216  }
 0x323   : > { %v1455_v12 = vsel %vm5069_vm4, %v1449_v25, %v1454_v22  ;;  %v2839_v25 = vld [vmem:[#allocation3 + $0x58] sm:$0xf0]  ;;  %v2837_v22 = vld [vmem:[#allocation3 + $0x50] sm:$0xf]  ;;  %vm5079_vm4 = vcmask 924672  }
 0x324   : > { %1457 = vst [vmem:[#allocation3 + $0x68] sm:$0x88] %v1455_v12  ;;  %v2997_v12 = vld [vmem:[#allocation3 + $0x54] sm:$0xf] }
 0x326   : > { %v1660_v62 = vpop.permute.xlu2 %1659 }
 0x327   : > { %v1658_v2 = vpop.permute.xlu1 %1657  ;;  %v1644_v7 = vpop.permute.xlu0 %1643  ;;  %v1662_v33 = vrot.slane %v1660_v62, 4  ;;  %v1766_v62 = vrot.slane %v4305_v10, 4 }
 0x328   : > { %v1661_v4 = vrot.slane %v1658_v2, 4  ;;  %v1646_v44 = vrot.slane %v1644_v7, 4  ;;  %v2838_v7 = vor.u32 %v2998_v42, %v2837_v22  ;;  %v1748_v42 = vrot.slane %v4272_v28, 4  ;;  %v2896_v22 = vld [vmem:[#allocation3 + $0x30] sm:$0xf] }
 0x329   : > { %v2388_v28 = vld [vmem:[%s4648_s3] sm:$0xf] }
 0x32a   : > { %v1663_v58 = vsel %vm5070_vm1, %v1661_v4, %v1662_v33  ;;  %v1647_v23 = vsel %vm5071_vm14, %v1645_v37, %v1646_v44  ;;  %v2842_v33 = vor.u32 %v2997_v12, %v2839_v25  ;;  %v2912_v4 = vld [vmem:[#allocation3 + $0x50] sm:$0xf]  ;;  %v2996_v44 = vld [vmem:[#allocation3 + $0x44] sm:$0xf0]  ;;  %v1630_v12 = vrot.slane %v4378_v41, 4  ;;  %vm5080_vm14 = vmmov %vm5070_vm1 }
 0x32b   : > { %v1664_v63 = vsel %vm5072_vm2, %v1658_v2, %v1663_v58  ;;  %v1648_v52 = vsel %vm5073_vm11, %v1642_v31, %v1647_v23  ;;  %v3000_v55 = vld [vmem:[#allocation3 + $0x64] sm:$0xf0]  ;;  %v2847_v53 = vld [vmem:[#allocation3 + $0x68] sm:$0xf0]  ;;  %v3016_v31 = vld [vmem:[#allocation3 + $0x54] sm:$0xf0] }
 0x32c   : > { %1666 = vst [vmem:[#allocation3 + $0x88] sm:$0x11] %v1664_v63  ;;  %v2846_v60 = vor.u32 %v3000_v55, %v2845_v15  ;;  %v2850_v45 = vor.u32 %v2999_v21, %v2847_v53  ;;  %v3018_v0 = vld [vmem:[#allocation3 + $0x64] sm:$0xf0]  ;;  %v2913_v37 = vor.u32 %v3016_v31, %v2912_v4  ;;  %v2831_v58 = vld [vmem:[#allocation3 + $0x48] sm:$0xf0] }
 0x32d   : > { %1650 = vst [vmem:[#allocation3 + $0x80] sm:$0x88] %v1648_v52  ;;  %v2921_v32 = vor.u32 %v3018_v0, %v2920_v1  ;;  %v3014_v63 = vld [vmem:[#allocation3 + $0x44] sm:$0xf0]  ;;  %v2829_v21 = vld [vmem:[#allocation3 + $0x40] sm:$0xf] }
 0x32e   : > { %1908 = vmatpush.bf16.msra.mxu2 %v2846_v60  ;;  %1934 = vmatpush.bf16.msra.mxu3 %v2850_v45  ;;  %v2995_v1 = vld [vmem:[#allocation3 + $0x44] sm:$0xf]  ;;  %v2830_v52 = vor.u32 %v2996_v44, %v2829_v21  ;;  %v2904_v55 = vld [vmem:[#allocation3 + $0x40] sm:$0xf]  ;;  %v2994_v60 = vld [vmem:[#allocation3 + $0x34] sm:$0xf0] }
 0x32f   : > { %v4391_v36 = vpop.permute.xlu1 %1677  ;;  %2561 = vmatpush.bf16.msrb.mxu1 %v2921_v32  ;;  %v1762_v35 = vpop.permute.xlu0 %1761  ;;  %v2834_v10 = vor.u32 %v2995_v1, %v2831_v58  ;;  %v2905_v53 = vor.u32 %v3014_v63, %v2904_v55  ;;  %v2823_v45 = vld [vmem:[#allocation3 + $0x38] sm:$0xf0]  ;;  %v3012_v32 = vld [vmem:[#allocation3 + $0x34] sm:$0xf0]  ;;  %v2991_v4 = vld [vmem:[#allocation3 + $0x24] sm:$0xf] }
 0x330   : > { %v1765_v2 = vrot.slane %v1762_v35, 4  ;;  %v2897_v44 = vor.u32 %v3012_v32, %v2896_v22  ;;  %v4399_v58 = vld [vmem:[#allocation1] sm:$0xff]  ;;  %v4406_v63 = vpop.permute.xlu2 %1693  ;;  %v2888_v21 = vld [vmem:[#allocation3 + $0x20] sm:$0xf]  ;;  %v2807_v32 = vld [vmem:[#allocation3 + $0x18] sm:$0xf0] }
 0x331   : > { %v2805_v22 = vld [vmem:[#allocation3 + $0x10] sm:$0xf]  ;;  %vm5081_vm2 = vcmask 932864   ;;  %vm5082_vm11 = vcmask 900096  }
 0x332   : > { %v1767_v23 = vsel %vm5074_vm15, %v1765_v2, %v1766_v62  ;;  %1909 = vmatpush.bf16.msra.mxu2 %v2838_v7  ;;  %1935 = vmatpush.bf16.msra.mxu3 %v2842_v33  ;;  %v2822_v2 = vor.u32 %v2994_v60, %v2821_v51  ;;  %v2813_v33 = vld [vmem:[#allocation3 + $0x20] sm:$0xf]  ;;  %v3010_v60 = vld [vmem:[#allocation3 + $0x24] sm:$0xf0]  ;;  %v2990_v51 = vld [vmem:[#allocation3 + $0x14] sm:$0xf0] }
 0x333   : > { %v1768_v15 = vsel %vm5075_vm10, %v1762_v35, %v1767_v23  ;;  %2562 = vmatpush.bf16.msrb.mxu1 %v2913_v37  ;;  %v2993_v35 = vld [vmem:[#allocation3 + $0x34] sm:$0xf]  ;;  %vm1900_vm15 = vcmask 1042432   ;;  %vm5083_vm10 = vmmov %vm5070_vm1 }
 0x334   : > { %1770 = vst [vmem:[#allocation3 + $0x90] sm:$0x44] %v1768_v15  ;;  %v2826_v7 = vor.u32 %v2993_v35, %v2823_v45  ;;  %v4401_v23 = vld [vmem:[#allocation1 + $0x9] sm:$0xff]  ;;  %v2889_v45 = vor.u32 %v3010_v60, %v2888_v21 }
 0x335   : > { %2421 = vst [vmem:[#allocation1] ss:$4 sm:$0xff] %v2388_v28  ;;  %v2797_v28 = vld [vmem:[#allocation3] sm:$0xf] }
 0x336   : > { %1910 = vmatpush.bf16.msra.mxu2 %v2830_v52  ;;  %1936 = vmatpush.bf16.msra.mxu3 %v2834_v10  ;;  %v2992_v52 = vld [vmem:[#allocation3 + $0x24] sm:$0xf0]  ;;  %v2815_v10 = vld [vmem:[#allocation3 + $0x28] sm:$0xf0] }
 0x337   : > { %v1744_v0 = vpop.permute.xlu1 %1743  ;;  %2563 = vmatpush.bf16.msrb.mxu1 %v2905_v53  ;;  %v1626_v25 = vpop.permute.xlu0 %1625  ;;  %v2814_v55 = vor.u32 %v2992_v52, %v2813_v33  ;;  %v2818_v53 = vor.u32 %v2991_v4, %v2815_v10  ;;  %v2880_v4 = vld [vmem:[#allocation3 + $0x10] sm:$0xf]  ;;  %v2930_v52 = vld [vmem:[#allocation3 + $0x78] sm:$0xf0] }
 0x338   : > { %v1747_v31 = vrot.slane %v1744_v0, 4  ;;  %v1629_v62 = vrot.slane %v1626_v25, 4 }
 0x33a   : > { %v1749_v37 = vsel %vm5076_vm5, %v1747_v31, %v1748_v42  ;;  %v1631_v41 = vsel %vm5077_vm9, %v1629_v62, %v1630_v12  ;;  %1911 = vmatpush.bf16.msra.mxu2 %v2822_v2  ;;  %1937 = vmatpush.bf16.msra.mxu3 %v2826_v7  ;;  %v3008_v42 = vld [vmem:[#allocation3 + $0x14] sm:$0xf0]  ;;  %v1612_v31 = vrot.slane %v4376_v26, 4  ;;  %v2989_v12 = vld [vmem:[#allocation3 + $0x14] sm:$0xf]  ;;  %v1680_v62 = vrot.slane %v4391_v36, 4  ;;  %vm5084_vm5 = vmmov %vm5070_vm1 }
 0x33b   : > { %v1750_v15 = vsel %vm5078_vm0, %v1744_v0, %v1749_v37  ;;  %v1632_v1 = vsel %vm5079_vm4, %v1626_v25, %v1631_v41  ;;  %2564 = vmatpush.bf16.msrb.mxu1 %v2897_v44  ;;  %v2806_v7 = vor.u32 %v2990_v51, %v2805_v22  ;;  %v2810_v33 = vor.u32 %v2989_v12, %v2807_v32  ;;  %v2988_v41 = vld [vmem:[#allocation3 + $0x4] sm:$0xf0]  ;;  %v1714_v51 = vpop.permute.xlu2 %1713 }
 0x33c   : > { %1752 = vst [vmem:[#allocation3 + $0x90] sm:$0x22] %v1750_v15  ;;  %v2881_v44 = vor.u32 %v3008_v42, %v2880_v4  ;;  %v2799_v15 = vld [vmem:[#allocation3 + $0x8] sm:$0xf0]  ;;  %v2798_v32 = vor.u32 %v2988_v41, %v2797_v28  ;;  %v3017_v41 = vld [vmem:[#allocation3 + $0x64] sm:$0xf] }
 0x33d   : > { %1634 = vst [vmem:[#allocation3 + $0x80] sm:$0x44] %v1632_v1  ;;  %v3006_v1 = vld [vmem:[#allocation3 + $0x4] sm:$0xf0]  ;;  %vm5085_vm9 = vcmask 793600   ;;  %vm5086_vm0 = vcmask 801792  }
 0x33e   : > { %1912 = vmatpush.bf16.msra.mxu2 %v2814_v55  ;;  %1938 = vmatpush.bf16.msra.mxu3 %v2818_v53  ;;  %v2987_v55 = vld [vmem:[#allocation3 + $0x4] sm:$0xf]  ;;  %v2872_v53 = vld [vmem:[#allocation3] sm:$0xf]  ;;  %vm1897_vm4 = vcmask 179200  }
 0x33f   : > { %v1608_v0 = vpop.permute.xlu1 %1607  ;;  %2565 = vmatpush.bf16.msrb.mxu1 %v2889_v45  ;;  %v1676_v35 = vpop.permute.xlu0 %1675  ;;  %v2802_v42 = vor.u32 %v2987_v55, %v2799_v15  ;;  %v2422_v38 = vld.sshfl [vmem:[#allocation1] sm:$0xff pattern:$0x73625140] }
 0x340   : > { %v1611_v25 = vrot.slane %v1608_v0, 4  ;;  %v1679_v2 = vrot.slane %v1676_v35, 4 }
 0x342   : > { %v1613_v37 = vsel %vm5070_vm1, %v1611_v25, %v1612_v31  ;;  %v1681_v21 = vsel %vm5080_vm14, %v1679_v2, %v1680_v62  ;;  %1913 = vmatpush.bf16.msra.mxu2 %v2806_v7  ;;  %1939 = vmatpush.bf16.msra.mxu3 %v2810_v33  ;;  %v3019_v31 = vld [vmem:[#allocation3 + $0x74] sm:$0xf]  ;;  %v1716_v2 = vrot.slane %v1714_v51, 4 }
 0x343   : > { %v1614_v26 = vsel %vm5081_vm2, %v1608_v0, %v1613_v37  ;;  %v1790_v10 = vld [vmem:[#allocation3 + $0x90] sm:$0x77]  ;;  %v1682_v36 = vsel %vm5082_vm11, %v1676_v35, %v1681_v21  ;;  %2566 = vmatpush.bf16.msrb.mxu1 %v2881_v44  ;;  %v2873_v0 = vor.u32 %v3006_v1, %v2872_v53  ;;  %v2933_v25 = vor.u32 %v3019_v31, %v2930_v52  ;;  %v2922_v35 = vld [vmem:[#allocation3 + $0x68] sm:$0xf0]  ;;  %v2914_v52 = vld [vmem:[#allocation3 + $0x58] sm:$0xf0] }
 0x344   : > { %1616 = vst [vmem:[#allocation3 + $0x80] sm:$0x22] %v1614_v26  ;;  %v1857_v60 = vunpack.c.l.b16 %v1790_v10  ;;  %v1858_v45 = vunpack.c.h.b16 %v1790_v10  ;;  %v1697_v44 = vrot.slane %v4406_v63, 4  ;;  %v2925_v21 = vor.u32 %v3017_v41, %v2922_v35  ;;  %v2906_v53 = vld [vmem:[#allocation3 + $0x48] sm:$0xf0] }
 0x345   : > { %1684 = vst [vmem:[#allocation3 + $0x88] sm:$0x22] %v1682_v36  ;;  %v3015_v36 = vld [vmem:[#allocation3 + $0x54] sm:$0xf]  ;;  %vm5093_vm2 = vnez %v4860_v27  ;;  %vm5094_vm11 = vnez %v4934_v57 }
 0x346   : > { %v1877_v22 = vpack.c.b16 %v1857_v60, %v1857_v60  ;;  %v1878_v12 = vpack.c.b16 %v1858_v45, %v1858_v45  ;;  %1914 = vmatpush.bf16.msra.mxu2 %v2798_v32  ;;  %1940 = vmatpush.bf16.msra.mxu3 %v2802_v42  ;;  %v2917_v55 = vor.u32 %v3015_v36, %v2914_v52  ;;  %v3013_v60 = vld [vmem:[#allocation3 + $0x44] sm:$0xf]  ;;  %v2898_v32 = vld [vmem:[#allocation3 + $0x38] sm:$0xf0] }
 0x347   : > { %v1712_v62 = vpop.permute.xlu1 %1711  ;;  %2567 = vmatpush.bf16.msrb.mxu1 %v2873_v0  ;;  %v1696_v7 = vpop.permute.xlu0 %1695  ;;  %v2909_v45 = vor.u32 %v3013_v60, %v2906_v53 }
 0x348   : > { %v1715_v33 = vrot.slane %v1712_v62, 4  ;;  %v1902_v4 = vsel %vm1900_vm15, %v1877_v22, 0  ;;  %v1905_v37 = vsel %vm1900_vm15, %v1878_v12, 0  ;;  %v1698_v28 = vrot.slane %v1696_v7, 4  ;;  %v3011_v22 = vld [vmem:[#allocation3 + $0x34] sm:$0xf] }
 0x349   : > { %1952 = vmatpush.bf16.msrb.mxu0 %v1905_v37  ;;  %1915 = vmatmul.bf16.vlgmr.msra.gmra.mxu2 %v4399_v58  ;;  %v2901_v12 = vor.u32 %v3011_v22, %v2898_v32  ;;  %v3007_v7 = vld [vmem:[#allocation3 + $0x14] sm:$0xf]  ;;  %v3005_v37 = vld [vmem:[#allocation3 + $0x4] sm:$0xf]  ;;  %vm5095_vm15 = vnez %v4833_v43 }
 0x34a   : > { %2586 = vmatpush.bf16.msrb.mxu3 %v2933_v25  ;;  %1926 = vmatpush.bf16.msrb.mxu2 %v1902_v4  ;;  %v1717_v15 = vsel %vm5083_vm10, %v1715_v33, %v1716_v2  ;;  %v1699_v26 = vsel %vm5084_vm5, %v1697_v44, %v1698_v28  ;;  %v2882_v2 = vld [vmem:[#allocation3 + $0x18] sm:$0xf0]  ;;  %v2874_v4 = vld [vmem:[#allocation3 + $0x8] sm:$0xf0]  ;;  %vm5096_vm10 = vnez %v4837_v54  ;;  %vm5097_vm5 = vnez %v4853_v40 }
 0x34b   : > { %1941 = vmatmul.bf16.vlgmr.msra.gmra.mxu3 %v4399_v58  ;;  %v1718_v1 = vsel %vm5085_vm9, %v1712_v62, %v1717_v15  ;;  %v1700_v10 = vsel %vm5086_vm0, %v4406_v63, %v1699_v26  ;;  %v2861_v51 = vld [vmem:[#allocation3 + $0x80] sm:$0xf]  ;;  %v3003_v42 = vld [vmem:[#allocation3 + $0x84] sm:$0xf]  ;;  %v2890_v62 = vld [vmem:[#allocation3 + $0x28] sm:$0xf0]  ;;  %v2885_v33 = vor.u32 %v3007_v7, %v2882_v2  ;;  %v2877_v44 = vor.u32 %v3005_v37, %v2874_v4 }
 0x34c   : > { %1720 = vst [vmem:[#allocation3 + $0x88] sm:$0x88] %v1718_v1  ;;  %v3009_v63 = vld [vmem:[#allocation3 + $0x24] sm:$0xf]  ;;  %2568 = vmatmul.bf16.vlgmr.msrb.gmra.mxu1 %v2422_v38  ;;  %vm5098_vm9 = vnez %v4886_v20  ;;  %vm5099_vm0 = vnez %v4829_v18 }
 0x34d   : > { %1702 = vst [vmem:[#allocation3 + $0x88] sm:$0x44] %v1700_v10  ;;  %v2893_v35 = vor.u32 %v3009_v63, %v2890_v62 }
 0x34e   : > { %2587 = vmatpush.bf16.msrb.mxu3 %v2925_v21 }
 0x34f   : > { %v1795_v15 = vpop.permute.xlu0 %1794 }
 0x352   : > { %2588 = vmatpush.bf16.msrb.mxu3 %v2917_v55  ;;  %v1964_v55 = vstv %s2869_s9 }
 0x354   : > { %v3004_v58 = vld [vmem:[#allocation3 + $0x84] sm:$0xf0]  ;;  %v2863_v31 = vld [vmem:[#allocation3 + $0x88] sm:$0xf0] }
 0x355   : > { %v2862_v0 = vor.u32 %v3004_v58, %v2861_v51  ;;  %v2866_v25 = vor.u32 %v3003_v42, %v2863_v31 }
 0x356   : > { %2589 = vmatpush.bf16.msrb.mxu3 %v2909_v45 }
 0x357   : > { %1927 = vmatpush.bf16.msrb.mxu2 %v2862_v0  ;;  %1953 = vmatpush.bf16.msrb.mxu0 %v2866_v25 }
 0x35a   : > { %2590 = vmatpush.bf16.msrb.mxu3 %v2901_v12  ;;  %2867 = vmatmul.msk.bf16.vlgmr.msrb.gmra.mxu2 %vm1897_vm4, %v4401_v23 }
 0x35b   : > { %2868 = vmatmul.msk.bf16.vlgmr.msrb.gmra.mxu0 %vm1897_vm4, %v4401_v23  ;;  %vm5100_vm4 = vnez %v4922_v16 }
 0x35e   : > { %2591 = vmatpush.bf16.msrb.mxu3 %v2893_v35 }
 0x362   : > { %2592 = vmatpush.bf16.msrb.mxu3 %v2885_v33 }
 0x366   : > { %2593 = vmatpush.bf16.msrb.mxu3 %v2877_v44 }
 0x369   : > { %2594 = vmatmul.bf16.vlgmr.msrb.gmra.mxu3 %v2422_v38 }
 0x3cc   : > { %v1916_v28 = vpop.f32.mrf.mxu2 }
 0x3cd   : > { %v1917_v23 = vadd.f32 %v1916_v28, %v1795_v15 }
 0x3ce   : > { %v1942_v41 = vpop.f32.mrf.mxu3 }
 0x3cf   : > { %v1943_v21 = vadd.f32 %v1942_v41, %v1795_v15 }
 0x3d4   : > { %v1918_v26 = vpop.f32.mrf.mxu2 }
 0x3d6   : > { %v1944_v1 = vpop.f32.mrf.mxu3 }
 0x3d8   : > { %v1955_v52 = vpop.f32.mrf.mxu0 }
 0x3d9   : > { %v1956_v10 = vadd.f32 %v1955_v52, %v1943_v21 }
 0x3db   : > { %v1960_v36 = vadd.f32 %v1956_v10, %v4181_v19 }
 0x3dd   : > { %v1929_v53 = vpop.f32.mrf.mxu2  ;;  %v1966_v51 = vmul.f32 %v1964_v55, %v1960_v36  ;;  %vm1963_vm1 = vcmp.ge.f32.partialorder %v1960_v36, 0.0 }
 0x3de   : > { %v1930_v60 = vadd.f32 %v1929_v53, %v1917_v23 }
 0x3df   : > { %v1968_v42 = vsel %vm1963_vm1, %v1960_v36, %v1966_v51  ;;  %vm5101_vm1 = vnez %v4897_v59 }
 0x3e0   : > { %v1957_v45 = vpop.f32.mrf.mxu0  ;;  %v1959_v32 = vadd.f32 %v1930_v60, %v4179_v13 }
 0x3e2   : > { %vm1962_vm14 = vcmp.ge.f32.partialorder %v1959_v32, 0.0  ;;  %v1965_v58 = vmul.f32 %v1964_v55, %v1959_v32 }
 0x3e4   : > { %v1967_v31 = vsel %vm1962_vm14, %v1959_v32, %v1965_v58  ;;  %vm5102_vm14 = vnez %v4843_v8 }
 0x3e5   : > { %v1969_v0 = vpack.c.bf16 %v1968_v42, %v1967_v31  ;;  %v1931_v25 = vpop.f32.mrf.mxu2 }
 0x3e7   : > { %1970 = vst [vmem:[#allocation2 + $0x4] sm:$0x11] %v1969_v0 }
 0x3ee   : > { %v2252_v22 = vld [vmem:[#allocation2 + $0x4] sm:$0x11] }
 0x3ef   : > { %2256 = vrot.lane.b32.xlu0 %v2252_v22, %s5022_s12  ;;  %v2320_v12 = vld [vmem:[#allocation2 + $0x4] sm:$0x11] }
 0x3f0   : > { %v2057_v19 = vld [vmem:[#allocation2] sm:$0x11]  ;;  %v2058_v63 = vld [vmem:[#allocation2 + $0x8] sm:$0x1]  ;;  %v2322_v62 = vsel %vm5034_vm13, %v2320_v12, 0  ;;  %vm5092_vm13 = vnez %v4848_v17 }
 0x3f1   : > { %v2059_v13 = vsel %vm5018_vm7, %v2057_v19, 0  ;;  %2326 = vrot.lane.b32.xlu1 %v2322_v62, %s5037_s22  ;;  %v2060_v35 = vsel %vm4036_vm8, %v2058_v63, 0  ;;  %v2182_v2 = vld [vmem:[#allocation2 + $0x4] sm:$0x11]  ;;  %vm5087_vm8 = vnez %v4936_v5  ;;  %vm5089_vm7 = vnez %v4947_v3  ;;  %v4473_v19 = vpop.permute.xlu2 %2328 }
 0x3f2   : > { %2063 = vrot.lane.b32.xlu2 %v2059_v13, %s4930_s18  ;;  %v2126_v7 = vld [vmem:[#allocation2 + $0x8] sm:$0x1]  ;;  %v1989_v33 = vld [vmem:[#allocation2] sm:$0x11]  ;;  %v2184_v4 = vsel %vm5012_vm12, %v2182_v2, 0  ;;  %vm5090_vm12 = vnez %v4902_v11 }
 0x3f3   : > { %v2128_v61 = vsel %vm5006_vm3, %v2126_v7, 0  ;;  %v1991_v47 = vsel %vm4021_vm6, %v1989_v33, 0  ;;  %v2177_v37 = vld [vmem:[#allocation2 + $0x4] sm:$0x11]  ;;  %vm5088_vm6 = vnez %v4841_v6  ;;  %vm5091_vm3 = vnez %v4924_v9 }
 0x3f4   : > { %v2005_v44 = vld [vmem:[#allocation2] sm:$0x11]  ;;  %v2179_v28 = vrot.slane %v2177_v37, 5  ;;  %v1990_v1 = vld [vmem:[#allocation2 + $0x8] sm:$0x1] }
 0x3f5   : > { %v2125_v14 = vld [vmem:[#allocation2] sm:$0x11]  ;;  %v2009_v56 = vrot.slane %v2005_v44, 7  ;;  %v2006_v52 = vld [vmem:[#allocation2 + $0x8] sm:$0x1]  ;;  %v1992_v23 = vsel %vm5089_vm7, %v1990_v1, 0  ;;  %vm5105_vm7 = vnez %v4858_v50 }
 0x3f6   : > { %v2091_v41 = vld [vmem:[#allocation2] sm:$0x11]  ;;  %2181 = vst [vmem:[#allocation3 + $0xa8] sm:$0x88] %v2179_v28  ;;  %v2127_v15 = vsel %vm5087_vm8, %v2125_v14, 0  ;;  %v2010_v5 = vrot.slane %v2006_v52, 7  ;;  %vm5103_vm8 = vnez %v4954_v48  ;;  %v4522_v48 = vpop.permute.xlu1 %2362 }
 0x3f7   : > { %2065 = vrot.lane.b32.xlu0 %v2060_v35, %s4930_s18  ;;  %v2095_v30 = vrot.slane %v2091_v41, 6  ;;  %v2370_v21 = vld [vmem:[#allocation2 + $0x4] sm:$0x11]  ;;  %s5162_s18 = sld [smem:[#allocation27_spill]] }
 0x3f8   : > { %v2372_v26 = vsel %vm5088_vm6, %v2370_v21, 0  ;;  %v2216_v36 = vld [vmem:[#allocation2 + $0x4] sm:$0x11]  ;;  %vm5104_vm6 = vnez %v4831_v29 }
 0x3f9   : > { %2188 = vrot.lane.b32.xlu1 %v2184_v4, %s4964_s15  ;;  %v2376_v10 = vrot.slane %v2372_v26, 5  ;;  %v2352_v55 = vld [vmem:[#allocation2 + $0x4] sm:$0x11]  ;;  %v2218_v53 = vsel %vm5090_vm12, %v2216_v36, 0  ;;  %v4489_v54 = vpop.permute.xlu2 %2344  ;;  %vm5106_vm12 = vnez %v4944_v46 }
 0x3fa   : > { %2133 = vrot.lane.b32.xlu2 %v2128_v61, %s4887_s24  ;;  %v2336_v6 = vld [vmem:[#allocation2 + $0x4] sm:$0x11]  ;;  %v2354_v60 = vsel %vm5091_vm3, %v2352_v55, 0  ;;  %v2222_v45 = vrot.slane %v2218_v53, 6  ;;  %vm5107_vm3 = vnez %v4959_v34 }
 0x3fb   : > { %v2340_v51 = vrot.slane %v2336_v6, 7  ;;  %v2266_v3 = vld [vmem:[#allocation2 + $0x4] sm:$0x11]  ;;  %v2358_v32 = vrot.slane %v2354_v60, 6 }
 0x3fc   : > { %v2198_v58 = vld [vmem:[#allocation2 + $0x4] sm:$0x11]  ;;  %v2268_v42 = vsel %vm5092_vm13, %v2266_v3, 0  ;;  %vm5108_vm13 = vnez %v4869_v24  ;;  %v2414_v24 = vld [vmem:[%s4651_s6] sm:$0xf] }
 0x3fd   : > { %v2092_v11 = vld [vmem:[#allocation2 + $0x8] sm:$0x1]  ;;  %v2200_v31 = vsel %vm5093_vm2, %v2198_v58, 0  ;;  %v2272_v9 = vrot.slane %v2268_v42, 7  ;;  %v2107_v2 = vld [vmem:[#allocation2] sm:$0x11]  ;;  %vm5109_vm2 = vnez %v4951_v39 }
 0x3fe   : > { %v2096_v0 = vrot.slane %v2092_v11, 6  ;;  %v2074_v25 = vld [vmem:[#allocation2 + $0x8] sm:$0x1]  ;;  %v2204_v12 = vrot.slane %v2200_v31, 7  ;;  %v2109_v57 = vsel %vm5097_vm5, %v2107_v2, 0  ;;  %v4536_v34 = vpop.permute.xlu1 %2208 }
 0x3ff   : > { %1995 = vrot.lane.b32.xlu0 %v1991_v47, %s4948_s10  ;;  %v2234_v22 = vld [vmem:[#allocation2 + $0x4] sm:$0x11]  ;;  %v2076_v17 = vsel %vm5094_vm11, %v2074_v25, 0  ;;  %v2113_v38 = vrot.slane %v2109_v57, 5  ;;  %vm5110_vm11 = vnez %v4835_v49 }
 0x400   : > { %v2302_v63 = vld [vmem:[#allocation2 + $0x4] sm:$0x11]  ;;  %v2236_v27 = vsel %vm5095_vm15, %v2234_v22, 0  ;;  %v2080_v13 = vrot.slane %v2076_v17, 7  ;;  %vm5111_vm15 = vcmask 1043456  }
 0x401   : > { %2131 = vrot.lane.b32.xlu1 %v2127_v15, %s4887_s24  ;;  %v2304_v62 = vsel %vm5096_vm10, %v2302_v63, 0  ;;  %v2240_v35 = vrot.slane %v2236_v27, 5  ;;  %v2284_v33 = vld [vmem:[#allocation2 + $0x4] sm:$0x11]  ;;  %v4502_v41 = vpop.permute.xlu2 %2190  ;;  %vm5112_vm10 = vcmask 916480   ;;  %vm5113_vm5 = vmmov %vm5111_vm15 }
 0x402   : > { %2011 = vrot.lane.b32.xlu2 %v2009_v56, %s4957_s14  ;;  %v2308_v7 = vrot.slane %v2304_v62, 5  ;;  %v2108_v4 = vld [vmem:[#allocation2 + $0x8] sm:$0x1]  ;;  %v2286_v43 = vsel %vm5098_vm9, %v2284_v33, 0  ;;  %v2073_v37 = vld [vmem:[#allocation2] sm:$0x11]  ;;  %vm5114_vm9 = vmmov %vm5113_vm5 }
 0x403   : > { %v2110_v61 = vsel %vm5099_vm0, %v2108_v4, 0  ;;  %v2290_v47 = vrot.slane %v2286_v43, 6  ;;  %v2159_v28 = vld [vmem:[#allocation2] sm:$0x11]  ;;  %v2075_v40 = vsel %vm5100_vm4, %v2073_v37, 0  ;;  %v2331_v33 = vrot.slane %v4473_v19, 4 }
 0x404   : > { %v2114_v44 = vrot.slane %v2110_v61, 5  ;;  %v2141_v14 = vld [vmem:[#allocation2] sm:$0x11]  ;;  %v2161_v20 = vsel %vm5101_vm1, %v2159_v28, 0  ;;  %v2079_v56 = vrot.slane %v2075_v40, 7  ;;  %vm5115_vm0 = vcmask 769024   ;;  %vm5117_vm1 = vmmov %vm5113_vm5 }
 0x405   : > { %v2143_v18 = vsel %vm5102_vm14, %v2141_v14, 0  ;;  %v2165_v15 = vrot.slane %v2161_v20, 6  ;;  %v2142_v21 = vld [vmem:[#allocation2 + $0x8] sm:$0x1]  ;;  %v2039_v53 = vld [vmem:[#allocation2] sm:$0x11] }
 0x406   : > { %v2147_v26 = vrot.slane %v2143_v18, 7  ;;  %v2160_v16 = vld [vmem:[#allocation2 + $0x8] sm:$0x1]  ;;  %v2144_v8 = vsel %vm5104_vm6, %v2142_v21, 0  ;;  %v2041_v6 = vsel %vm5108_vm13, %v2039_v53, 0  ;;  %v2259_v22 = vpop.permute.xlu1 %2258  ;;  %vm5116_vm4 = vcmask 793600   ;;  %vm5120_vm6 = vmmov %vm5117_vm1 }
 0x407   : > { %2097 = vrot.lane.b32.xlu0 %v2095_v30, %s5007_s29  ;;  %v1972_v30 = vld [vmem:[#allocation2 + $0x8] sm:$0x1]  ;;  %v2162_v1 = vsel %vm5105_vm7, %v2160_v16, 0  ;;  %v2045_v3 = vrot.slane %v2041_v6, 5  ;;  %v2261_v62 = vrot.slane %v2259_v22, 4  ;;  %vm5118_vm14 = vcmask 146432   ;;  %vm5124_vm13 = vmmov %vm5117_vm1 }
 0x408   : > { %v1974_v59 = vsel %vm5103_vm8, %v1972_v30, 0  ;;  %v2166_v36 = vrot.slane %v2162_v1, 6  ;;  %v2022_v55 = vld [vmem:[#allocation2 + $0x8] sm:$0x1]  ;;  %vm5119_vm8 = vmmov %vm5117_vm1  ;;  %vm5121_vm7 = vcmask 932864  }
 0x409   : > { %1997 = vrot.lane.b32.xlu1 %v1992_v23, %s4948_s10  ;;  %v1978_v52 = vrot.slane %v1974_v59, 5  ;;  %v4513_v23 = vpop.permute.xlu2 %2244  ;;  %v2024_v50 = vsel %vm5107_vm3, %v2022_v55, 0  ;;  %v2040_v11 = vld [vmem:[#allocation2 + $0x8] sm:$0x1]  ;;  %vm5123_vm3 = vmmov %vm5117_vm1 }
 0x40a   : > { %2378 = vrot.lane.b32.xlu2 %v2376_v10, %s4969_s0  ;;  %v2148_v10 = vrot.slane %v2144_v8, 7 }
 0x40e   : > { %v4542_v63 = vpop.permute.xlu1 %2312 }
 0x40f   : > { %2013 = vrot.lane.b32.xlu0 %v2010_v5, %s4957_s14  ;;  %v1971_v5 = vld [vmem:[#allocation2] sm:$0x11] }
 0x410   : > { %v1973_v29 = vsel %vm5106_vm12, %v1971_v5, 0  ;;  %vm5122_vm12 = vcmask 1039360  }
 0x411   : > { %2342 = vrot.lane.b32.xlu1 %v2340_v51, %s4956_s11  ;;  %v1977_v60 = vrot.slane %v1973_v29, 5  ;;  %v2381_v51 = vpop.permute.xlu0 %2380  ;;  %v4528_v58 = vpop.permute.xlu2 %2294  ;;  %s3179_s11 = scalar_lea.hbm %s5162_s18, 16 }
 0x412   : > { %2224 = vrot.lane.b32.xlu2 %v2222_v45, %s4920_s16  ;;  %v2028_v45 = vrot.slane %v2024_v50, 6  ;;  %v2383_v4 = vrot.slane %v2381_v51, 4 }
 0x417   : > { %2360 = vrot.lane.b32.xlu0 %v2358_v32, %s5028_s27  ;;  %v2021_v32 = vld [vmem:[#allocation2] sm:$0x11]  ;;  %s2968_s27 = sld [smem:[#allocation8 + $0x2]] }
 0x418   : > { %v2023_v46 = vsel %vm5109_vm2, %v2021_v32, 0  ;;  %vm5125_vm2 = vcmask 908288  }
 0x419   : > { %2099 = vrot.lane.b32.xlu1 %v2096_v0, %s5007_s29  ;;  %v2027_v42 = vrot.slane %v2023_v46, 6  ;;  %v2227_v31 = vpop.permute.xlu0 %2226  ;;  %v2042_v0 = vsel %vm5110_vm11, %v2040_v11, 0  ;;  %vm5126_vm11 = vcmask 113664  }
 0x41a   : > { %2274 = vrot.lane.b32.xlu2 %v2272_v9, %s5021_s30  ;;  %v2046_v25 = vrot.slane %v2042_v0, 5  ;;  %v4566_v0 = vpop.f32.mrf.mxu1  ;;  %s5161_s30 = sld [smem:[#allocation22_spill]] }
 0x41f   : > { %2206 = vrot.lane.b32.xlu0 %v2204_v12, %s4962_s20 }
 0x420   : > { %s5163_s16 = sshll.u32 %s5161_s30, 3 }
 0x421   : > { %2242 = vrot.lane.b32.xlu1 %v2240_v35, %s5016_s17  ;;  %v2277_v12 = vpop.permute.xlu0 %2276 }
 0x422   : > { %2083 = vrot.lane.b32.xlu2 %v2080_v13, %s4931_s19  ;;  %v2279_v5 = vrot.slane %v2277_v12, 4 }
 0x427   : > { %2310 = vrot.lane.b32.xlu0 %v2308_v7, %s5038_s8 }
 0x429   : > { %2292 = vrot.lane.b32.xlu1 %v2290_v47, %s4898_s25 }
 0x42a   : > { %2115 = vrot.lane.b32.xlu2 %v2113_v38, %s5004_s28 }
 0x42f   : > { %2117 = vrot.lane.b32.xlu0 %v2114_v44, %s5004_s28 }
 0x431   : > { %2081 = vrot.lane.b32.xlu1 %v2079_v56, %s4931_s19  ;;  %v2193_v56 = vrot.slane %v4502_v41, 4 }
 0x432   : > { %2167 = vrot.lane.b32.xlu2 %v2165_v15, %s4870_s21  ;;  %v2229_v15 = vrot.slane %v2227_v31, 4 }
 0x437   : > { %2149 = vrot.lane.b32.xlu0 %v2147_v26, %s5001_s4 }
 0x439   : > { %2151 = vrot.lane.b32.xlu1 %v2148_v10, %s5001_s4 }
 0x43a   : > { %1981 = vrot.lane.b32.xlu2 %v1978_v52, %s4949_s26 }
 0x43f   : > { %2169 = vrot.lane.b32.xlu0 %v2166_v36, %s4870_s21  ;;  %s337_s21 = scalar_lea.vmem [#allocation9], %s5163_s16 }
 0x440   : > { %s2649_s19 = sshll.u32 %s337_s21, 4  ;;  %s2650_s19 = int_to_ptr.vmem [resolvable:$true] %s2649_s19 }
 0x441   : > { %1979 = vrot.lane.b32.xlu1 %v1977_v60, %s4949_s26  ;;  %s2636_s26 = scalar_lea.sflag [#allocation6], %s5161_s30 }
 0x442   : > { %2031 = vrot.lane.b32.xlu2 %v2028_v45, %s4955_s13 }
 0x447   : > { %2047 = vrot.lane.b32.xlu0 %v2045_v3, %s5014_s1 }
 0x449   : > { %2029 = vrot.lane.b32.xlu1 %v2027_v42, %s4955_s13 }
 0x44a   : > { %2417 = vperm.xlu2 %3112, %v2414_v24  }
 0x44c   : > { %v2064_v9 = vpop.permute.xlu2 %2063 }
 0x44d   : > { %v2067_v38 = vrot.slane %v2064_v9, 4 }
 0x451   : > { %2049 = vrot.lane.b32.xlu1 %v2046_v25, %s5014_s1  ;;  %v4568_v25 = vpop.f32.mrf.mxu3  ;;  %s5160_s1 = sld [smem:[#allocation17_spill]] }
 0x454   : > { %v2134_v39 = vpop.permute.xlu2 %2133 }
 0x455   : > { %v2136_v36 = vrot.slane %v2134_v39, 4  ;;  %v2347_v39 = vrot.slane %v4489_v54, 4 }
 0x457   : > { %s3029_s12 = sshll.u32 %s5160_s1, 3 }
 0x45c   : > { %v2012_v17 = vpop.permute.xlu2 %2011 }
 0x45d   : > { %v2015_v46 = vrot.slane %v2012_v17, 4 }
 0x461   : > { %v2257_v27 = vpop.permute.xlu0 %2256 }
 0x462   : > { %v2260_v13 = vrot.slane %v2257_v27, 4 }
 0x463   : > { %v2327_v49 = vpop.permute.xlu1 %2326 }
 0x464   : > { %v2262_v35 = vsel %vm5111_vm15, %v2260_v13, %v2261_v62  ;;  %v2379_v7 = vpop.permute.xlu2 %2378  ;;  %v2330_v43 = vrot.slane %v2327_v49, 4  ;;  %vm5127_vm15 = vmmov %vm5117_vm1  ;;  %v2365_v62 = vrot.slane %v4522_v48, 4 }
 0x465   : > { %v2263_v2 = vsel %vm5112_vm10, %v2257_v27, %v2262_v35  ;;  %v2382_v57 = vrot.slane %v2379_v7, 4  ;;  %vm5128_vm10 = vcmask 269312  }
 0x466   : > { %2265 = vst [vmem:[#allocation3 + $0xb8] sm:$0x11] %v2263_v2  ;;  %v2332_v37 = vsel %vm5114_vm9, %v2330_v43, %v2331_v33  ;;  %vm5130_vm9 = vcmask 261120   ;;  %v2571_v33 = vpop.f32.mrf.mxu1 }
 0x467   : > { %v2384_v47 = vsel %vm5113_vm5, %v2382_v57, %v2383_v4  ;;  %v2333_v14 = vsel %vm5116_vm4, %v2327_v49, %v2332_v37  ;;  %vm5129_vm5 = vmmov %vm5117_vm1  ;;  %vm5132_vm4 = vcmask 785408   ;;  %v2597_v49 = vpop.f32.mrf.mxu3 }
 0x468   : > { %v2385_v28 = vsel %vm5115_vm0, %v2379_v7, %v2384_v47  ;;  %2335 = vst [vmem:[#allocation3 + $0xc0] sm:$0x11] %v2333_v14  ;;  %vm5131_vm0 = vmmov %vm5117_vm1 }
 0x469   : > { %v2066_v61 = vpop.permute.xlu0 %2065  ;;  %2387 = vst [vmem:[#allocation3 + $0xc0] sm:$0x88] %v2385_v28 }
 0x46a   : > { %v2068_v44 = vrot.slane %v2066_v61, 4  ;;  %v2211_v61 = vrot.slane %v4536_v34, 4 }
 0x46b   : > { %v2189_v18 = vpop.permute.xlu1 %2188 }
 0x46c   : > { %v2069_v40 = vsel %vm5117_vm1, %v2067_v38, %v2068_v44  ;;  %v2225_v20 = vpop.permute.xlu2 %2224  ;;  %v2192_v21 = vrot.slane %v2189_v18, 4  ;;  %vm5133_vm1 = vmmov %vm5131_vm0 }
 0x46d   : > { %v2070_v19 = vsel %vm5118_vm14, %v2064_v9, %v2069_v40  ;;  %v2228_v30 = vrot.slane %v2225_v20, 4  ;;  %vm5134_vm14 = vcmask 777216  }
 0x46e   : > { %2072 = vst [vmem:[#allocation3 + $0xa0] sm:$0x11] %v2070_v19  ;;  %v2194_v59 = vsel %vm5120_vm6, %v2192_v21, %v2193_v56  ;;  %vm5136_vm6 = vcmask 130048  }
 0x46f   : > { %v2230_v16 = vsel %vm5119_vm8, %v2228_v30, %v2229_v15  ;;  %v2195_v1 = vsel %vm5122_vm12, %v2189_v18, %v2194_v59  ;;  %vm5135_vm8 = vmmov %vm5131_vm0  ;;  %vm5138_vm12 = vcmask 1031168   ;;  %v2247_v18 = vrot.slane %v4513_v23, 4 }
 0x470   : > { %v2231_v8 = vsel %vm5121_vm7, %v2225_v20, %v2230_v16  ;;  %2197 = vst [vmem:[#allocation3 + $0xb0] sm:$0x11] %v2195_v1  ;;  %vm5137_vm7 = vmmov %vm5131_vm0  ;;  %v2315_v30 = vrot.slane %v4542_v63, 4 }
 0x471   : > { %v1996_v26 = vpop.permute.xlu0 %1995  ;;  %2233 = vst [vmem:[#allocation3 + $0xb0] sm:$0x44] %v2231_v8 }
 0x472   : > { %v1999_v51 = vrot.slane %v1996_v26, 4 }
 0x473   : > { %v2132_v10 = vpop.permute.xlu1 %2131 }
 0x474   : > { %v2275_v52 = vpop.permute.xlu2 %2274  ;;  %v2135_v41 = vrot.slane %v2132_v10, 4 }
 0x475   : > { %v2278_v55 = vrot.slane %v2275_v52, 4 }
 0x476   : > { %v2137_v50 = vsel %vm5124_vm13, %v2135_v41, %v2136_v36  ;;  %vm5140_vm13 = vmmov %vm5131_vm0 }
 0x477   : > { %v2280_v29 = vsel %vm5123_vm3, %v2278_v55, %v2279_v5  ;;  %v2138_v60 = vsel %vm5126_vm11, %v2132_v10, %v2137_v50  ;;  %vm5139_vm3 = vmmov %vm5131_vm0  ;;  %vm5142_vm11 = vcmask 924672   ;;  %v2297_v5 = vrot.slane %v4528_v58, 4 }
 0x478   : > { %v2281_v6 = vsel %vm5125_vm2, %v2275_v52, %v2280_v29  ;;  %2140 = vst [vmem:[#allocation3 + $0xa8] sm:$0x11] %v2138_v60  ;;  %vm5141_vm2 = vmmov %vm5131_vm0 }
 0x479   : > { %v2098_v53 = vpop.permute.xlu0 %2097  ;;  %2283 = vst [vmem:[#allocation3 + $0xb8] sm:$0x22] %v2281_v6 }
 0x47a   : > { %v2101_v57 = vrot.slane %v2098_v53, 4 }
 0x47b   : > { %v1998_v45 = vpop.permute.xlu1 %1997 }
 0x47c   : > { %v2000_v3 = vrot.slane %v1998_v45, 4  ;;  %v2084_v44 = vpop.permute.xlu2 %2083 }
 0x47e   : > { %v2001_v24 = vsel %vm5127_vm15, %v1999_v51, %v2000_v3  ;;  %vm5143_vm15 = vmmov %vm5131_vm0  ;;  %v2086_v51 = vrot.slane %v2084_v44, 4 }
 0x47f   : > { %v2002_v11 = vsel %vm5128_vm10, %v1996_v26, %v2001_v24  ;;  %vm5144_vm10 = vcmask 801792  }
 0x480   : > { %2004 = vst [vmem:[#allocation3 + $0x98] sm:$0x11] %v2002_v11 }
 0x481   : > { %v2014_v32 = vpop.permute.xlu0 %2013 }
 0x482   : > { %v2016_v42 = vrot.slane %v2014_v32, 4 }
 0x483   : > { %v2343_v22 = vpop.permute.xlu1 %2342 }
 0x484   : > { %v2017_v31 = vsel %vm5129_vm5, %v2015_v46, %v2016_v42  ;;  %v2346_v12 = vrot.slane %v2343_v22, 4  ;;  %v2116_v10 = vpop.permute.xlu2 %2115  ;;  %vm5145_vm5 = vmmov %vm5131_vm0 }
 0x485   : > { %v2018_v9 = vsel %vm5130_vm9, %v2012_v17, %v2017_v31  ;;  %v2119_v41 = vrot.slane %v2116_v10, 4  ;;  %vm5146_vm9 = vcmask 900096  }
 0x486   : > { %2020 = vst [vmem:[#allocation3 + $0x98] sm:$0x22] %v2018_v9  ;;  %v2348_v13 = vsel %vm5131_vm0, %v2346_v12, %v2347_v39 }
 0x487   : > { %v2349_v2 = vsel %vm5132_vm4, %v2343_v22, %v2348_v13  ;;  %vm5147_vm4 = vcmask 121856  }
 0x488   : > { %2351 = vst [vmem:[#allocation3 + $0xc0] sm:$0x22] %v2349_v2 }
 0x489   : > { %v2361_v27 = vpop.permute.xlu0 %2360 }
 0x48a   : > { %v2364_v35 = vrot.slane %v2361_v27, 4 }
 0x48b   : > { %v2100_v4 = vpop.permute.xlu1 %2099 }
 0x48c   : > { %v2366_v17 = vsel %vm5133_vm1, %v2364_v35, %v2365_v62  ;;  %v2102_v54 = vrot.slane %v2100_v4, 4  ;;  %v2168_v32 = vpop.permute.xlu2 %2167  ;;  %vm5148_vm1 = vmmov %vm5131_vm0 }
 0x48d   : > { %v2367_v7 = vsel %vm5134_vm14, %v2361_v27, %v2366_v17  ;;  %vm5149_vm14 = vcmask 138240   ;;  %v2171_v35 = vrot.slane %v2168_v32, 4 }
 0x48e   : > { %2369 = vst [vmem:[#allocation3 + $0xc0] sm:$0x44] %v2367_v7  ;;  %v2103_v48 = vsel %vm5135_vm8, %v2101_v57, %v2102_v54  ;;  %vm5150_vm8 = vmmov %vm5131_vm0 }
 0x48f   : > { %v2104_v47 = vsel %vm5136_vm6, %v2098_v53, %v2103_v48  ;;  %vm5151_vm6 = vcmask 15360  }
 0x490   : > { %2106 = vst [vmem:[#allocation3 + $0xa0] sm:$0x44] %v2104_v47 }
 0x491   : > { %v2207_v43 = vpop.permute.xlu0 %2206 }
 0x492   : > { %v2210_v38 = vrot.slane %v2207_v43, 4 }
 0x493   : > { %v2243_v20 = vpop.permute.xlu1 %2242 }
 0x494   : > { %v2212_v37 = vsel %vm5137_vm7, %v2210_v38, %v2211_v61  ;;  %v2246_v56 = vrot.slane %v2243_v20, 4  ;;  %v1982_v7 = vpop.permute.xlu2 %1981  ;;  %vm5152_vm7 = vmmov %vm5131_vm0 }
 0x495   : > { %v2213_v28 = vsel %vm5138_vm12, %v2207_v43, %v2212_v37  ;;  %v2413_v14 = vld [vmem:[#allocation3 + $0xc0] sm:$0xff]  ;;  %vm5153_vm12 = vcmask 7168   ;;  %v1984_v54 = vrot.slane %v1982_v7, 4  ;;  %v2423_v37 = vld.sshfl [vmem:[#allocation1 + $0x8] sm:$0xff pattern:$0x73625140] }
 0x496   : > { %2215 = vst [vmem:[#allocation3 + $0xb0] sm:$0x22] %v2213_v28  ;;  %v2498_v40 = vunpack.c.l.b16 %v2413_v14  ;;  %v2499_v19 = vunpack.c.h.b16 %v2413_v14  ;;  %v2248_v26 = vsel %vm5139_vm3, %v2246_v56, %v2247_v18  ;;  %vm5154_vm3 = vmmov %vm5131_vm0 }
 0x497   : > { %v2249_v1 = vsel %vm5142_vm11, %v2243_v20, %v2248_v26  ;;  %vm5157_vm11 = vcmask 252928  }
 0x498   : > { %v2524_v34 = vpack.c.b16 %v2498_v40, %v2498_v40  ;;  %v2525_v15 = vpack.c.b16 %v2499_v19, %v2499_v19  ;;  %2251 = vst [vmem:[#allocation3 + $0xb0] sm:$0x88] %v2249_v1  ;;  %v2620_v40 = vld [vmem:[%s3401_s7] sm:$0xff]  ;;  %s2647_s7 = scalar_lea.hbm %s5162_s18, %s3029_s12 }
 0x499   : > { %v2311_v21 = vpop.permute.xlu0 %2310  ;;  %2622 = vst [vmem:[#allocation1] ss:$2 sm:$0xff] %v2620_v40  ;;  %s2651_s20 = sshll.u32 %s2647_s7, 4  ;;  %s2652_s20 = int_to_ptr.hbm [resolvable:$true] %s2651_s20 }
 0x49a   : > { %v2314_v16 = vrot.slane %v2311_v21, 4  ;;  %v2555_v59 = vsel %vm5140_vm13, %v2524_v34, 0  ;;  %v2558_v8 = vsel %vm5141_vm2, %v2525_v15, 0  ;;  %vm5155_vm13 = vcmask 277504   ;;  %vm5156_vm2 = vmmov %vm5131_vm0  ;;  %s3173_s24 = sshra.s32 %s2652_s20, 4  ;;  %s3174_s24 = int_to_ptr.hbm [resolvable:$true] %s3173_s24 }
 0x49b   : > { %2576 = vmatpush.bf16.msra.mxu2 %v2555_v59  ;;  %2602 = vmatpush.bf16.msra.mxu0 %v2558_v8  ;;  %v2293_v63 = vpop.permute.xlu1 %2292  ;;  %s3175_s10 = scalar_lea.hbm %s3174_s24, 8  ;;  %p3180_p9 = scmp.lt.s32.totalorder %s3174_s24, %s5162_s18 }
 0x49c   : > { %v2316_v23 = vsel %vm5143_vm15, %v2314_v16, %v2315_v30  ;;  %v2296_v36 = vrot.slane %v2293_v63, 4  ;;  %v2032_v44 = vpop.permute.xlu2 %2031  ;;  %vm5158_vm15 = vmmov %vm5131_vm0  ;;  %p3176_p1 = scmp.ne.s32.totalorder %s3174_s24, %s3175_s10  ;;  %p3181_p10 = scmp.lt.s32.totalorder %s3179_s11, %s3175_s10 }
 0x49d   : > { %v2317_v52 = vsel %vm5144_vm10, %v2311_v21, %v2316_v23  ;;  %v2034_v56 = vrot.slane %v2032_v44, 4  ;;  %vm5159_vm10 = vcmask 244736  }
 0x49e   : > { %2319 = vst [vmem:[#allocation3 + $0xb8] sm:$0x88] %v2317_v52  ;;  %v2298_v53 = vsel %vm5145_vm5, %v2296_v36, %v2297_v5  ;;  %vm2550_vm5 = vcmask 588800   ;;  %p3177_p4 = pnand %p3176_p1, %p3368_p3  ;;  %p3182_p2 = por %p3181_p10, %p3180_p9 }
 0x49f   : > { %v2299_v50 = vsel %vm5146_vm9, %v2293_v63, %v2298_v53  ;;  %v2960_v24 = vld [vmem:[#allocation3 + $0xb0] sm:$0xf]  ;;  %v3027_v31 = vld [vmem:[#allocation3 + $0xb4] sm:$0xf]  ;;  %v2936_v53 = vld [vmem:[#allocation3 + $0x80] sm:$0xf] }
 0x4a0   : > { %2301 = vst [vmem:[#allocation3 + $0xb8] sm:$0x44] %v2299_v50  ;;  %p3178_p8 = pneg %p3177_p4 }
 0x4a1   : > { %v2118_v55 = vpop.permute.xlu0 %2117 }
 0x4a2   : > { %v2120_v29 = vrot.slane %v2118_v55, 4  ;;  %v3022_v55 = vld [vmem:[#allocation3 + $0x84] sm:$0xf0]  ;;  %p3183_p11 = pnand %p3182_p2, %p3178_p8 }
 0x4a3   : > { %v2082_v45 = vpop.permute.xlu1 %2081  ;;  %v2937_v50 = vor.u32 %v3022_v55, %v2936_v53 }
 0x4a4   : > { %v2121_v6 = vsel %vm5131_vm0, %v2119_v41, %v2120_v29  ;;  %v2085_v3 = vrot.slane %v2082_v45, 4  ;;  %v2938_v41 = vld [vmem:[#allocation3 + $0x88] sm:$0xf0]  ;;  %v3021_v29 = vld [vmem:[#allocation3 + $0x84] sm:$0xf] }
 0x4a5   : > { %v2122_v60 = vsel %vm5147_vm4, %v2116_v10, %v2121_v6  ;;  %v2941_v6 = vor.u32 %v3021_v29, %v2938_v41  ;;  %vm5165_vm4 = vmmov %vm5148_vm1 }
 0x4a6   : > { %2124 = vst [vmem:[#allocation3 + $0xa0] sm:$0x88] %v2122_v60  ;;  %v2087_v58 = vsel %vm5148_vm1, %v2085_v3, %v2086_v51  ;;  %v2418_v60 = vpop.permute.xlu2 %2417  ;;  %v2615_v3 = vstv %s2968_s27 }
 0x4a7   : > { %v2088_v42 = vsel %vm5149_vm14, %v2082_v45, %v2087_v58  ;;  %v3028_v11 = vld [vmem:[#allocation3 + $0xb4] sm:$0xf0]  ;;  %v2962_v9 = vld [vmem:[#allocation3 + $0xb8] sm:$0xf0]  ;;  %v2596_v45 = vadd.f32 %v4568_v25, %v2418_v60  ;;  %v2570_v58 = vadd.f32 %v4566_v0, %v2418_v60 }
 0x4a8   : > { %2090 = vst [vmem:[#allocation3 + $0xa0] sm:$0x22] %v2088_v42  ;;  %v2961_v22 = vor.u32 %v3028_v11, %v2960_v24  ;;  %v2965_v39 = vor.u32 %v3027_v31, %v2962_v9  ;;  %v2624_v42 = vld.sshfl [vmem:[#allocation1 + $0x8] sm:$0xff pattern:$0x75316420] }
 0x4a9   : > { %v2150_v46 = vpop.permute.xlu0 %2149 }
 0x4aa   : > { %v2153_v12 = vrot.slane %v2150_v46, 4  ;;  %2577 = vmatpush.bf16.msra.mxu2 %v2961_v22  ;;  %2603 = vmatpush.bf16.msra.mxu0 %v2965_v39  ;;  %v2623_v39 = vld.sshfl [vmem:[#allocation1] sm:$0xff pattern:$0x75316420] }
 0x4ab   : > { %v2152_v27 = vpop.permute.xlu1 %2151 }
 0x4ac   : > { %v2154_v62 = vrot.slane %v2152_v27, 4 }
 0x4ae   : > { %v2155_v2 = vsel %vm5150_vm8, %v2153_v12, %v2154_v62 }
 0x4af   : > { %v2156_v49 = vsel %vm5151_vm6, %v2150_v46, %v2155_v2  ;;  %v2952_v38 = vld [vmem:[#allocation3 + $0xa0] sm:$0xf]  ;;  %v3025_v47 = vld [vmem:[#allocation3 + $0xa4] sm:$0xf] }
 0x4b0   : > { %2158 = vst [vmem:[#allocation3 + $0xa8] sm:$0x22] %v2156_v49 }
 0x4b1   : > { %v2170_v13 = vpop.permute.xlu0 %2169 }
 0x4b2   : > { %v2172_v17 = vrot.slane %v2170_v13, 4 }
 0x4b3   : > { %v1980_v57 = vpop.permute.xlu1 %1979 }
 0x4b4   : > { %v2173_v33 = vsel %vm5152_vm7, %v2171_v35, %v2172_v17  ;;  %v1983_v43 = vrot.slane %v1980_v57, 4 }
 0x4b5   : > { %v2174_v4 = vsel %vm5153_vm12, %v2168_v32, %v2173_v33 }
 0x4b6   : > { %2176 = vst [vmem:[#allocation3 + $0xa8] sm:$0x44] %v2174_v4  ;;  %v1985_v61 = vsel %vm5154_vm3, %v1983_v43, %v1984_v54 }
 0x4b7   : > { %v1986_v48 = vsel %vm5155_vm13, %v1980_v57, %v1985_v61 }
 0x4b8   : > { %1988 = vst [vmem:[#allocation3 + $0x90] sm:$0x88] %v1986_v48 }
 0x4b9   : > { %v2048_v21 = vpop.permute.xlu0 %2047 }
 0x4ba   : > { %v2051_v16 = vrot.slane %v2048_v21, 4 }
 0x4bb   : > { %v2030_v18 = vpop.permute.xlu1 %2029 }
 0x4bc   : > { %v2033_v34 = vrot.slane %v2030_v18, 4 }
 0x4bd   : > { %v3026_v28 = vld [vmem:[#allocation3 + $0xa4] sm:$0xf0]  ;;  %v2954_v14 = vld [vmem:[#allocation3 + $0xa8] sm:$0xf0] }
 0x4be   : > { %v2953_v19 = vor.u32 %v3026_v28, %v2952_v38  ;;  %v2957_v20 = vor.u32 %v3025_v47, %v2954_v14  ;;  %v2035_v15 = vsel %vm5156_vm2, %v2033_v34, %v2034_v56 }
 0x4bf   : > { %v2036_v30 = vsel %vm5157_vm11, %v2030_v18, %v2035_v15  ;;  %v2944_v23 = vld [vmem:[#allocation3 + $0x90] sm:$0xf]  ;;  %v3023_v10 = vld [vmem:[#allocation3 + $0x94] sm:$0xf] }
 0x4c0   : > { %2578 = vmatpush.bf16.msra.mxu2 %v2953_v19  ;;  %2604 = vmatpush.bf16.msra.mxu0 %v2957_v20  ;;  %2038 = vst [vmem:[#allocation3 + $0x98] sm:$0x44] %v2036_v30 }
 0x4c3   : > { %v2050_v26 = vpop.permute.xlu1 %2049 }
 0x4c4   : > { %v2052_v59 = vrot.slane %v2050_v26, 4 }
 0x4c6   : > { %v2053_v8 = vsel %vm5158_vm15, %v2051_v16, %v2052_v59 }
 0x4c7   : > { %v2054_v1 = vsel %vm5159_vm10, %v2048_v21, %v2053_v8 }
 0x4c8   : > { %2056 = vst [vmem:[#allocation3 + $0x98] sm:$0x88] %v2054_v1 }
 0x4cf   : > { %v3024_v52 = vld [vmem:[#allocation3 + $0x94] sm:$0xf0]  ;;  %v2946_v63 = vld [vmem:[#allocation3 + $0x98] sm:$0xf0] }
 0x4d0   : > { %v2945_v5 = vor.u32 %v3024_v52, %v2944_v23  ;;  %v2949_v36 = vor.u32 %v3023_v10, %v2946_v63 }
 0x4d2   : > { %2579 = vmatpush.bf16.msra.mxu2 %v2945_v5  ;;  %2605 = vmatpush.bf16.msra.mxu0 %v2949_v36 }
 0x4d6   : > { %2580 = vmatpush.bf16.msra.mxu2 %v2937_v50  ;;  %2606 = vmatpush.bf16.msra.mxu0 %v2941_v6 }
 0x4d9   : > { %2966 = vmatmul.msk.bf16.vlgmr.msra.gmra.mxu2 %vm2550_vm5, %v2423_v37  ;;  %2967 = vmatmul.msk.bf16.vlgmr.msra.gmra.mxu0 %vm2550_vm5, %v2423_v37 }
 0x556   : > { %v2608_v51 = vpop.f32.mrf.mxu0 }
 0x557   : > { %v2609_v32 = vadd.f32 %v2608_v51, %v2596_v45 }
 0x559   : > { %vm2614_vm9 = vcmp.ge.f32.partialorder %v2609_v32, 0.0  ;;  %v2617_v46 = vmul.f32 %v2615_v3, %v2609_v32 }
 0x55b   : > { %v2619_v24 = vsel %vm2614_vm9, %v2609_v32, %v2617_v46 }
 0x55c   : > { %v2582_v11 = vpop.f32.mrf.mxu2  ;;  %v2628_v9 = vadd.f32 %v2624_v42, %v2619_v24 }
 0x55d   : > { %v2583_v31 = vadd.f32 %v2582_v11, %v2570_v58 }
 0x55e   : > { %v2610_v25 = vpop.f32.mrf.mxu0  ;;  %v2631_v12 = vrot.slane %v2628_v9, 4 }
 0x55f   : > { %vm2613_vm0 = vcmp.ge.f32.partialorder %v2583_v31, 0.0  ;;  %v2616_v22 = vmul.f32 %v2615_v3, %v2583_v31 }
 0x561   : > { %v2618_v0 = vsel %vm2613_vm0, %v2583_v31, %v2616_v22 }
 0x562   : > { %v2627_v27 = vadd.f32 %v2623_v39, %v2618_v0 }
 0x564   : > { %v2584_v62 = vpop.f32.mrf.mxu2  ;;  %v2632_v13 = vsel %vm5165_vm4, %v2627_v27, %v2631_v12 }
 0x565   : > { %2634 = vst [vmem:[%s337_s21] sm:$0xff] %v2632_v13 }
 0x566   : > { %3186 = shalt.err (!%p3183_p11)
}
 0x567   : > { %3036 = dma.vmem_to_hbm [thread:$0]  (%p3368_p3), %s2650_s19, 128, %s2652_s20, %s2636_s26  }
 0x568 PF: > { %s5166_s28 = sld [smem:[#allocation13_spill]] }
 0x569   : > { %s5168_s23 = sld [smem:[#allocation16_spill]] }
 0x56e   : > { %s2663_s9 = sand.u32 1, %s5166_s28  }
 0x56f   : > { %p5169_p12 = scmp.ge.s32.totalorder %s5168_s23, 2  ;;  %s2664_s0 = scalar_lea.sflag [#allocation6], %s2663_s9 }
 0x571   : > { %p3047_p13 = pnand %p5169_p12, %p3337_p6 }
 0x573   : > { %p3048_p0 = pneg %p3047_p13 }
 0x575   : > { %3212 = dma.done.wait (%p3048_p0), %s2664_s0, 128  }
 0x576   : > { %3214 = vsyncadd (%p3048_p0), %s2664_s0, 4294967168  ;;  %s5170_s30 = sld [smem:[#allocation19_spill]] }
 0x577   : > { %s5171_s27 = sld [smem:[#allocation14_spill]] }
 0x578   : > { %s5172_s28 = sld [smem:[#allocation15_spill]] }
 0x579   : > { %s5173_s29 = sld [smem:[#allocation20_spill]] }
 0x57c   : > { %p22_p5 = scmp.ge.s32.totalorder %s5170_s30, 4  }
 0x57e   :  { %24 = sbr.rel (!%p22_p5) target bundleno = 12 (0xc), region = 102 }
 0x583   :  { %2670 = vsyncpa [#allocation5], 1 }
 0x584   :  { %2672 = vsyncpa [#allocation5 + $0x1], 1 }
 0x585   :  { %2673 = vsyncpa [#allocation6], 1 }
 0x586   :  { %2675 = vsyncpa [#allocation6 + $0x1], 1 }
 0x587   :  { %2676 = vsyncpa [#allocation7], 1 }
 0x588   :  { %2678 = vsyncpa [#allocation7 + $0x1], 1 }

</bundles_post_ra>
